<compile_context>
chip_gen: v7x
topology: tpu7x:2x2x1
jax: 0.10.0
libtpu: 0.0.40
codegen_flags: <defaults>
</compile_context>

<pallas_src>
import functools

import jax
import jax.numpy as jnp
from jax.experimental import pallas as pl
from jax.experimental.pallas import tpu as pltpu

C0, C1 = 16, 32      # backbone channel widths
VMEM_LIMIT = 32 * 1024 * 1024


# --------------------------------------------------------------------------
# Slab layout helpers (channels on sublanes, flattened padded pixels on lanes)
# --------------------------------------------------------------------------

def slab_geom(h, w):
    """(Hp, Wp, Lv=Hp*Wp, guard, S=Lv+2*guard) for an HxW feature map."""
    hp, wp = h + 2, w + 2
    lv = hp * wp
    g = wp + 1                      # guard: every 3x3 tap is an in-bounds lane shift
    return hp, wp, lv, g, lv + 2 * g


def ring_mask(h, w):
    """(1, Lv) f32 mask: 1 on interior pixels, 0 on the zero-padding ring."""
    hp, wp = h + 2, w + 2
    m = jnp.zeros((hp, wp), jnp.float32).at[1:h + 1, 1:w + 1].set(1.0)
    return m.reshape(1, hp * wp)


def image_to_slab(x, h, w):
    """x: (B, C, h, w) f32 -> (B, C, S) bf16 zero-padded, guarded slab."""
    _, _, _, g, _ = slab_geom(h, w)
    b, c = x.shape[0], x.shape[1]
    xp = jnp.pad(x, ((0, 0), (0, 0), (1, 1), (1, 1)))
    flat = xp.reshape(b, c, (h + 2) * (w + 2))
    flat = jnp.pad(flat, ((0, 0), (0, 0), (g, g)))
    return flat.astype(jnp.bfloat16)


def pack_taps(w):
    """(Cout, Cin, 3, 3) f32 -> (9, Cout, Cin) bf16, tap index k = kh*3 + kw."""
    cout, cin = w.shape[0], w.shape[1]
    return jnp.transpose(w, (2, 3, 0, 1)).reshape(9, cout, cin).astype(jnp.bfloat16)


# --------------------------------------------------------------------------
# Fused 3x3 conv kernel on the slab layout (sum of 9 shifted MXU matmuls)
# --------------------------------------------------------------------------

def _conv_slab_kernel(*refs, wp, g, lv, relu, has_skip):
    if has_skip:
        x_ref, w_ref, b_ref, m_ref, skip_ref, o_ref = refs
    else:
        x_ref, w_ref, b_ref, m_ref, o_ref = refs

    cout = o_ref.shape[0]
    acc = jnp.zeros((cout, lv), jnp.float32)
    for k in range(9):                              # unrolled: 9 lane-shifted MXU matmuls
        kh, kw = k // 3, k % 3
        d = (kh - 1) * wp + (kw - 1)                # flat offset of this tap
        xs = x_ref[:, g + d:g + d + lv]             # (Cin, Lv) bf16, in-bounds via guard
        acc += jnp.dot(w_ref[k], xs, preferred_element_type=jnp.float32)

    acc = acc + b_ref[...]                          # (Cout, 1) bias, f32
    if has_skip:
        acc = acc + skip_ref[:, g:g + lv].astype(jnp.float32)   # fused residual
    if relu:
        acc = jnp.maximum(acc, 0.0)
    acc = acc * m_ref[...]                          # zero the padding ring

    zeros_g = jnp.zeros((cout, g), o_ref.dtype)
    o_ref[:, 0:g] = zeros_g                         # guard
    o_ref[:, g:g + lv] = acc.astype(o_ref.dtype)    # lane-dense center store
    o_ref[:, g + lv:g + lv + g] = zeros_g           # guard


def conv_slab(x, w_taps, bias, mask, h, wsz, *, relu=True, skip=None):
    """3x3 stride-1 'same' conv on the slab layout.

    x: (B, Cin, S) bf16, w_taps: (9, Cout, Cin) bf16, bias: (Cout, 1) f32,
    mask: (1, Lv) f32.  Returns (B, Cout, S) bf16 with ring & guard zeroed.
    """
    B, cin, S = x.shape
    cout = w_taps.shape[1]
    hp, wp, lv, g, s = slab_geom(h, wsz)
    assert S == s

    in_specs = [
        pl.BlockSpec((None, cin, S), lambda b: (b, 0, 0)),
        pl.BlockSpec((9, cout, cin), lambda b: (0, 0, 0)),
        pl.BlockSpec((cout, 1), lambda b: (0, 0)),
        pl.BlockSpec((1, lv), lambda b: (0, 0)),
    ]
    args = [x, w_taps, bias, mask]
    if skip is not None:
        in_specs.append(pl.BlockSpec((None, cout, S), lambda b: (b, 0, 0)))
        args.append(skip)

    flops = 2 * 9 * B * cout * cin * lv
    bytes_acc = (2 * (x.size + w_taps.size + B * cout * S
                      + (skip.size if skip is not None else 0))
                 + 4 * (bias.size + mask.size))

    return pl.pallas_call(
        functools.partial(_conv_slab_kernel, wp=wp, g=g, lv=lv,
                          relu=relu, has_skip=skip is not None),
        out_shape=jax.ShapeDtypeStruct((B, cout, S), jnp.bfloat16),
        grid=(B,),
        in_specs=in_specs,
        out_specs=pl.BlockSpec((None, cout, S), lambda b: (b, 0, 0)),
        compiler_params=pltpu.CompilerParams(
            dimension_semantics=("parallel",),
            vmem_limit_bytes=VMEM_LIMIT),
        cost_estimate=pl.CostEstimate(flops=flops, transcendentals=0,
                                      bytes_accessed=bytes_acc),
    )(*args)


def downsample_to_slab(y, h_in, w_in, h_out, w_out):
    """Stride-2 sub-sampling of a full-resolution conv slab + re-slab at the
    lower resolution (equivalent to a stride-2 conv).  Tiny XLA glue at the
    single resolution change of the backbone."""
    B, C, _ = y.shape
    hp_i, wp_i, lv_i, g_i, _ = slab_geom(h_in, w_in)
    _, _, _, g_o, _ = slab_geom(h_out, w_out)
    grid = y[:, :, g_i:g_i + lv_i].reshape(B, C, hp_i, wp_i)
    grid = grid[:, :, 1:1 + 2 * h_out:2, 1:1 + 2 * w_out:2]     # (B, C, h_out, w_out)
    grid = jnp.pad(grid, ((0, 0), (0, 0), (1, 1), (1, 1)))
    flat = grid.reshape(B, C, (h_out + 2) * (w_out + 2))
    return jnp.pad(flat, ((0, 0), (0, 0), (g_o, g_o)))


# --------------------------------------------------------------------------
# Fused head kernel: GAP + per-group mean + Linear -> Linear -> Softmax
# --------------------------------------------------------------------------

def _head_kernel(x_ref, gmat_ref, w1_ref, b1_ref, w2_ref, b2_ref, o_ref, *, inv_hw):
    # Ring & guard lanes of the slab are exactly zero, so a plain lane-sum is GAP.
    gap = jnp.sum(x_ref[...].astype(jnp.float32), axis=-1) * inv_hw        # (B, C)
    means = jnp.dot(gmat_ref[...], gap, preferred_element_type=jnp.float32)  # (G, C)
    h = jnp.dot(means, w1_ref[...], preferred_element_type=jnp.float32) + b1_ref[...]
    logits = jnp.dot(h, w2_ref[...], preferred_element_type=jnp.float32) + b2_ref[...]
    m = jnp.max(logits, axis=-1, keepdims=True)
    e = jnp.exp(logits - m)
    inv = pl.reciprocal(jnp.sum(e, axis=-1, keepdims=True), approx=True)
    o_ref[...] = e * inv


def classifier_head(grid_slab, group_mat, params, h, w):
    G = group_mat.shape[0]
    w1, b1 = params["fc1"]
    w2, b2 = params["fc2"]
    vmem = pl.BlockSpec(memory_space=pltpu.MemorySpace.VMEM)
    return pl.pallas_call(
        functools.partial(_head_kernel, inv_hw=1.0 / float(h * w)),
        out_shape=jax.ShapeDtypeStruct((G, 2), jnp.float32),
        in_specs=[vmem] * 6,
        out_specs=vmem,
        compiler_params=pltpu.CompilerParams(vmem_limit_bytes=VMEM_LIMIT),
    )(grid_slab, group_mat, w1, b1.reshape(1, -1), w2, b2.reshape(1, -1))


# --------------------------------------------------------------------------
# Synthetic ResNet backbone + full forward (batched, jitted)
# --------------------------------------------------------------------------

def init_params(key, in_channel=3, c0=C0, c1=C1):
    def conv_init(k, cin, cout):
        std = (2.0 / (cin * 9)) ** 0.5
        w = jax.random.normal(k, (cout, cin, 3, 3), jnp.float32) * std
        return w, jnp.zeros((cout,), jnp.float32)

    def linear_init(k, cin, cout):
        lim = 1.0 / (cin ** 0.5)
        kw, kb = jax.random.split(k)
        w = jax.random.uniform(kw, (cin, cout), jnp.float32, -lim, lim)
        b = jax.random.uniform(kb, (cout,), jnp.float32, -lim, lim)
        return w, b

    ks = jax.random.split(key, 8)
    return {
        "stem": conv_init(ks[0], in_channel, c0),
        "b1a": conv_init(ks[1], c0, c0),
        "b1b": conv_init(ks[2], c0, c0),
        "down": conv_init(ks[3], c0, c1),
        "b2a": conv_init(ks[4], c1, c1),
        "b2b": conv_init(ks[5], c1, c1),
        "fc1": linear_init(ks[6], c1, c1 // 2),
        "fc2": linear_init(ks[7], c1 // 2, 2),
    }


def backbone_forward(images, params, img_size):
    """images: (B, Cin, H, W) f32 -> final grid-feature slab (B, C1, S2) bf16."""
    h1 = w1 = img_size
    h2 = w2 = img_size // 2
    mask1, mask2 = ring_mask(h1, w1), ring_mask(h2, w2)

    def tb(name):
        w, b = params[name]
        return pack_taps(w), b.reshape(-1, 1).astype(jnp.float32)

    x = image_to_slab(images, h1, w1)                                   # (B, Cin, S1)

    wt, bt = tb("stem")
    x0 = conv_slab(x, wt, bt, mask1, h1, w1, relu=True)                 # (B, C0, S1)

    wt, bt = tb("b1a")
    y = conv_slab(x0, wt, bt, mask1, h1, w1, relu=True)
    wt, bt = tb("b1b")
    x1 = conv_slab(y, wt, bt, mask1, h1, w1, relu=True, skip=x0)        # fused residual

    # stride-2 downsample conv: same fused kernel at full res, then subsample.
    wt, bt = tb("down")
    yd = conv_slab(x1, wt, bt, mask1, h1, w1, relu=True)                # (B, C1, S1)
    x2 = downsample_to_slab(yd, h1, w1, h2, w2)                         # (B, C1, S2)

    wt, bt = tb("b2a")
    y = conv_slab(x2, wt, bt, mask2, h2, w2, relu=True)
    wt, bt = tb("b2b")
    x3 = conv_slab(y, wt, bt, mask2, h2, w2, relu=True, skip=x2)        # (B, C1, S2)
    return x3


@functools.partial(jax.jit, static_argnames=("img_size",))
def resnet_forward_batched(images_sel, group_mat, params, *, img_size):
    """images_sel: (NK, Cin, H, W) all selected images of all groups stacked.
    group_mat: (G, NK) row-normalized selection matrix (per-group mean).
    Returns (G, 2) softmax predictions — same as ResNet.forward."""
    grid_slab = backbone_forward(images_sel, params, img_size)
    return classifier_head(grid_slab, group_mat, params, img_size // 2, img_size // 2)


def resnet_forward(data, params, img_size):
    """Mirrors ResNet.forward: data = [(images, indexes), ...]; images[idx] is (1,C,H,W)."""
    sel, spans, n = [], [], 0
    for images, indexes in data:
        for idx in indexes:
            sel.append(images[idx])                 # (1, C, H, W)
        spans.append((n, len(indexes)))
        n += len(indexes)
    images_sel = jnp.concatenate(sel, axis=0)       # (NK, C, H, W)
    gmat = jnp.zeros((len(data), n), jnp.float32)
    for g_i, (start, cnt) in enumerate(spans):
        gmat = gmat.at[g_i, start:start + cnt].set(1.0 / cnt)
    return resnet_forward_batched(images_sel, gmat, params, img_size=img_size)


# --------------------------------------------------------------------------
# Main
# --------------------------------------------------------------------------

if __name__ == "__main__":
    in_channel, img_size = 3, 16
    params = init_params(jax.random.PRNGKey(0), in_channel=in_channel)

    # Synthetic `data`: 2 groups, each with 3 candidate images (1, C, H, W),
    # and per-group index lists selecting 2 of them.
    G, M = 2, 3
    keys = jax.random.split(jax.random.PRNGKey(0), G)
    data = []
    for g in range(G):
        images = jax.random.normal(keys[g], (M, 1, in_channel, img_size, img_size),
                                   jnp.float32)
        data.append((images, [0, 2]))

    out = jax.block_until_ready(resnet_forward(data, params, img_size))

    assert out.shape == (G, 2), out.shape
    assert bool(jnp.all(jnp.isfinite(out))), "NaN/Inf in output"
    # EUP approx reciprocal in the fused softmax: rows sum to 1 within ~1e-3.
    assert bool(jnp.allclose(jnp.sum(out, axis=-1), 1.0, atol=5e-3)), \
        "softmax rows must sum to 1"
    print("KERNEL_OK")
</pallas_src>

<mosaic_0001>
module attributes {stable_mosaic.version = 11 : i64} {
  func.func @_conv_slab_kernel(%arg0: i32, %arg1: memref<1x3x362xbf16, #tpu.memory_space<vmem>>, %arg2: memref<9x16x3xbf16, #tpu.memory_space<vmem>>, %arg3: memref<16x1xf32, #tpu.memory_space<vmem>>, %arg4: memref<1x324xf32, #tpu.memory_space<vmem>>, %arg5: memref<1x16x362xbf16, #tpu.memory_space<vmem>>) attributes {dimension_semantics = [#tpu.dimension_semantics<parallel>], iteration_bounds = array<i64: 4>, scalar_prefetch = 0 : i64, scratch_operands = 0 : i64, tpu.core_type = #tpu.core_type<tc>, window_params = [{transform_indices = @transform_0, window_bounds = array<i64: 1, 3, 362>}, {pipeline_mode = #tpu.pipeline_mode<synchronous>, transform_indices = @transform_1, window_bounds = array<i64: 9, 16, 3>}, {pipeline_mode = #tpu.pipeline_mode<synchronous>, transform_indices = @transform_2, window_bounds = array<i64: 16, 1>}, {pipeline_mode = #tpu.pipeline_mode<synchronous>, transform_indices = @transform_3, window_bounds = array<i64: 1, 324>}, {transform_indices = @transform_4, window_bounds = array<i64: 1, 16, 362>}]} {
    %cst = arith.constant 0.000000e+00 : f32
    %0 = vector.broadcast %cst : f32 to vector<16x324xf32>
    %c0 = arith.constant 0 : index
    %c0_0 = arith.constant 0 : index
    %c0_1 = arith.constant 0 : index
    %1 = vector.load %arg1[%c0, %c0_0, %c0_1] : memref<1x3x362xbf16, #tpu.memory_space<vmem>>, vector<1x3x324xbf16>
    %2 = vector.shape_cast %1 : vector<1x3x324xbf16> to vector<3x324xbf16>
    %c0_2 = arith.constant 0 : index
    %c0_3 = arith.constant 0 : index
    %c0_4 = arith.constant 0 : index
    %3 = vector.load %arg2[%c0_2, %c0_3, %c0_4] : memref<9x16x3xbf16, #tpu.memory_space<vmem>>, vector<1x16x3xbf16>
    %4 = vector.shape_cast %3 : vector<1x16x3xbf16> to vector<16x3xbf16>
    %cst_5 = arith.constant dense<0.000000e+00> : vector<16x324xf32>
    %5 = tpu.matmul %4, %2, %cst_5 {dimension_numbers = #tpu.dot_dimension_numbers<[1], [0], [0], [1], [0, 0, 1, 1], [], []>} : vector<16x3xbf16>, vector<3x324xbf16>, vector<16x324xf32> -> vector<16x324xf32>
    %6 = arith.addf %0, %5 : vector<16x324xf32>
    %c0_6 = arith.constant 0 : index
    %c0_7 = arith.constant 0 : index
    %c1 = arith.constant 1 : index
    %7 = vector.load %arg1[%c0_6, %c0_7, %c1] : memref<1x3x362xbf16, #tpu.memory_space<vmem>>, vector<1x3x324xbf16>
    %8 = vector.shape_cast %7 : vector<1x3x324xbf16> to vector<3x324xbf16>
    %c1_8 = arith.constant 1 : index
    %c0_9 = arith.constant 0 : index
    %c0_10 = arith.constant 0 : index
    %9 = vector.load %arg2[%c1_8, %c0_9, %c0_10] : memref<9x16x3xbf16, #tpu.memory_space<vmem>>, vector<1x16x3xbf16>
    %10 = vector.shape_cast %9 : vector<1x16x3xbf16> to vector<16x3xbf16>
    %cst_11 = arith.constant dense<0.000000e+00> : vector<16x324xf32>
    %11 = tpu.matmul %10, %8, %cst_11 {dimension_numbers = #tpu.dot_dimension_numbers<[1], [0], [0], [1], [0, 0, 1, 1], [], []>} : vector<16x3xbf16>, vector<3x324xbf16>, vector<16x324xf32> -> vector<16x324xf32>
    %12 = arith.addf %6, %11 : vector<16x324xf32>
    %c0_12 = arith.constant 0 : index
    %c0_13 = arith.constant 0 : index
    %c2 = arith.constant 2 : index
    %13 = vector.load %arg1[%c0_12, %c0_13, %c2] : memref<1x3x362xbf16, #tpu.memory_space<vmem>>, vector<1x3x324xbf16>
    %14 = vector.shape_cast %13 : vector<1x3x324xbf16> to vector<3x324xbf16>
    %c2_14 = arith.constant 2 : index
    %c0_15 = arith.constant 0 : index
    %c0_16 = arith.constant 0 : index
    %15 = vector.load %arg2[%c2_14, %c0_15, %c0_16] : memref<9x16x3xbf16, #tpu.memory_space<vmem>>, vector<1x16x3xbf16>
    %16 = vector.shape_cast %15 : vector<1x16x3xbf16> to vector<16x3xbf16>
    %cst_17 = arith.constant dense<0.000000e+00> : vector<16x324xf32>
    %17 = tpu.matmul %16, %14, %cst_17 {dimension_numbers = #tpu.dot_dimension_numbers<[1], [0], [0], [1], [0, 0, 1, 1], [], []>} : vector<16x3xbf16>, vector<3x324xbf16>, vector<16x324xf32> -> vector<16x324xf32>
    %18 = arith.addf %12, %17 : vector<16x324xf32>
    %c0_18 = arith.constant 0 : index
    %c0_19 = arith.constant 0 : index
    %c18 = arith.constant 18 : index
    %19 = vector.load %arg1[%c0_18, %c0_19, %c18] : memref<1x3x362xbf16, #tpu.memory_space<vmem>>, vector<1x3x324xbf16>
    %20 = vector.shape_cast %19 : vector<1x3x324xbf16> to vector<3x324xbf16>
    %c3 = arith.constant 3 : index
    %c0_20 = arith.constant 0 : index
    %c0_21 = arith.constant 0 : index
    %21 = vector.load %arg2[%c3, %c0_20, %c0_21] : memref<9x16x3xbf16, #tpu.memory_space<vmem>>, vector<1x16x3xbf16>
    %22 = vector.shape_cast %21 : vector<1x16x3xbf16> to vector<16x3xbf16>
    %cst_22 = arith.constant dense<0.000000e+00> : vector<16x324xf32>
    %23 = tpu.matmul %22, %20, %cst_22 {dimension_numbers = #tpu.dot_dimension_numbers<[1], [0], [0], [1], [0, 0, 1, 1], [], []>} : vector<16x3xbf16>, vector<3x324xbf16>, vector<16x324xf32> -> vector<16x324xf32>
    %24 = arith.addf %18, %23 : vector<16x324xf32>
    %c0_23 = arith.constant 0 : index
    %c0_24 = arith.constant 0 : index
    %c19 = arith.constant 19 : index
    %25 = vector.load %arg1[%c0_23, %c0_24, %c19] : memref<1x3x362xbf16, #tpu.memory_space<vmem>>, vector<1x3x324xbf16>
    %26 = vector.shape_cast %25 : vector<1x3x324xbf16> to vector<3x324xbf16>
    %c4 = arith.constant 4 : index
    %c0_25 = arith.constant 0 : index
    %c0_26 = arith.constant 0 : index
    %27 = vector.load %arg2[%c4, %c0_25, %c0_26] : memref<9x16x3xbf16, #tpu.memory_space<vmem>>, vector<1x16x3xbf16>
    %28 = vector.shape_cast %27 : vector<1x16x3xbf16> to vector<16x3xbf16>
    %cst_27 = arith.constant dense<0.000000e+00> : vector<16x324xf32>
    %29 = tpu.matmul %28, %26, %cst_27 {dimension_numbers = #tpu.dot_dimension_numbers<[1], [0], [0], [1], [0, 0, 1, 1], [], []>} : vector<16x3xbf16>, vector<3x324xbf16>, vector<16x324xf32> -> vector<16x324xf32>
    %30 = arith.addf %24, %29 : vector<16x324xf32>
    %c0_28 = arith.constant 0 : index
    %c0_29 = arith.constant 0 : index
    %c20 = arith.constant 20 : index
    %31 = vector.load %arg1[%c0_28, %c0_29, %c20] : memref<1x3x362xbf16, #tpu.memory_space<vmem>>, vector<1x3x324xbf16>
    %32 = vector.shape_cast %31 : vector<1x3x324xbf16> to vector<3x324xbf16>
    %c5 = arith.constant 5 : index
    %c0_30 = arith.constant 0 : index
    %c0_31 = arith.constant 0 : index
    %33 = vector.load %arg2[%c5, %c0_30, %c0_31] : memref<9x16x3xbf16, #tpu.memory_space<vmem>>, vector<1x16x3xbf16>
    %34 = vector.shape_cast %33 : vector<1x16x3xbf16> to vector<16x3xbf16>
    %cst_32 = arith.constant dense<0.000000e+00> : vector<16x324xf32>
    %35 = tpu.matmul %34, %32, %cst_32 {dimension_numbers = #tpu.dot_dimension_numbers<[1], [0], [0], [1], [0, 0, 1, 1], [], []>} : vector<16x3xbf16>, vector<3x324xbf16>, vector<16x324xf32> -> vector<16x324xf32>
    %36 = arith.addf %30, %35 : vector<16x324xf32>
    %c0_33 = arith.constant 0 : index
    %c0_34 = arith.constant 0 : index
    %c36 = arith.constant 36 : index
    %37 = vector.load %arg1[%c0_33, %c0_34, %c36] : memref<1x3x362xbf16, #tpu.memory_space<vmem>>, vector<1x3x324xbf16>
    %38 = vector.shape_cast %37 : vector<1x3x324xbf16> to vector<3x324xbf16>
    %c6 = arith.constant 6 : index
    %c0_35 = arith.constant 0 : index
    %c0_36 = arith.constant 0 : index
    %39 = vector.load %arg2[%c6, %c0_35, %c0_36] : memref<9x16x3xbf16, #tpu.memory_space<vmem>>, vector<1x16x3xbf16>
    %40 = vector.shape_cast %39 : vector<1x16x3xbf16> to vector<16x3xbf16>
    %cst_37 = arith.constant dense<0.000000e+00> : vector<16x324xf32>
    %41 = tpu.matmul %40, %38, %cst_37 {dimension_numbers = #tpu.dot_dimension_numbers<[1], [0], [0], [1], [0, 0, 1, 1], [], []>} : vector<16x3xbf16>, vector<3x324xbf16>, vector<16x324xf32> -> vector<16x324xf32>
    %42 = arith.addf %36, %41 : vector<16x324xf32>
    %c0_38 = arith.constant 0 : index
    %c0_39 = arith.constant 0 : index
    %c37 = arith.constant 37 : index
    %43 = vector.load %arg1[%c0_38, %c0_39, %c37] : memref<1x3x362xbf16, #tpu.memory_space<vmem>>, vector<1x3x324xbf16>
    %44 = vector.shape_cast %43 : vector<1x3x324xbf16> to vector<3x324xbf16>
    %c7 = arith.constant 7 : index
    %c0_40 = arith.constant 0 : index
    %c0_41 = arith.constant 0 : index
    %45 = vector.load %arg2[%c7, %c0_40, %c0_41] : memref<9x16x3xbf16, #tpu.memory_space<vmem>>, vector<1x16x3xbf16>
    %46 = vector.shape_cast %45 : vector<1x16x3xbf16> to vector<16x3xbf16>
    %cst_42 = arith.constant dense<0.000000e+00> : vector<16x324xf32>
    %47 = tpu.matmul %46, %44, %cst_42 {dimension_numbers = #tpu.dot_dimension_numbers<[1], [0], [0], [1], [0, 0, 1, 1], [], []>} : vector<16x3xbf16>, vector<3x324xbf16>, vector<16x324xf32> -> vector<16x324xf32>
    %48 = arith.addf %42, %47 : vector<16x324xf32>
    %c0_43 = arith.constant 0 : index
    %c0_44 = arith.constant 0 : index
    %c38 = arith.constant 38 : index
    %49 = vector.load %arg1[%c0_43, %c0_44, %c38] : memref<1x3x362xbf16, #tpu.memory_space<vmem>>, vector<1x3x324xbf16>
    %50 = vector.shape_cast %49 : vector<1x3x324xbf16> to vector<3x324xbf16>
    %c8 = arith.constant 8 : index
    %c0_45 = arith.constant 0 : index
    %c0_46 = arith.constant 0 : index
    %51 = vector.load %arg2[%c8, %c0_45, %c0_46] : memref<9x16x3xbf16, #tpu.memory_space<vmem>>, vector<1x16x3xbf16>
    %52 = vector.shape_cast %51 : vector<1x16x3xbf16> to vector<16x3xbf16>
    %cst_47 = arith.constant dense<0.000000e+00> : vector<16x324xf32>
    %53 = tpu.matmul %52, %50, %cst_47 {dimension_numbers = #tpu.dot_dimension_numbers<[1], [0], [0], [1], [0, 0, 1, 1], [], []>} : vector<16x3xbf16>, vector<3x324xbf16>, vector<16x324xf32> -> vector<16x324xf32>
    %54 = arith.addf %48, %53 : vector<16x324xf32>
    %c0_48 = arith.constant 0 : index
    %c0_49 = arith.constant 0 : index
    %55 = vector.load %arg3[%c0_48, %c0_49] : memref<16x1xf32, #tpu.memory_space<vmem>>, vector<16x1xf32>
    %56 = vector.broadcast %55 : vector<16x1xf32> to vector<16x324xf32>
    %57 = arith.addf %54, %56 : vector<16x324xf32>
    %cst_50 = arith.constant 0.000000e+00 : f32
    %58 = vector.broadcast %cst_50 : f32 to vector<16x324xf32>
    %59 = arith.maximumf %57, %58 : vector<16x324xf32>
    %c0_51 = arith.constant 0 : index
    %c0_52 = arith.constant 0 : index
    %60 = vector.load %arg4[%c0_51, %c0_52] : memref<1x324xf32, #tpu.memory_space<vmem>>, vector<1x324xf32>
    %61 = vector.broadcast %60 : vector<1x324xf32> to vector<16x324xf32>
    %62 = arith.mulf %59, %61 : vector<16x324xf32>
    %cst_53 = arith.constant 0.000000e+00 : bf16
    %63 = vector.broadcast %cst_53 : bf16 to vector<16x19xbf16>
    %c0_54 = arith.constant 0 : index
    %c0_55 = arith.constant 0 : index
    %c0_56 = arith.constant 0 : index
    %64 = vector.load %arg5[%c0_54, %c0_55, %c0_56] : memref<1x16x362xbf16, #tpu.memory_space<vmem>>, vector<1x16x19xbf16>
    %65 = vector.shape_cast %64 : vector<1x16x19xbf16> to vector<16x19xbf16>
    %66 = vector.shape_cast %63 : vector<16x19xbf16> to vector<1x16x19xbf16>
    tpu.vector_store %arg5[%c0_54, %c0_55, %c0_56], %66 {strides = array<i32>} : memref<1x16x362xbf16, #tpu.memory_space<vmem>>, vector<1x16x19xbf16>,
    %67 = arith.truncf %62 : vector<16x324xf32> to vector<16x324xbf16>
    %c0_57 = arith.constant 0 : index
    %c0_58 = arith.constant 0 : index
    %c19_59 = arith.constant 19 : index
    %68 = vector.load %arg5[%c0_57, %c0_58, %c19_59] : memref<1x16x362xbf16, #tpu.memory_space<vmem>>, vector<1x16x324xbf16>
    %69 = vector.shape_cast %68 : vector<1x16x324xbf16> to vector<16x324xbf16>
    %70 = vector.shape_cast %67 : vector<16x324xbf16> to vector<1x16x324xbf16>
    tpu.vector_store %arg5[%c0_57, %c0_58, %c19_59], %70 {strides = array<i32>} : memref<1x16x362xbf16, #tpu.memory_space<vmem>>, vector<1x16x324xbf16>,
    %c0_60 = arith.constant 0 : index
    %c0_61 = arith.constant 0 : index
    %c343 = arith.constant 343 : index
    %71 = vector.load %arg5[%c0_60, %c0_61, %c343] : memref<1x16x362xbf16, #tpu.memory_space<vmem>>, vector<1x16x19xbf16>
    %72 = vector.shape_cast %71 : vector<1x16x19xbf16> to vector<16x19xbf16>
    %73 = vector.shape_cast %63 : vector<16x19xbf16> to vector<1x16x19xbf16>
    tpu.vector_store %arg5[%c0_60, %c0_61, %c343], %73 {strides = array<i32>} : memref<1x16x362xbf16, #tpu.memory_space<vmem>>, vector<1x16x19xbf16>,
    return
  }
  func.func @transform_0(%arg0: i32) -> (i32, i32, i32) {
    %c0_i32 = arith.constant 0 : i32
    %c0_i32_0 = arith.constant 0 : i32
    %c0_i32_1 = arith.constant 0 : i32
    return %arg0, %c0_i32, %c0_i32_0 : i32, i32, i32
  }
  func.func @transform_1(%arg0: i32) -> (i32, i32, i32) {
    %c0_i32 = arith.constant 0 : i32
    %c0_i32_0 = arith.constant 0 : i32
    %c0_i32_1 = arith.constant 0 : i32
    %c0_i32_2 = arith.constant 0 : i32
    return %c0_i32, %c0_i32_0, %c0_i32_1 : i32, i32, i32
  }
  func.func @transform_2(%arg0: i32) -> (i32, i32) {
    %c0_i32 = arith.constant 0 : i32
    %c0_i32_0 = arith.constant 0 : i32
    %c0_i32_1 = arith.constant 0 : i32
    return %c0_i32, %c0_i32_0 : i32, i32
  }
  func.func @transform_3(%arg0: i32) -> (i32, i32) {
    %c0_i32 = arith.constant 0 : i32
    %c0_i32_0 = arith.constant 0 : i32
    %c0_i32_1 = arith.constant 0 : i32
    return %c0_i32, %c0_i32_0 : i32, i32
  }
  func.func @transform_4(%arg0: i32) -> (i32, i32, i32) {
    %c0_i32 = arith.constant 0 : i32
    %c0_i32_0 = arith.constant 0 : i32
    %c0_i32_1 = arith.constant 0 : i32
    return %arg0, %c0_i32, %c0_i32_0 : i32, i32, i32
  }
}

module attributes {stable_mosaic.version = 11 : i64} {
  func.func @_conv_slab_kernel(%arg0: i32, %arg1: memref<1x16x362xbf16, #tpu.memory_space<vmem>>, %arg2: memref<9x16x16xbf16, #tpu.memory_space<vmem>>, %arg3: memref<16x1xf32, #tpu.memory_space<vmem>>, %arg4: memref<1x324xf32, #tpu.memory_space<vmem>>, %arg5: memref<1x16x362xbf16, #tpu.memory_space<vmem>>) attributes {dimension_semantics = [#tpu.dimension_semantics<parallel>], iteration_bounds = array<i64: 4>, scalar_prefetch = 0 : i64, scratch_operands = 0 : i64, tpu.core_type = #tpu.core_type<tc>, window_params = [{transform_indices = @transform_0, window_bounds = array<i64: 1, 16, 362>}, {pipeline_mode = #tpu.pipeline_mode<synchronous>, transform_indices = @transform_1, window_bounds = array<i64: 9, 16, 16>}, {pipeline_mode = #tpu.pipeline_mode<synchronous>, transform_indices = @transform_2, window_bounds = array<i64: 16, 1>}, {pipeline_mode = #tpu.pipeline_mode<synchronous>, transform_indices = @transform_3, window_bounds = array<i64: 1, 324>}, {transform_indices = @transform_4, window_bounds = array<i64: 1, 16, 362>}]} {
    %cst = arith.constant 0.000000e+00 : f32
    %0 = vector.broadcast %cst : f32 to vector<16x324xf32>
    %c0 = arith.constant 0 : index
    %c0_0 = arith.constant 0 : index
    %c0_1 = arith.constant 0 : index
    %1 = vector.load %arg1[%c0, %c0_0, %c0_1] : memref<1x16x362xbf16, #tpu.memory_space<vmem>>, vector<1x16x324xbf16>
    %2 = vector.shape_cast %1 : vector<1x16x324xbf16> to vector<16x324xbf16>
    %c0_2 = arith.constant 0 : index
    %c0_3 = arith.constant 0 : index
    %c0_4 = arith.constant 0 : index
    %3 = vector.load %arg2[%c0_2, %c0_3, %c0_4] : memref<9x16x16xbf16, #tpu.memory_space<vmem>>, vector<1x16x16xbf16>
    %4 = vector.shape_cast %3 : vector<1x16x16xbf16> to vector<16x16xbf16>
    %cst_5 = arith.constant dense<0.000000e+00> : vector<16x324xf32>
    %5 = tpu.matmul %4, %2, %cst_5 {dimension_numbers = #tpu.dot_dimension_numbers<[1], [0], [0], [1], [0, 0, 1, 1], [], []>} : vector<16x16xbf16>, vector<16x324xbf16>, vector<16x324xf32> -> vector<16x324xf32>
    %6 = arith.addf %0, %5 : vector<16x324xf32>
    %c0_6 = arith.constant 0 : index
    %c0_7 = arith.constant 0 : index
    %c1 = arith.constant 1 : index
    %7 = vector.load %arg1[%c0_6, %c0_7, %c1] : memref<1x16x362xbf16, #tpu.memory_space<vmem>>, vector<1x16x324xbf16>
    %8 = vector.shape_cast %7 : vector<1x16x324xbf16> to vector<16x324xbf16>
    %c1_8 = arith.constant 1 : index
    %c0_9 = arith.constant 0 : index
    %c0_10 = arith.constant 0 : index
    %9 = vector.load %arg2[%c1_8, %c0_9, %c0_10] : memref<9x16x16xbf16, #tpu.memory_space<vmem>>, vector<1x16x16xbf16>
    %10 = vector.shape_cast %9 : vector<1x16x16xbf16> to vector<16x16xbf16>
    %cst_11 = arith.constant dense<0.000000e+00> : vector<16x324xf32>
    %11 = tpu.matmul %10, %8, %cst_11 {dimension_numbers = #tpu.dot_dimension_numbers<[1], [0], [0], [1], [0, 0, 1, 1], [], []>} : vector<16x16xbf16>, vector<16x324xbf16>, vector<16x324xf32> -> vector<16x324xf32>
    %12 = arith.addf %6, %11 : vector<16x324xf32>
    %c0_12 = arith.constant 0 : index
    %c0_13 = arith.constant 0 : index
    %c2 = arith.constant 2 : index
    %13 = vector.load %arg1[%c0_12, %c0_13, %c2] : memref<1x16x362xbf16, #tpu.memory_space<vmem>>, vector<1x16x324xbf16>
    %14 = vector.shape_cast %13 : vector<1x16x324xbf16> to vector<16x324xbf16>
    %c2_14 = arith.constant 2 : index
    %c0_15 = arith.constant 0 : index
    %c0_16 = arith.constant 0 : index
    %15 = vector.load %arg2[%c2_14, %c0_15, %c0_16] : memref<9x16x16xbf16, #tpu.memory_space<vmem>>, vector<1x16x16xbf16>
    %16 = vector.shape_cast %15 : vector<1x16x16xbf16> to vector<16x16xbf16>
    %cst_17 = arith.constant dense<0.000000e+00> : vector<16x324xf32>
    %17 = tpu.matmul %16, %14, %cst_17 {dimension_numbers = #tpu.dot_dimension_numbers<[1], [0], [0], [1], [0, 0, 1, 1], [], []>} : vector<16x16xbf16>, vector<16x324xbf16>, vector<16x324xf32> -> vector<16x324xf32>
    %18 = arith.addf %12, %17 : vector<16x324xf32>
    %c0_18 = arith.constant 0 : index
    %c0_19 = arith.constant 0 : index
    %c18 = arith.constant 18 : index
    %19 = vector.load %arg1[%c0_18, %c0_19, %c18] : memref<1x16x362xbf16, #tpu.memory_space<vmem>>, vector<1x16x324xbf16>
    %20 = vector.shape_cast %19 : vector<1x16x324xbf16> to vector<16x324xbf16>
    %c3 = arith.constant 3 : index
    %c0_20 = arith.constant 0 : index
    %c0_21 = arith.constant 0 : index
    %21 = vector.load %arg2[%c3, %c0_20, %c0_21] : memref<9x16x16xbf16, #tpu.memory_space<vmem>>, vector<1x16x16xbf16>
    %22 = vector.shape_cast %21 : vector<1x16x16xbf16> to vector<16x16xbf16>
    %cst_22 = arith.constant dense<0.000000e+00> : vector<16x324xf32>
    %23 = tpu.matmul %22, %20, %cst_22 {dimension_numbers = #tpu.dot_dimension_numbers<[1], [0], [0], [1], [0, 0, 1, 1], [], []>} : vector<16x16xbf16>, vector<16x324xbf16>, vector<16x324xf32> -> vector<16x324xf32>
    %24 = arith.addf %18, %23 : vector<16x324xf32>
    %c0_23 = arith.constant 0 : index
    %c0_24 = arith.constant 0 : index
    %c19 = arith.constant 19 : index
    %25 = vector.load %arg1[%c0_23, %c0_24, %c19] : memref<1x16x362xbf16, #tpu.memory_space<vmem>>, vector<1x16x324xbf16>
    %26 = vector.shape_cast %25 : vector<1x16x324xbf16> to vector<16x324xbf16>
    %c4 = arith.constant 4 : index
    %c0_25 = arith.constant 0 : index
    %c0_26 = arith.constant 0 : index
    %27 = vector.load %arg2[%c4, %c0_25, %c0_26] : memref<9x16x16xbf16, #tpu.memory_space<vmem>>, vector<1x16x16xbf16>
    %28 = vector.shape_cast %27 : vector<1x16x16xbf16> to vector<16x16xbf16>
    %cst_27 = arith.constant dense<0.000000e+00> : vector<16x324xf32>
    %29 = tpu.matmul %28, %26, %cst_27 {dimension_numbers = #tpu.dot_dimension_numbers<[1], [0], [0], [1], [0, 0, 1, 1], [], []>} : vector<16x16xbf16>, vector<16x324xbf16>, vector<16x324xf32> -> vector<16x324xf32>
    %30 = arith.addf %24, %29 : vector<16x324xf32>
    %c0_28 = arith.constant 0 : index
    %c0_29 = arith.constant 0 : index
    %c20 = arith.constant 20 : index
    %31 = vector.load %arg1[%c0_28, %c0_29, %c20] : memref<1x16x362xbf16, #tpu.memory_space<vmem>>, vector<1x16x324xbf16>
    %32 = vector.shape_cast %31 : vector<1x16x324xbf16> to vector<16x324xbf16>
    %c5 = arith.constant 5 : index
    %c0_30 = arith.constant 0 : index
    %c0_31 = arith.constant 0 : index
    %33 = vector.load %arg2[%c5, %c0_30, %c0_31] : memref<9x16x16xbf16, #tpu.memory_space<vmem>>, vector<1x16x16xbf16>
    %34 = vector.shape_cast %33 : vector<1x16x16xbf16> to vector<16x16xbf16>
    %cst_32 = arith.constant dense<0.000000e+00> : vector<16x324xf32>
    %35 = tpu.matmul %34, %32, %cst_32 {dimension_numbers = #tpu.dot_dimension_numbers<[1], [0], [0], [1], [0, 0, 1, 1], [], []>} : vector<16x16xbf16>, vector<16x324xbf16>, vector<16x324xf32> -> vector<16x324xf32>
    %36 = arith.addf %30, %35 : vector<16x324xf32>
    %c0_33 = arith.constant 0 : index
    %c0_34 = arith.constant 0 : index
    %c36 = arith.constant 36 : index
    %37 = vector.load %arg1[%c0_33, %c0_34, %c36] : memref<1x16x362xbf16, #tpu.memory_space<vmem>>, vector<1x16x324xbf16>
    %38 = vector.shape_cast %37 : vector<1x16x324xbf16> to vector<16x324xbf16>
    %c6 = arith.constant 6 : index
    %c0_35 = arith.constant 0 : index
    %c0_36 = arith.constant 0 : index
    %39 = vector.load %arg2[%c6, %c0_35, %c0_36] : memref<9x16x16xbf16, #tpu.memory_space<vmem>>, vector<1x16x16xbf16>
    %40 = vector.shape_cast %39 : vector<1x16x16xbf16> to vector<16x16xbf16>
    %cst_37 = arith.constant dense<0.000000e+00> : vector<16x324xf32>
    %41 = tpu.matmul %40, %38, %cst_37 {dimension_numbers = #tpu.dot_dimension_numbers<[1], [0], [0], [1], [0, 0, 1, 1], [], []>} : vector<16x16xbf16>, vector<16x324xbf16>, vector<16x324xf32> -> vector<16x324xf32>
    %42 = arith.addf %36, %41 : vector<16x324xf32>
    %c0_38 = arith.constant 0 : index
    %c0_39 = arith.constant 0 : index
    %c37 = arith.constant 37 : index
    %43 = vector.load %arg1[%c0_38, %c0_39, %c37] : memref<1x16x362xbf16, #tpu.memory_space<vmem>>, vector<1x16x324xbf16>
    %44 = vector.shape_cast %43 : vector<1x16x324xbf16> to vector<16x324xbf16>
    %c7 = arith.constant 7 : index
    %c0_40 = arith.constant 0 : index
    %c0_41 = arith.constant 0 : index
    %45 = vector.load %arg2[%c7, %c0_40, %c0_41] : memref<9x16x16xbf16, #tpu.memory_space<vmem>>, vector<1x16x16xbf16>
    %46 = vector.shape_cast %45 : vector<1x16x16xbf16> to vector<16x16xbf16>
    %cst_42 = arith.constant dense<0.000000e+00> : vector<16x324xf32>
    %47 = tpu.matmul %46, %44, %cst_42 {dimension_numbers = #tpu.dot_dimension_numbers<[1], [0], [0], [1], [0, 0, 1, 1], [], []>} : vector<16x16xbf16>, vector<16x324xbf16>, vector<16x324xf32> -> vector<16x324xf32>
    %48 = arith.addf %42, %47 : vector<16x324xf32>
    %c0_43 = arith.constant 0 : index
    %c0_44 = arith.constant 0 : index
    %c38 = arith.constant 38 : index
    %49 = vector.load %arg1[%c0_43, %c0_44, %c38] : memref<1x16x362xbf16, #tpu.memory_space<vmem>>, vector<1x16x324xbf16>
    %50 = vector.shape_cast %49 : vector<1x16x324xbf16> to vector<16x324xbf16>
    %c8 = arith.constant 8 : index
    %c0_45 = arith.constant 0 : index
    %c0_46 = arith.constant 0 : index
    %51 = vector.load %arg2[%c8, %c0_45, %c0_46] : memref<9x16x16xbf16, #tpu.memory_space<vmem>>, vector<1x16x16xbf16>
    %52 = vector.shape_cast %51 : vector<1x16x16xbf16> to vector<16x16xbf16>
    %cst_47 = arith.constant dense<0.000000e+00> : vector<16x324xf32>
    %53 = tpu.matmul %52, %50, %cst_47 {dimension_numbers = #tpu.dot_dimension_numbers<[1], [0], [0], [1], [0, 0, 1, 1], [], []>} : vector<16x16xbf16>, vector<16x324xbf16>, vector<16x324xf32> -> vector<16x324xf32>
    %54 = arith.addf %48, %53 : vector<16x324xf32>
    %c0_48 = arith.constant 0 : index
    %c0_49 = arith.constant 0 : index
    %55 = vector.load %arg3[%c0_48, %c0_49] : memref<16x1xf32, #tpu.memory_space<vmem>>, vector<16x1xf32>
    %56 = vector.broadcast %55 : vector<16x1xf32> to vector<16x324xf32>
    %57 = arith.addf %54, %56 : vector<16x324xf32>
    %cst_50 = arith.constant 0.000000e+00 : f32
    %58 = vector.broadcast %cst_50 : f32 to vector<16x324xf32>
    %59 = arith.maximumf %57, %58 : vector<16x324xf32>
    %c0_51 = arith.constant 0 : index
    %c0_52 = arith.constant 0 : index
    %60 = vector.load %arg4[%c0_51, %c0_52] : memref<1x324xf32, #tpu.memory_space<vmem>>, vector<1x324xf32>
    %61 = vector.broadcast %60 : vector<1x324xf32> to vector<16x324xf32>
    %62 = arith.mulf %59, %61 : vector<16x324xf32>
    %cst_53 = arith.constant 0.000000e+00 : bf16
    %63 = vector.broadcast %cst_53 : bf16 to vector<16x19xbf16>
    %c0_54 = arith.constant 0 : index
    %c0_55 = arith.constant 0 : index
    %c0_56 = arith.constant 0 : index
    %64 = vector.load %arg5[%c0_54, %c0_55, %c0_56] : memref<1x16x362xbf16, #tpu.memory_space<vmem>>, vector<1x16x19xbf16>
    %65 = vector.shape_cast %64 : vector<1x16x19xbf16> to vector<16x19xbf16>
    %66 = vector.shape_cast %63 : vector<16x19xbf16> to vector<1x16x19xbf16>
    tpu.vector_store %arg5[%c0_54, %c0_55, %c0_56], %66 {strides = array<i32>} : memref<1x16x362xbf16, #tpu.memory_space<vmem>>, vector<1x16x19xbf16>,
    %67 = arith.truncf %62 : vector<16x324xf32> to vector<16x324xbf16>
    %c0_57 = arith.constant 0 : index
    %c0_58 = arith.constant 0 : index
    %c19_59 = arith.constant 19 : index
    %68 = vector.load %arg5[%c0_57, %c0_58, %c19_59] : memref<1x16x362xbf16, #tpu.memory_space<vmem>>, vector<1x16x324xbf16>
    %69 = vector.shape_cast %68 : vector<1x16x324xbf16> to vector<16x324xbf16>
    %70 = vector.shape_cast %67 : vector<16x324xbf16> to vector<1x16x324xbf16>
    tpu.vector_store %arg5[%c0_57, %c0_58, %c19_59], %70 {strides = array<i32>} : memref<1x16x362xbf16, #tpu.memory_space<vmem>>, vector<1x16x324xbf16>,
    %c0_60 = arith.constant 0 : index
    %c0_61 = arith.constant 0 : index
    %c343 = arith.constant 343 : index
    %71 = vector.load %arg5[%c0_60, %c0_61, %c343] : memref<1x16x362xbf16, #tpu.memory_space<vmem>>, vector<1x16x19xbf16>
    %72 = vector.shape_cast %71 : vector<1x16x19xbf16> to vector<16x19xbf16>
    %73 = vector.shape_cast %63 : vector<16x19xbf16> to vector<1x16x19xbf16>
    tpu.vector_store %arg5[%c0_60, %c0_61, %c343], %73 {strides = array<i32>} : memref<1x16x362xbf16, #tpu.memory_space<vmem>>, vector<1x16x19xbf16>,
    return
  }
  func.func @transform_0(%arg0: i32) -> (i32, i32, i32) {
    %c0_i32 = arith.constant 0 : i32
    %c0_i32_0 = arith.constant 0 : i32
    %c0_i32_1 = arith.constant 0 : i32
    return %arg0, %c0_i32, %c0_i32_0 : i32, i32, i32
  }
  func.func @transform_1(%arg0: i32) -> (i32, i32, i32) {
    %c0_i32 = arith.constant 0 : i32
    %c0_i32_0 = arith.constant 0 : i32
    %c0_i32_1 = arith.constant 0 : i32
    %c0_i32_2 = arith.constant 0 : i32
    return %c0_i32, %c0_i32_0, %c0_i32_1 : i32, i32, i32
  }
  func.func @transform_2(%arg0: i32) -> (i32, i32) {
    %c0_i32 = arith.constant 0 : i32
    %c0_i32_0 = arith.constant 0 : i32
    %c0_i32_1 = arith.constant 0 : i32
    return %c0_i32, %c0_i32_0 : i32, i32
  }
  func.func @transform_3(%arg0: i32) -> (i32, i32) {
    %c0_i32 = arith.constant 0 : i32
    %c0_i32_0 = arith.constant 0 : i32
    %c0_i32_1 = arith.constant 0 : i32
    return %c0_i32, %c0_i32_0 : i32, i32
  }
  func.func @transform_4(%arg0: i32) -> (i32, i32, i32) {
    %c0_i32 = arith.constant 0 : i32
    %c0_i32_0 = arith.constant 0 : i32
    %c0_i32_1 = arith.constant 0 : i32
    return %arg0, %c0_i32, %c0_i32_0 : i32, i32, i32
  }
}

module attributes {stable_mosaic.version = 11 : i64} {
  func.func @_conv_slab_kernel(%arg0: i32, %arg1: memref<1x16x362xbf16, #tpu.memory_space<vmem>>, %arg2: memref<9x16x16xbf16, #tpu.memory_space<vmem>>, %arg3: memref<16x1xf32, #tpu.memory_space<vmem>>, %arg4: memref<1x324xf32, #tpu.memory_space<vmem>>, %arg5: memref<1x16x362xbf16, #tpu.memory_space<vmem>>, %arg6: memref<1x16x362xbf16, #tpu.memory_space<vmem>>) attributes {dimension_semantics = [#tpu.dimension_semantics<parallel>], iteration_bounds = array<i64: 4>, scalar_prefetch = 0 : i64, scratch_operands = 0 : i64, tpu.core_type = #tpu.core_type<tc>, window_params = [{transform_indices = @transform_0, window_bounds = array<i64: 1, 16, 362>}, {pipeline_mode = #tpu.pipeline_mode<synchronous>, transform_indices = @transform_1, window_bounds = array<i64: 9, 16, 16>}, {pipeline_mode = #tpu.pipeline_mode<synchronous>, transform_indices = @transform_2, window_bounds = array<i64: 16, 1>}, {pipeline_mode = #tpu.pipeline_mode<synchronous>, transform_indices = @transform_3, window_bounds = array<i64: 1, 324>}, {transform_indices = @transform_4, window_bounds = array<i64: 1, 16, 362>}, {transform_indices = @transform_5, window_bounds = array<i64: 1, 16, 362>}]} {
    %cst = arith.constant 0.000000e+00 : f32
    %0 = vector.broadcast %cst : f32 to vector<16x324xf32>
    %c0 = arith.constant 0 : index
    %c0_0 = arith.constant 0 : index
    %c0_1 = arith.constant 0 : index
    %1 = vector.load %arg1[%c0, %c0_0, %c0_1] : memref<1x16x362xbf16, #tpu.memory_space<vmem>>, vector<1x16x324xbf16>
    %2 = vector.shape_cast %1 : vector<1x16x324xbf16> to vector<16x324xbf16>
    %c0_2 = arith.constant 0 : index
    %c0_3 = arith.constant 0 : index
    %c0_4 = arith.constant 0 : index
    %3 = vector.load %arg2[%c0_2, %c0_3, %c0_4] : memref<9x16x16xbf16, #tpu.memory_space<vmem>>, vector<1x16x16xbf16>
    %4 = vector.shape_cast %3 : vector<1x16x16xbf16> to vector<16x16xbf16>
    %cst_5 = arith.constant dense<0.000000e+00> : vector<16x324xf32>
    %5 = tpu.matmul %4, %2, %cst_5 {dimension_numbers = #tpu.dot_dimension_numbers<[1], [0], [0], [1], [0, 0, 1, 1], [], []>} : vector<16x16xbf16>, vector<16x324xbf16>, vector<16x324xf32> -> vector<16x324xf32>
    %6 = arith.addf %0, %5 : vector<16x324xf32>
    %c0_6 = arith.constant 0 : index
    %c0_7 = arith.constant 0 : index
    %c1 = arith.constant 1 : index
    %7 = vector.load %arg1[%c0_6, %c0_7, %c1] : memref<1x16x362xbf16, #tpu.memory_space<vmem>>, vector<1x16x324xbf16>
    %8 = vector.shape_cast %7 : vector<1x16x324xbf16> to vector<16x324xbf16>
    %c1_8 = arith.constant 1 : index
    %c0_9 = arith.constant 0 : index
    %c0_10 = arith.constant 0 : index
    %9 = vector.load %arg2[%c1_8, %c0_9, %c0_10] : memref<9x16x16xbf16, #tpu.memory_space<vmem>>, vector<1x16x16xbf16>
    %10 = vector.shape_cast %9 : vector<1x16x16xbf16> to vector<16x16xbf16>
    %cst_11 = arith.constant dense<0.000000e+00> : vector<16x324xf32>
    %11 = tpu.matmul %10, %8, %cst_11 {dimension_numbers = #tpu.dot_dimension_numbers<[1], [0], [0], [1], [0, 0, 1, 1], [], []>} : vector<16x16xbf16>, vector<16x324xbf16>, vector<16x324xf32> -> vector<16x324xf32>
    %12 = arith.addf %6, %11 : vector<16x324xf32>
    %c0_12 = arith.constant 0 : index
    %c0_13 = arith.constant 0 : index
    %c2 = arith.constant 2 : index
    %13 = vector.load %arg1[%c0_12, %c0_13, %c2] : memref<1x16x362xbf16, #tpu.memory_space<vmem>>, vector<1x16x324xbf16>
    %14 = vector.shape_cast %13 : vector<1x16x324xbf16> to vector<16x324xbf16>
    %c2_14 = arith.constant 2 : index
    %c0_15 = arith.constant 0 : index
    %c0_16 = arith.constant 0 : index
    %15 = vector.load %arg2[%c2_14, %c0_15, %c0_16] : memref<9x16x16xbf16, #tpu.memory_space<vmem>>, vector<1x16x16xbf16>
    %16 = vector.shape_cast %15 : vector<1x16x16xbf16> to vector<16x16xbf16>
    %cst_17 = arith.constant dense<0.000000e+00> : vector<16x324xf32>
    %17 = tpu.matmul %16, %14, %cst_17 {dimension_numbers = #tpu.dot_dimension_numbers<[1], [0], [0], [1], [0, 0, 1, 1], [], []>} : vector<16x16xbf16>, vector<16x324xbf16>, vector<16x324xf32> -> vector<16x324xf32>
    %18 = arith.addf %12, %17 : vector<16x324xf32>
    %c0_18 = arith.constant 0 : index
    %c0_19 = arith.constant 0 : index
    %c18 = arith.constant 18 : index
    %19 = vector.load %arg1[%c0_18, %c0_19, %c18] : memref<1x16x362xbf16, #tpu.memory_space<vmem>>, vector<1x16x324xbf16>
    %20 = vector.shape_cast %19 : vector<1x16x324xbf16> to vector<16x324xbf16>
    %c3 = arith.constant 3 : index
    %c0_20 = arith.constant 0 : index
    %c0_21 = arith.constant 0 : index
    %21 = vector.load %arg2[%c3, %c0_20, %c0_21] : memref<9x16x16xbf16, #tpu.memory_space<vmem>>, vector<1x16x16xbf16>
    %22 = vector.shape_cast %21 : vector<1x16x16xbf16> to vector<16x16xbf16>
    %cst_22 = arith.constant dense<0.000000e+00> : vector<16x324xf32>
    %23 = tpu.matmul %22, %20, %cst_22 {dimension_numbers = #tpu.dot_dimension_numbers<[1], [0], [0], [1], [0, 0, 1, 1], [], []>} : vector<16x16xbf16>, vector<16x324xbf16>, vector<16x324xf32> -> vector<16x324xf32>
    %24 = arith.addf %18, %23 : vector<16x324xf32>
    %c0_23 = arith.constant 0 : index
    %c0_24 = arith.constant 0 : index
    %c19 = arith.constant 19 : index
    %25 = vector.load %arg1[%c0_23, %c0_24, %c19] : memref<1x16x362xbf16, #tpu.memory_space<vmem>>, vector<1x16x324xbf16>
    %26 = vector.shape_cast %25 : vector<1x16x324xbf16> to vector<16x324xbf16>
    %c4 = arith.constant 4 : index
    %c0_25 = arith.constant 0 : index
    %c0_26 = arith.constant 0 : index
    %27 = vector.load %arg2[%c4, %c0_25, %c0_26] : memref<9x16x16xbf16, #tpu.memory_space<vmem>>, vector<1x16x16xbf16>
    %28 = vector.shape_cast %27 : vector<1x16x16xbf16> to vector<16x16xbf16>
    %cst_27 = arith.constant dense<0.000000e+00> : vector<16x324xf32>
    %29 = tpu.matmul %28, %26, %cst_27 {dimension_numbers = #tpu.dot_dimension_numbers<[1], [0], [0], [1], [0, 0, 1, 1], [], []>} : vector<16x16xbf16>, vector<16x324xbf16>, vector<16x324xf32> -> vector<16x324xf32>
    %30 = arith.addf %24, %29 : vector<16x324xf32>
    %c0_28 = arith.constant 0 : index
    %c0_29 = arith.constant 0 : index
    %c20 = arith.constant 20 : index
    %31 = vector.load %arg1[%c0_28, %c0_29, %c20] : memref<1x16x362xbf16, #tpu.memory_space<vmem>>, vector<1x16x324xbf16>
    %32 = vector.shape_cast %31 : vector<1x16x324xbf16> to vector<16x324xbf16>
    %c5 = arith.constant 5 : index
    %c0_30 = arith.constant 0 : index
    %c0_31 = arith.constant 0 : index
    %33 = vector.load %arg2[%c5, %c0_30, %c0_31] : memref<9x16x16xbf16, #tpu.memory_space<vmem>>, vector<1x16x16xbf16>
    %34 = vector.shape_cast %33 : vector<1x16x16xbf16> to vector<16x16xbf16>
    %cst_32 = arith.constant dense<0.000000e+00> : vector<16x324xf32>
    %35 = tpu.matmul %34, %32, %cst_32 {dimension_numbers = #tpu.dot_dimension_numbers<[1], [0], [0], [1], [0, 0, 1, 1], [], []>} : vector<16x16xbf16>, vector<16x324xbf16>, vector<16x324xf32> -> vector<16x324xf32>
    %36 = arith.addf %30, %35 : vector<16x324xf32>
    %c0_33 = arith.constant 0 : index
    %c0_34 = arith.constant 0 : index
    %c36 = arith.constant 36 : index
    %37 = vector.load %arg1[%c0_33, %c0_34, %c36] : memref<1x16x362xbf16, #tpu.memory_space<vmem>>, vector<1x16x324xbf16>
    %38 = vector.shape_cast %37 : vector<1x16x324xbf16> to vector<16x324xbf16>
    %c6 = arith.constant 6 : index
    %c0_35 = arith.constant 0 : index
    %c0_36 = arith.constant 0 : index
    %39 = vector.load %arg2[%c6, %c0_35, %c0_36] : memref<9x16x16xbf16, #tpu.memory_space<vmem>>, vector<1x16x16xbf16>
    %40 = vector.shape_cast %39 : vector<1x16x16xbf16> to vector<16x16xbf16>
    %cst_37 = arith.constant dense<0.000000e+00> : vector<16x324xf32>
    %41 = tpu.matmul %40, %38, %cst_37 {dimension_numbers = #tpu.dot_dimension_numbers<[1], [0], [0], [1], [0, 0, 1, 1], [], []>} : vector<16x16xbf16>, vector<16x324xbf16>, vector<16x324xf32> -> vector<16x324xf32>
    %42 = arith.addf %36, %41 : vector<16x324xf32>
    %c0_38 = arith.constant 0 : index
    %c0_39 = arith.constant 0 : index
    %c37 = arith.constant 37 : index
    %43 = vector.load %arg1[%c0_38, %c0_39, %c37] : memref<1x16x362xbf16, #tpu.memory_space<vmem>>, vector<1x16x324xbf16>
    %44 = vector.shape_cast %43 : vector<1x16x324xbf16> to vector<16x324xbf16>
    %c7 = arith.constant 7 : index
    %c0_40 = arith.constant 0 : index
    %c0_41 = arith.constant 0 : index
    %45 = vector.load %arg2[%c7, %c0_40, %c0_41] : memref<9x16x16xbf16, #tpu.memory_space<vmem>>, vector<1x16x16xbf16>
    %46 = vector.shape_cast %45 : vector<1x16x16xbf16> to vector<16x16xbf16>
    %cst_42 = arith.constant dense<0.000000e+00> : vector<16x324xf32>
    %47 = tpu.matmul %46, %44, %cst_42 {dimension_numbers = #tpu.dot_dimension_numbers<[1], [0], [0], [1], [0, 0, 1, 1], [], []>} : vector<16x16xbf16>, vector<16x324xbf16>, vector<16x324xf32> -> vector<16x324xf32>
    %48 = arith.addf %42, %47 : vector<16x324xf32>
    %c0_43 = arith.constant 0 : index
    %c0_44 = arith.constant 0 : index
    %c38 = arith.constant 38 : index
    %49 = vector.load %arg1[%c0_43, %c0_44, %c38] : memref<1x16x362xbf16, #tpu.memory_space<vmem>>, vector<1x16x324xbf16>
    %50 = vector.shape_cast %49 : vector<1x16x324xbf16> to vector<16x324xbf16>
    %c8 = arith.constant 8 : index
    %c0_45 = arith.constant 0 : index
    %c0_46 = arith.constant 0 : index
    %51 = vector.load %arg2[%c8, %c0_45, %c0_46] : memref<9x16x16xbf16, #tpu.memory_space<vmem>>, vector<1x16x16xbf16>
    %52 = vector.shape_cast %51 : vector<1x16x16xbf16> to vector<16x16xbf16>
    %cst_47 = arith.constant dense<0.000000e+00> : vector<16x324xf32>
    %53 = tpu.matmul %52, %50, %cst_47 {dimension_numbers = #tpu.dot_dimension_numbers<[1], [0], [0], [1], [0, 0, 1, 1], [], []>} : vector<16x16xbf16>, vector<16x324xbf16>, vector<16x324xf32> -> vector<16x324xf32>
    %54 = arith.addf %48, %53 : vector<16x324xf32>
    %c0_48 = arith.constant 0 : index
    %c0_49 = arith.constant 0 : index
    %55 = vector.load %arg3[%c0_48, %c0_49] : memref<16x1xf32, #tpu.memory_space<vmem>>, vector<16x1xf32>
    %56 = vector.broadcast %55 : vector<16x1xf32> to vector<16x324xf32>
    %57 = arith.addf %54, %56 : vector<16x324xf32>
    %c0_50 = arith.constant 0 : index
    %c0_51 = arith.constant 0 : index
    %c19_52 = arith.constant 19 : index
    %58 = vector.load %arg5[%c0_50, %c0_51, %c19_52] : memref<1x16x362xbf16, #tpu.memory_space<vmem>>, vector<1x16x324xbf16>
    %59 = vector.shape_cast %58 : vector<1x16x324xbf16> to vector<16x324xbf16>
    %60 = arith.extf %59 : vector<16x324xbf16> to vector<16x324xf32>
    %61 = arith.addf %57, %60 : vector<16x324xf32>
    %cst_53 = arith.constant 0.000000e+00 : f32
    %62 = vector.broadcast %cst_53 : f32 to vector<16x324xf32>
    %63 = arith.maximumf %61, %62 : vector<16x324xf32>
    %c0_54 = arith.constant 0 : index
    %c0_55 = arith.constant 0 : index
    %64 = vector.load %arg4[%c0_54, %c0_55] : memref<1x324xf32, #tpu.memory_space<vmem>>, vector<1x324xf32>
    %65 = vector.broadcast %64 : vector<1x324xf32> to vector<16x324xf32>
    %66 = arith.mulf %63, %65 : vector<16x324xf32>
    %cst_56 = arith.constant 0.000000e+00 : bf16
    %67 = vector.broadcast %cst_56 : bf16 to vector<16x19xbf16>
    %c0_57 = arith.constant 0 : index
    %c0_58 = arith.constant 0 : index
    %c0_59 = arith.constant 0 : index
    %68 = vector.load %arg6[%c0_57, %c0_58, %c0_59] : memref<1x16x362xbf16, #tpu.memory_space<vmem>>, vector<1x16x19xbf16>
    %69 = vector.shape_cast %68 : vector<1x16x19xbf16> to vector<16x19xbf16>
    %70 = vector.shape_cast %67 : vector<16x19xbf16> to vector<1x16x19xbf16>
    tpu.vector_store %arg6[%c0_57, %c0_58, %c0_59], %70 {strides = array<i32>} : memref<1x16x362xbf16, #tpu.memory_space<vmem>>, vector<1x16x19xbf16>,
    %71 = arith.truncf %66 : vector<16x324xf32> to vector<16x324xbf16>
    %c0_60 = arith.constant 0 : index
    %c0_61 = arith.constant 0 : index
    %c19_62 = arith.constant 19 : index
    %72 = vector.load %arg6[%c0_60, %c0_61, %c19_62] : memref<1x16x362xbf16, #tpu.memory_space<vmem>>, vector<1x16x324xbf16>
    %73 = vector.shape_cast %72 : vector<1x16x324xbf16> to vector<16x324xbf16>
    %74 = vector.shape_cast %71 : vector<16x324xbf16> to vector<1x16x324xbf16>
    tpu.vector_store %arg6[%c0_60, %c0_61, %c19_62], %74 {strides = array<i32>} : memref<1x16x362xbf16, #tpu.memory_space<vmem>>, vector<1x16x324xbf16>,
    %c0_63 = arith.constant 0 : index
    %c0_64 = arith.constant 0 : index
    %c343 = arith.constant 343 : index
    %75 = vector.load %arg6[%c0_63, %c0_64, %c343] : memref<1x16x362xbf16, #tpu.memory_space<vmem>>, vector<1x16x19xbf16>
    %76 = vector.shape_cast %75 : vector<1x16x19xbf16> to vector<16x19xbf16>
    %77 = vector.shape_cast %67 : vector<16x19xbf16> to vector<1x16x19xbf16>
    tpu.vector_store %arg6[%c0_63, %c0_64, %c343], %77 {strides = array<i32>} : memref<1x16x362xbf16, #tpu.memory_space<vmem>>, vector<1x16x19xbf16>,
    return
  }
  func.func @transform_0(%arg0: i32) -> (i32, i32, i32) {
    %c0_i32 = arith.constant 0 : i32
    %c0_i32_0 = arith.constant 0 : i32
    %c0_i32_1 = arith.constant 0 : i32
    return %arg0, %c0_i32, %c0_i32_0 : i32, i32, i32
  }
  func.func @transform_1(%arg0: i32) -> (i32, i32, i32) {
    %c0_i32 = arith.constant 0 : i32
    %c0_i32_0 = arith.constant 0 : i32
    %c0_i32_1 = arith.constant 0 : i32
    %c0_i32_2 = arith.constant 0 : i32
    return %c0_i32, %c0_i32_0, %c0_i32_1 : i32, i32, i32
  }
  func.func @transform_2(%arg0: i32) -> (i32, i32) {
    %c0_i32 = arith.constant 0 : i32
    %c0_i32_0 = arith.constant 0 : i32
    %c0_i32_1 = arith.constant 0 : i32
    return %c0_i32, %c0_i32_0 : i32, i32
  }
  func.func @transform_3(%arg0: i32) -> (i32, i32) {
    %c0_i32 = arith.constant 0 : i32
    %c0_i32_0 = arith.constant 0 : i32
    %c0_i32_1 = arith.constant 0 : i32
    return %c0_i32, %c0_i32_0 : i32, i32
  }
  func.func @transform_4(%arg0: i32) -> (i32, i32, i32) {
    %c0_i32 = arith.constant 0 : i32
    %c0_i32_0 = arith.constant 0 : i32
    %c0_i32_1 = arith.constant 0 : i32
    return %arg0, %c0_i32, %c0_i32_0 : i32, i32, i32
  }
  func.func @transform_5(%arg0: i32) -> (i32, i32, i32) {
    %c0_i32 = arith.constant 0 : i32
    %c0_i32_0 = arith.constant 0 : i32
    %c0_i32_1 = arith.constant 0 : i32
    return %arg0, %c0_i32, %c0_i32_0 : i32, i32, i32
  }
}

module attributes {stable_mosaic.version = 11 : i64} {
  func.func @_conv_slab_kernel(%arg0: i32, %arg1: memref<1x16x362xbf16, #tpu.memory_space<vmem>>, %arg2: memref<9x32x16xbf16, #tpu.memory_space<vmem>>, %arg3: memref<32x1xf32, #tpu.memory_space<vmem>>, %arg4: memref<1x324xf32, #tpu.memory_space<vmem>>, %arg5: memref<1x32x362xbf16, #tpu.memory_space<vmem>>) attributes {dimension_semantics = [#tpu.dimension_semantics<parallel>], iteration_bounds = array<i64: 4>, scalar_prefetch = 0 : i64, scratch_operands = 0 : i64, tpu.core_type = #tpu.core_type<tc>, window_params = [{transform_indices = @transform_0, window_bounds = array<i64: 1, 16, 362>}, {pipeline_mode = #tpu.pipeline_mode<synchronous>, transform_indices = @transform_1, window_bounds = array<i64: 9, 32, 16>}, {pipeline_mode = #tpu.pipeline_mode<synchronous>, transform_indices = @transform_2, window_bounds = array<i64: 32, 1>}, {pipeline_mode = #tpu.pipeline_mode<synchronous>, transform_indices = @transform_3, window_bounds = array<i64: 1, 324>}, {transform_indices = @transform_4, window_bounds = array<i64: 1, 32, 362>}]} {
    %cst = arith.constant 0.000000e+00 : f32
    %0 = vector.broadcast %cst : f32 to vector<32x324xf32>
    %c0 = arith.constant 0 : index
    %c0_0 = arith.constant 0 : index
    %c0_1 = arith.constant 0 : index
    %1 = vector.load %arg1[%c0, %c0_0, %c0_1] : memref<1x16x362xbf16, #tpu.memory_space<vmem>>, vector<1x16x324xbf16>
    %2 = vector.shape_cast %1 : vector<1x16x324xbf16> to vector<16x324xbf16>
    %c0_2 = arith.constant 0 : index
    %c0_3 = arith.constant 0 : index
    %c0_4 = arith.constant 0 : index
    %3 = vector.load %arg2[%c0_2, %c0_3, %c0_4] : memref<9x32x16xbf16, #tpu.memory_space<vmem>>, vector<1x32x16xbf16>
    %4 = vector.shape_cast %3 : vector<1x32x16xbf16> to vector<32x16xbf16>
    %cst_5 = arith.constant dense<0.000000e+00> : vector<32x324xf32>
    %5 = tpu.matmul %4, %2, %cst_5 {dimension_numbers = #tpu.dot_dimension_numbers<[1], [0], [0], [1], [0, 0, 1, 1], [], []>} : vector<32x16xbf16>, vector<16x324xbf16>, vector<32x324xf32> -> vector<32x324xf32>
    %6 = arith.addf %0, %5 : vector<32x324xf32>
    %c0_6 = arith.constant 0 : index
    %c0_7 = arith.constant 0 : index
    %c1 = arith.constant 1 : index
    %7 = vector.load %arg1[%c0_6, %c0_7, %c1] : memref<1x16x362xbf16, #tpu.memory_space<vmem>>, vector<1x16x324xbf16>
    %8 = vector.shape_cast %7 : vector<1x16x324xbf16> to vector<16x324xbf16>
    %c1_8 = arith.constant 1 : index
    %c0_9 = arith.constant 0 : index
    %c0_10 = arith.constant 0 : index
    %9 = vector.load %arg2[%c1_8, %c0_9, %c0_10] : memref<9x32x16xbf16, #tpu.memory_space<vmem>>, vector<1x32x16xbf16>
    %10 = vector.shape_cast %9 : vector<1x32x16xbf16> to vector<32x16xbf16>
    %cst_11 = arith.constant dense<0.000000e+00> : vector<32x324xf32>
    %11 = tpu.matmul %10, %8, %cst_11 {dimension_numbers = #tpu.dot_dimension_numbers<[1], [0], [0], [1], [0, 0, 1, 1], [], []>} : vector<32x16xbf16>, vector<16x324xbf16>, vector<32x324xf32> -> vector<32x324xf32>
    %12 = arith.addf %6, %11 : vector<32x324xf32>
    %c0_12 = arith.constant 0 : index
    %c0_13 = arith.constant 0 : index
    %c2 = arith.constant 2 : index
    %13 = vector.load %arg1[%c0_12, %c0_13, %c2] : memref<1x16x362xbf16, #tpu.memory_space<vmem>>, vector<1x16x324xbf16>
    %14 = vector.shape_cast %13 : vector<1x16x324xbf16> to vector<16x324xbf16>
    %c2_14 = arith.constant 2 : index
    %c0_15 = arith.constant 0 : index
    %c0_16 = arith.constant 0 : index
    %15 = vector.load %arg2[%c2_14, %c0_15, %c0_16] : memref<9x32x16xbf16, #tpu.memory_space<vmem>>, vector<1x32x16xbf16>
    %16 = vector.shape_cast %15 : vector<1x32x16xbf16> to vector<32x16xbf16>
    %cst_17 = arith.constant dense<0.000000e+00> : vector<32x324xf32>
    %17 = tpu.matmul %16, %14, %cst_17 {dimension_numbers = #tpu.dot_dimension_numbers<[1], [0], [0], [1], [0, 0, 1, 1], [], []>} : vector<32x16xbf16>, vector<16x324xbf16>, vector<32x324xf32> -> vector<32x324xf32>
    %18 = arith.addf %12, %17 : vector<32x324xf32>
    %c0_18 = arith.constant 0 : index
    %c0_19 = arith.constant 0 : index
    %c18 = arith.constant 18 : index
    %19 = vector.load %arg1[%c0_18, %c0_19, %c18] : memref<1x16x362xbf16, #tpu.memory_space<vmem>>, vector<1x16x324xbf16>
    %20 = vector.shape_cast %19 : vector<1x16x324xbf16> to vector<16x324xbf16>
    %c3 = arith.constant 3 : index
    %c0_20 = arith.constant 0 : index
    %c0_21 = arith.constant 0 : index
    %21 = vector.load %arg2[%c3, %c0_20, %c0_21] : memref<9x32x16xbf16, #tpu.memory_space<vmem>>, vector<1x32x16xbf16>
    %22 = vector.shape_cast %21 : vector<1x32x16xbf16> to vector<32x16xbf16>
    %cst_22 = arith.constant dense<0.000000e+00> : vector<32x324xf32>
    %23 = tpu.matmul %22, %20, %cst_22 {dimension_numbers = #tpu.dot_dimension_numbers<[1], [0], [0], [1], [0, 0, 1, 1], [], []>} : vector<32x16xbf16>, vector<16x324xbf16>, vector<32x324xf32> -> vector<32x324xf32>
    %24 = arith.addf %18, %23 : vector<32x324xf32>
    %c0_23 = arith.constant 0 : index
    %c0_24 = arith.constant 0 : index
    %c19 = arith.constant 19 : index
    %25 = vector.load %arg1[%c0_23, %c0_24, %c19] : memref<1x16x362xbf16, #tpu.memory_space<vmem>>, vector<1x16x324xbf16>
    %26 = vector.shape_cast %25 : vector<1x16x324xbf16> to vector<16x324xbf16>
    %c4 = arith.constant 4 : index
    %c0_25 = arith.constant 0 : index
    %c0_26 = arith.constant 0 : index
    %27 = vector.load %arg2[%c4, %c0_25, %c0_26] : memref<9x32x16xbf16, #tpu.memory_space<vmem>>, vector<1x32x16xbf16>
    %28 = vector.shape_cast %27 : vector<1x32x16xbf16> to vector<32x16xbf16>
    %cst_27 = arith.constant dense<0.000000e+00> : vector<32x324xf32>
    %29 = tpu.matmul %28, %26, %cst_27 {dimension_numbers = #tpu.dot_dimension_numbers<[1], [0], [0], [1], [0, 0, 1, 1], [], []>} : vector<32x16xbf16>, vector<16x324xbf16>, vector<32x324xf32> -> vector<32x324xf32>
    %30 = arith.addf %24, %29 : vector<32x324xf32>
    %c0_28 = arith.constant 0 : index
    %c0_29 = arith.constant 0 : index
    %c20 = arith.constant 20 : index
    %31 = vector.load %arg1[%c0_28, %c0_29, %c20] : memref<1x16x362xbf16, #tpu.memory_space<vmem>>, vector<1x16x324xbf16>
    %32 = vector.shape_cast %31 : vector<1x16x324xbf16> to vector<16x324xbf16>
    %c5 = arith.constant 5 : index
    %c0_30 = arith.constant 0 : index
    %c0_31 = arith.constant 0 : index
    %33 = vector.load %arg2[%c5, %c0_30, %c0_31] : memref<9x32x16xbf16, #tpu.memory_space<vmem>>, vector<1x32x16xbf16>
    %34 = vector.shape_cast %33 : vector<1x32x16xbf16> to vector<32x16xbf16>
    %cst_32 = arith.constant dense<0.000000e+00> : vector<32x324xf32>
    %35 = tpu.matmul %34, %32, %cst_32 {dimension_numbers = #tpu.dot_dimension_numbers<[1], [0], [0], [1], [0, 0, 1, 1], [], []>} : vector<32x16xbf16>, vector<16x324xbf16>, vector<32x324xf32> -> vector<32x324xf32>
    %36 = arith.addf %30, %35 : vector<32x324xf32>
    %c0_33 = arith.constant 0 : index
    %c0_34 = arith.constant 0 : index
    %c36 = arith.constant 36 : index
    %37 = vector.load %arg1[%c0_33, %c0_34, %c36] : memref<1x16x362xbf16, #tpu.memory_space<vmem>>, vector<1x16x324xbf16>
    %38 = vector.shape_cast %37 : vector<1x16x324xbf16> to vector<16x324xbf16>
    %c6 = arith.constant 6 : index
    %c0_35 = arith.constant 0 : index
    %c0_36 = arith.constant 0 : index
    %39 = vector.load %arg2[%c6, %c0_35, %c0_36] : memref<9x32x16xbf16, #tpu.memory_space<vmem>>, vector<1x32x16xbf16>
    %40 = vector.shape_cast %39 : vector<1x32x16xbf16> to vector<32x16xbf16>
    %cst_37 = arith.constant dense<0.000000e+00> : vector<32x324xf32>
    %41 = tpu.matmul %40, %38, %cst_37 {dimension_numbers = #tpu.dot_dimension_numbers<[1], [0], [0], [1], [0, 0, 1, 1], [], []>} : vector<32x16xbf16>, vector<16x324xbf16>, vector<32x324xf32> -> vector<32x324xf32>
    %42 = arith.addf %36, %41 : vector<32x324xf32>
    %c0_38 = arith.constant 0 : index
    %c0_39 = arith.constant 0 : index
    %c37 = arith.constant 37 : index
    %43 = vector.load %arg1[%c0_38, %c0_39, %c37] : memref<1x16x362xbf16, #tpu.memory_space<vmem>>, vector<1x16x324xbf16>
    %44 = vector.shape_cast %43 : vector<1x16x324xbf16> to vector<16x324xbf16>
    %c7 = arith.constant 7 : index
    %c0_40 = arith.constant 0 : index
    %c0_41 = arith.constant 0 : index
    %45 = vector.load %arg2[%c7, %c0_40, %c0_41] : memref<9x32x16xbf16, #tpu.memory_space<vmem>>, vector<1x32x16xbf16>
    %46 = vector.shape_cast %45 : vector<1x32x16xbf16> to vector<32x16xbf16>
    %cst_42 = arith.constant dense<0.000000e+00> : vector<32x324xf32>
    %47 = tpu.matmul %46, %44, %cst_42 {dimension_numbers = #tpu.dot_dimension_numbers<[1], [0], [0], [1], [0, 0, 1, 1], [], []>} : vector<32x16xbf16>, vector<16x324xbf16>, vector<32x324xf32> -> vector<32x324xf32>
    %48 = arith.addf %42, %47 : vector<32x324xf32>
    %c0_43 = arith.constant 0 : index
    %c0_44 = arith.constant 0 : index
    %c38 = arith.constant 38 : index
    %49 = vector.load %arg1[%c0_43, %c0_44, %c38] : memref<1x16x362xbf16, #tpu.memory_space<vmem>>, vector<1x16x324xbf16>
    %50 = vector.shape_cast %49 : vector<1x16x324xbf16> to vector<16x324xbf16>
    %c8 = arith.constant 8 : index
    %c0_45 = arith.constant 0 : index
    %c0_46 = arith.constant 0 : index
    %51 = vector.load %arg2[%c8, %c0_45, %c0_46] : memref<9x32x16xbf16, #tpu.memory_space<vmem>>, vector<1x32x16xbf16>
    %52 = vector.shape_cast %51 : vector<1x32x16xbf16> to vector<32x16xbf16>
    %cst_47 = arith.constant dense<0.000000e+00> : vector<32x324xf32>
    %53 = tpu.matmul %52, %50, %cst_47 {dimension_numbers = #tpu.dot_dimension_numbers<[1], [0], [0], [1], [0, 0, 1, 1], [], []>} : vector<32x16xbf16>, vector<16x324xbf16>, vector<32x324xf32> -> vector<32x324xf32>
    %54 = arith.addf %48, %53 : vector<32x324xf32>
    %c0_48 = arith.constant 0 : index
    %c0_49 = arith.constant 0 : index
    %55 = vector.load %arg3[%c0_48, %c0_49] : memref<32x1xf32, #tpu.memory_space<vmem>>, vector<32x1xf32>
    %56 = vector.broadcast %55 : vector<32x1xf32> to vector<32x324xf32>
    %57 = arith.addf %54, %56 : vector<32x324xf32>
    %cst_50 = arith.constant 0.000000e+00 : f32
    %58 = vector.broadcast %cst_50 : f32 to vector<32x324xf32>
    %59 = arith.maximumf %57, %58 : vector<32x324xf32>
    %c0_51 = arith.constant 0 : index
    %c0_52 = arith.constant 0 : index
    %60 = vector.load %arg4[%c0_51, %c0_52] : memref<1x324xf32, #tpu.memory_space<vmem>>, vector<1x324xf32>
    %61 = vector.broadcast %60 : vector<1x324xf32> to vector<32x324xf32>
    %62 = arith.mulf %59, %61 : vector<32x324xf32>
    %cst_53 = arith.constant 0.000000e+00 : bf16
    %63 = vector.broadcast %cst_53 : bf16 to vector<32x19xbf16>
    %c0_54 = arith.constant 0 : index
    %c0_55 = arith.constant 0 : index
    %c0_56 = arith.constant 0 : index
    %64 = vector.load %arg5[%c0_54, %c0_55, %c0_56] : memref<1x32x362xbf16, #tpu.memory_space<vmem>>, vector<1x32x19xbf16>
    %65 = vector.shape_cast %64 : vector<1x32x19xbf16> to vector<32x19xbf16>
    %66 = vector.shape_cast %63 : vector<32x19xbf16> to vector<1x32x19xbf16>
    tpu.vector_store %arg5[%c0_54, %c0_55, %c0_56], %66 {strides = array<i32>} : memref<1x32x362xbf16, #tpu.memory_space<vmem>>, vector<1x32x19xbf16>,
    %67 = arith.truncf %62 : vector<32x324xf32> to vector<32x324xbf16>
    %c0_57 = arith.constant 0 : index
    %c0_58 = arith.constant 0 : index
    %c19_59 = arith.constant 19 : index
    %68 = vector.load %arg5[%c0_57, %c0_58, %c19_59] : memref<1x32x362xbf16, #tpu.memory_space<vmem>>, vector<1x32x324xbf16>
    %69 = vector.shape_cast %68 : vector<1x32x324xbf16> to vector<32x324xbf16>
    %70 = vector.shape_cast %67 : vector<32x324xbf16> to vector<1x32x324xbf16>
    tpu.vector_store %arg5[%c0_57, %c0_58, %c19_59], %70 {strides = array<i32>} : memref<1x32x362xbf16, #tpu.memory_space<vmem>>, vector<1x32x324xbf16>,
    %c0_60 = arith.constant 0 : index
    %c0_61 = arith.constant 0 : index
    %c343 = arith.constant 343 : index
    %71 = vector.load %arg5[%c0_60, %c0_61, %c343] : memref<1x32x362xbf16, #tpu.memory_space<vmem>>, vector<1x32x19xbf16>
    %72 = vector.shape_cast %71 : vector<1x32x19xbf16> to vector<32x19xbf16>
    %73 = vector.shape_cast %63 : vector<32x19xbf16> to vector<1x32x19xbf16>
    tpu.vector_store %arg5[%c0_60, %c0_61, %c343], %73 {strides = array<i32>} : memref<1x32x362xbf16, #tpu.memory_space<vmem>>, vector<1x32x19xbf16>,
    return
  }
  func.func @transform_0(%arg0: i32) -> (i32, i32, i32) {
    %c0_i32 = arith.constant 0 : i32
    %c0_i32_0 = arith.constant 0 : i32
    %c0_i32_1 = arith.constant 0 : i32
    return %arg0, %c0_i32, %c0_i32_0 : i32, i32, i32
  }
  func.func @transform_1(%arg0: i32) -> (i32, i32, i32) {
    %c0_i32 = arith.constant 0 : i32
    %c0_i32_0 = arith.constant 0 : i32
    %c0_i32_1 = arith.constant 0 : i32
    %c0_i32_2 = arith.constant 0 : i32
    return %c0_i32, %c0_i32_0, %c0_i32_1 : i32, i32, i32
  }
  func.func @transform_2(%arg0: i32) -> (i32, i32) {
    %c0_i32 = arith.constant 0 : i32
    %c0_i32_0 = arith.constant 0 : i32
    %c0_i32_1 = arith.constant 0 : i32
    return %c0_i32, %c0_i32_0 : i32, i32
  }
  func.func @transform_3(%arg0: i32) -> (i32, i32) {
    %c0_i32 = arith.constant 0 : i32
    %c0_i32_0 = arith.constant 0 : i32
    %c0_i32_1 = arith.constant 0 : i32
    return %c0_i32, %c0_i32_0 : i32, i32
  }
  func.func @transform_4(%arg0: i32) -> (i32, i32, i32) {
    %c0_i32 = arith.constant 0 : i32
    %c0_i32_0 = arith.constant 0 : i32
    %c0_i32_1 = arith.constant 0 : i32
    return %arg0, %c0_i32, %c0_i32_0 : i32, i32, i32
  }
}

module attributes {stable_mosaic.version = 11 : i64} {
  func.func @_conv_slab_kernel(%arg0: i32, %arg1: memref<1x32x122xbf16, #tpu.memory_space<vmem>>, %arg2: memref<9x32x32xbf16, #tpu.memory_space<vmem>>, %arg3: memref<32x1xf32, #tpu.memory_space<vmem>>, %arg4: memref<1x100xf32, #tpu.memory_space<vmem>>, %arg5: memref<1x32x122xbf16, #tpu.memory_space<vmem>>) attributes {dimension_semantics = [#tpu.dimension_semantics<parallel>], iteration_bounds = array<i64: 4>, scalar_prefetch = 0 : i64, scratch_operands = 0 : i64, tpu.core_type = #tpu.core_type<tc>, window_params = [{transform_indices = @transform_0, window_bounds = array<i64: 1, 32, 122>}, {pipeline_mode = #tpu.pipeline_mode<synchronous>, transform_indices = @transform_1, window_bounds = array<i64: 9, 32, 32>}, {pipeline_mode = #tpu.pipeline_mode<synchronous>, transform_indices = @transform_2, window_bounds = array<i64: 32, 1>}, {pipeline_mode = #tpu.pipeline_mode<synchronous>, transform_indices = @transform_3, window_bounds = array<i64: 1, 100>}, {transform_indices = @transform_4, window_bounds = array<i64: 1, 32, 122>}]} {
    %cst = arith.constant 0.000000e+00 : f32
    %0 = vector.broadcast %cst : f32 to vector<32x100xf32>
    %c0 = arith.constant 0 : index
    %c0_0 = arith.constant 0 : index
    %c0_1 = arith.constant 0 : index
    %1 = vector.load %arg1[%c0, %c0_0, %c0_1] : memref<1x32x122xbf16, #tpu.memory_space<vmem>>, vector<1x32x100xbf16>
    %2 = vector.shape_cast %1 : vector<1x32x100xbf16> to vector<32x100xbf16>
    %c0_2 = arith.constant 0 : index
    %c0_3 = arith.constant 0 : index
    %c0_4 = arith.constant 0 : index
    %3 = vector.load %arg2[%c0_2, %c0_3, %c0_4] : memref<9x32x32xbf16, #tpu.memory_space<vmem>>, vector<1x32x32xbf16>
    %4 = vector.shape_cast %3 : vector<1x32x32xbf16> to vector<32x32xbf16>
    %cst_5 = arith.constant dense<0.000000e+00> : vector<32x100xf32>
    %5 = tpu.matmul %4, %2, %cst_5 {dimension_numbers = #tpu.dot_dimension_numbers<[1], [0], [0], [1], [0, 0, 1, 1], [], []>} : vector<32x32xbf16>, vector<32x100xbf16>, vector<32x100xf32> -> vector<32x100xf32>
    %6 = arith.addf %0, %5 : vector<32x100xf32>
    %c0_6 = arith.constant 0 : index
    %c0_7 = arith.constant 0 : index
    %c1 = arith.constant 1 : index
    %7 = vector.load %arg1[%c0_6, %c0_7, %c1] : memref<1x32x122xbf16, #tpu.memory_space<vmem>>, vector<1x32x100xbf16>
    %8 = vector.shape_cast %7 : vector<1x32x100xbf16> to vector<32x100xbf16>
    %c1_8 = arith.constant 1 : index
    %c0_9 = arith.constant 0 : index
    %c0_10 = arith.constant 0 : index
    %9 = vector.load %arg2[%c1_8, %c0_9, %c0_10] : memref<9x32x32xbf16, #tpu.memory_space<vmem>>, vector<1x32x32xbf16>
    %10 = vector.shape_cast %9 : vector<1x32x32xbf16> to vector<32x32xbf16>
    %cst_11 = arith.constant dense<0.000000e+00> : vector<32x100xf32>
    %11 = tpu.matmul %10, %8, %cst_11 {dimension_numbers = #tpu.dot_dimension_numbers<[1], [0], [0], [1], [0, 0, 1, 1], [], []>} : vector<32x32xbf16>, vector<32x100xbf16>, vector<32x100xf32> -> vector<32x100xf32>
    %12 = arith.addf %6, %11 : vector<32x100xf32>
    %c0_12 = arith.constant 0 : index
    %c0_13 = arith.constant 0 : index
    %c2 = arith.constant 2 : index
    %13 = vector.load %arg1[%c0_12, %c0_13, %c2] : memref<1x32x122xbf16, #tpu.memory_space<vmem>>, vector<1x32x100xbf16>
    %14 = vector.shape_cast %13 : vector<1x32x100xbf16> to vector<32x100xbf16>
    %c2_14 = arith.constant 2 : index
    %c0_15 = arith.constant 0 : index
    %c0_16 = arith.constant 0 : index
    %15 = vector.load %arg2[%c2_14, %c0_15, %c0_16] : memref<9x32x32xbf16, #tpu.memory_space<vmem>>, vector<1x32x32xbf16>
    %16 = vector.shape_cast %15 : vector<1x32x32xbf16> to vector<32x32xbf16>
    %cst_17 = arith.constant dense<0.000000e+00> : vector<32x100xf32>
    %17 = tpu.matmul %16, %14, %cst_17 {dimension_numbers = #tpu.dot_dimension_numbers<[1], [0], [0], [1], [0, 0, 1, 1], [], []>} : vector<32x32xbf16>, vector<32x100xbf16>, vector<32x100xf32> -> vector<32x100xf32>
    %18 = arith.addf %12, %17 : vector<32x100xf32>
    %c0_18 = arith.constant 0 : index
    %c0_19 = arith.constant 0 : index
    %c10 = arith.constant 10 : index
    %19 = vector.load %arg1[%c0_18, %c0_19, %c10] : memref<1x32x122xbf16, #tpu.memory_space<vmem>>, vector<1x32x100xbf16>
    %20 = vector.shape_cast %19 : vector<1x32x100xbf16> to vector<32x100xbf16>
    %c3 = arith.constant 3 : index
    %c0_20 = arith.constant 0 : index
    %c0_21 = arith.constant 0 : index
    %21 = vector.load %arg2[%c3, %c0_20, %c0_21] : memref<9x32x32xbf16, #tpu.memory_space<vmem>>, vector<1x32x32xbf16>
    %22 = vector.shape_cast %21 : vector<1x32x32xbf16> to vector<32x32xbf16>
    %cst_22 = arith.constant dense<0.000000e+00> : vector<32x100xf32>
    %23 = tpu.matmul %22, %20, %cst_22 {dimension_numbers = #tpu.dot_dimension_numbers<[1], [0], [0], [1], [0, 0, 1, 1], [], []>} : vector<32x32xbf16>, vector<32x100xbf16>, vector<32x100xf32> -> vector<32x100xf32>
    %24 = arith.addf %18, %23 : vector<32x100xf32>
    %c0_23 = arith.constant 0 : index
    %c0_24 = arith.constant 0 : index
    %c11 = arith.constant 11 : index
    %25 = vector.load %arg1[%c0_23, %c0_24, %c11] : memref<1x32x122xbf16, #tpu.memory_space<vmem>>, vector<1x32x100xbf16>
    %26 = vector.shape_cast %25 : vector<1x32x100xbf16> to vector<32x100xbf16>
    %c4 = arith.constant 4 : index
    %c0_25 = arith.constant 0 : index
    %c0_26 = arith.constant 0 : index
    %27 = vector.load %arg2[%c4, %c0_25, %c0_26] : memref<9x32x32xbf16, #tpu.memory_space<vmem>>, vector<1x32x32xbf16>
    %28 = vector.shape_cast %27 : vector<1x32x32xbf16> to vector<32x32xbf16>
    %cst_27 = arith.constant dense<0.000000e+00> : vector<32x100xf32>
    %29 = tpu.matmul %28, %26, %cst_27 {dimension_numbers = #tpu.dot_dimension_numbers<[1], [0], [0], [1], [0, 0, 1, 1], [], []>} : vector<32x32xbf16>, vector<32x100xbf16>, vector<32x100xf32> -> vector<32x100xf32>
    %30 = arith.addf %24, %29 : vector<32x100xf32>
    %c0_28 = arith.constant 0 : index
    %c0_29 = arith.constant 0 : index
    %c12 = arith.constant 12 : index
    %31 = vector.load %arg1[%c0_28, %c0_29, %c12] : memref<1x32x122xbf16, #tpu.memory_space<vmem>>, vector<1x32x100xbf16>
    %32 = vector.shape_cast %31 : vector<1x32x100xbf16> to vector<32x100xbf16>
    %c5 = arith.constant 5 : index
    %c0_30 = arith.constant 0 : index
    %c0_31 = arith.constant 0 : index
    %33 = vector.load %arg2[%c5, %c0_30, %c0_31] : memref<9x32x32xbf16, #tpu.memory_space<vmem>>, vector<1x32x32xbf16>
    %34 = vector.shape_cast %33 : vector<1x32x32xbf16> to vector<32x32xbf16>
    %cst_32 = arith.constant dense<0.000000e+00> : vector<32x100xf32>
    %35 = tpu.matmul %34, %32, %cst_32 {dimension_numbers = #tpu.dot_dimension_numbers<[1], [0], [0], [1], [0, 0, 1, 1], [], []>} : vector<32x32xbf16>, vector<32x100xbf16>, vector<32x100xf32> -> vector<32x100xf32>
    %36 = arith.addf %30, %35 : vector<32x100xf32>
    %c0_33 = arith.constant 0 : index
    %c0_34 = arith.constant 0 : index
    %c20 = arith.constant 20 : index
    %37 = vector.load %arg1[%c0_33, %c0_34, %c20] : memref<1x32x122xbf16, #tpu.memory_space<vmem>>, vector<1x32x100xbf16>
    %38 = vector.shape_cast %37 : vector<1x32x100xbf16> to vector<32x100xbf16>
    %c6 = arith.constant 6 : index
    %c0_35 = arith.constant 0 : index
    %c0_36 = arith.constant 0 : index
    %39 = vector.load %arg2[%c6, %c0_35, %c0_36] : memref<9x32x32xbf16, #tpu.memory_space<vmem>>, vector<1x32x32xbf16>
    %40 = vector.shape_cast %39 : vector<1x32x32xbf16> to vector<32x32xbf16>
    %cst_37 = arith.constant dense<0.000000e+00> : vector<32x100xf32>
    %41 = tpu.matmul %40, %38, %cst_37 {dimension_numbers = #tpu.dot_dimension_numbers<[1], [0], [0], [1], [0, 0, 1, 1], [], []>} : vector<32x32xbf16>, vector<32x100xbf16>, vector<32x100xf32> -> vector<32x100xf32>
    %42 = arith.addf %36, %41 : vector<32x100xf32>
    %c0_38 = arith.constant 0 : index
    %c0_39 = arith.constant 0 : index
    %c21 = arith.constant 21 : index
    %43 = vector.load %arg1[%c0_38, %c0_39, %c21] : memref<1x32x122xbf16, #tpu.memory_space<vmem>>, vector<1x32x100xbf16>
    %44 = vector.shape_cast %43 : vector<1x32x100xbf16> to vector<32x100xbf16>
    %c7 = arith.constant 7 : index
    %c0_40 = arith.constant 0 : index
    %c0_41 = arith.constant 0 : index
    %45 = vector.load %arg2[%c7, %c0_40, %c0_41] : memref<9x32x32xbf16, #tpu.memory_space<vmem>>, vector<1x32x32xbf16>
    %46 = vector.shape_cast %45 : vector<1x32x32xbf16> to vector<32x32xbf16>
    %cst_42 = arith.constant dense<0.000000e+00> : vector<32x100xf32>
    %47 = tpu.matmul %46, %44, %cst_42 {dimension_numbers = #tpu.dot_dimension_numbers<[1], [0], [0], [1], [0, 0, 1, 1], [], []>} : vector<32x32xbf16>, vector<32x100xbf16>, vector<32x100xf32> -> vector<32x100xf32>
    %48 = arith.addf %42, %47 : vector<32x100xf32>
    %c0_43 = arith.constant 0 : index
    %c0_44 = arith.constant 0 : index
    %c22 = arith.constant 22 : index
    %49 = vector.load %arg1[%c0_43, %c0_44, %c22] : memref<1x32x122xbf16, #tpu.memory_space<vmem>>, vector<1x32x100xbf16>
    %50 = vector.shape_cast %49 : vector<1x32x100xbf16> to vector<32x100xbf16>
    %c8 = arith.constant 8 : index
    %c0_45 = arith.constant 0 : index
    %c0_46 = arith.constant 0 : index
    %51 = vector.load %arg2[%c8, %c0_45, %c0_46] : memref<9x32x32xbf16, #tpu.memory_space<vmem>>, vector<1x32x32xbf16>
    %52 = vector.shape_cast %51 : vector<1x32x32xbf16> to vector<32x32xbf16>
    %cst_47 = arith.constant dense<0.000000e+00> : vector<32x100xf32>
    %53 = tpu.matmul %52, %50, %cst_47 {dimension_numbers = #tpu.dot_dimension_numbers<[1], [0], [0], [1], [0, 0, 1, 1], [], []>} : vector<32x32xbf16>, vector<32x100xbf16>, vector<32x100xf32> -> vector<32x100xf32>
    %54 = arith.addf %48, %53 : vector<32x100xf32>
    %c0_48 = arith.constant 0 : index
    %c0_49 = arith.constant 0 : index
    %55 = vector.load %arg3[%c0_48, %c0_49] : memref<32x1xf32, #tpu.memory_space<vmem>>, vector<32x1xf32>
    %56 = vector.broadcast %55 : vector<32x1xf32> to vector<32x100xf32>
    %57 = arith.addf %54, %56 : vector<32x100xf32>
    %cst_50 = arith.constant 0.000000e+00 : f32
    %58 = vector.broadcast %cst_50 : f32 to vector<32x100xf32>
    %59 = arith.maximumf %57, %58 : vector<32x100xf32>
    %c0_51 = arith.constant 0 : index
    %c0_52 = arith.constant 0 : index
    %60 = vector.load %arg4[%c0_51, %c0_52] : memref<1x100xf32, #tpu.memory_space<vmem>>, vector<1x100xf32>
    %61 = vector.broadcast %60 : vector<1x100xf32> to vector<32x100xf32>
    %62 = arith.mulf %59, %61 : vector<32x100xf32>
    %cst_53 = arith.constant 0.000000e+00 : bf16
    %63 = vector.broadcast %cst_53 : bf16 to vector<32x11xbf16>
    %c0_54 = arith.constant 0 : index
    %c0_55 = arith.constant 0 : index
    %c0_56 = arith.constant 0 : index
    %64 = vector.load %arg5[%c0_54, %c0_55, %c0_56] : memref<1x32x122xbf16, #tpu.memory_space<vmem>>, vector<1x32x11xbf16>
    %65 = vector.shape_cast %64 : vector<1x32x11xbf16> to vector<32x11xbf16>
    %66 = vector.shape_cast %63 : vector<32x11xbf16> to vector<1x32x11xbf16>
    tpu.vector_store %arg5[%c0_54, %c0_55, %c0_56], %66 {strides = array<i32>} : memref<1x32x122xbf16, #tpu.memory_space<vmem>>, vector<1x32x11xbf16>,
    %67 = arith.truncf %62 : vector<32x100xf32> to vector<32x100xbf16>
    %c0_57 = arith.constant 0 : index
    %c0_58 = arith.constant 0 : index
    %c11_59 = arith.constant 11 : index
    %68 = vector.load %arg5[%c0_57, %c0_58, %c11_59] : memref<1x32x122xbf16, #tpu.memory_space<vmem>>, vector<1x32x100xbf16>
    %69 = vector.shape_cast %68 : vector<1x32x100xbf16> to vector<32x100xbf16>
    %70 = vector.shape_cast %67 : vector<32x100xbf16> to vector<1x32x100xbf16>
    tpu.vector_store %arg5[%c0_57, %c0_58, %c11_59], %70 {strides = array<i32>} : memref<1x32x122xbf16, #tpu.memory_space<vmem>>, vector<1x32x100xbf16>,
    %c0_60 = arith.constant 0 : index
    %c0_61 = arith.constant 0 : index
    %c111 = arith.constant 111 : index
    %71 = vector.load %arg5[%c0_60, %c0_61, %c111] : memref<1x32x122xbf16, #tpu.memory_space<vmem>>, vector<1x32x11xbf16>
    %72 = vector.shape_cast %71 : vector<1x32x11xbf16> to vector<32x11xbf16>
    %73 = vector.shape_cast %63 : vector<32x11xbf16> to vector<1x32x11xbf16>
    tpu.vector_store %arg5[%c0_60, %c0_61, %c111], %73 {strides = array<i32>} : memref<1x32x122xbf16, #tpu.memory_space<vmem>>, vector<1x32x11xbf16>,
    return
  }
  func.func @transform_0(%arg0: i32) -> (i32, i32, i32) {
    %c0_i32 = arith.constant 0 : i32
    %c0_i32_0 = arith.constant 0 : i32
    %c0_i32_1 = arith.constant 0 : i32
    return %arg0, %c0_i32, %c0_i32_0 : i32, i32, i32
  }
  func.func @transform_1(%arg0: i32) -> (i32, i32, i32) {
    %c0_i32 = arith.constant 0 : i32
    %c0_i32_0 = arith.constant 0 : i32
    %c0_i32_1 = arith.constant 0 : i32
    %c0_i32_2 = arith.constant 0 : i32
    return %c0_i32, %c0_i32_0, %c0_i32_1 : i32, i32, i32
  }
  func.func @transform_2(%arg0: i32) -> (i32, i32) {
    %c0_i32 = arith.constant 0 : i32
    %c0_i32_0 = arith.constant 0 : i32
    %c0_i32_1 = arith.constant 0 : i32
    return %c0_i32, %c0_i32_0 : i32, i32
  }
  func.func @transform_3(%arg0: i32) -> (i32, i32) {
    %c0_i32 = arith.constant 0 : i32
    %c0_i32_0 = arith.constant 0 : i32
    %c0_i32_1 = arith.constant 0 : i32
    return %c0_i32, %c0_i32_0 : i32, i32
  }
  func.func @transform_4(%arg0: i32) -> (i32, i32, i32) {
    %c0_i32 = arith.constant 0 : i32
    %c0_i32_0 = arith.constant 0 : i32
    %c0_i32_1 = arith.constant 0 : i32
    return %arg0, %c0_i32, %c0_i32_0 : i32, i32, i32
  }
}

module attributes {stable_mosaic.version = 11 : i64} {
  func.func @_conv_slab_kernel(%arg0: i32, %arg1: memref<1x32x122xbf16, #tpu.memory_space<vmem>>, %arg2: memref<9x32x32xbf16, #tpu.memory_space<vmem>>, %arg3: memref<32x1xf32, #tpu.memory_space<vmem>>, %arg4: memref<1x100xf32, #tpu.memory_space<vmem>>, %arg5: memref<1x32x122xbf16, #tpu.memory_space<vmem>>, %arg6: memref<1x32x122xbf16, #tpu.memory_space<vmem>>) attributes {dimension_semantics = [#tpu.dimension_semantics<parallel>], iteration_bounds = array<i64: 4>, scalar_prefetch = 0 : i64, scratch_operands = 0 : i64, tpu.core_type = #tpu.core_type<tc>, window_params = [{transform_indices = @transform_0, window_bounds = array<i64: 1, 32, 122>}, {pipeline_mode = #tpu.pipeline_mode<synchronous>, transform_indices = @transform_1, window_bounds = array<i64: 9, 32, 32>}, {pipeline_mode = #tpu.pipeline_mode<synchronous>, transform_indices = @transform_2, window_bounds = array<i64: 32, 1>}, {pipeline_mode = #tpu.pipeline_mode<synchronous>, transform_indices = @transform_3, window_bounds = array<i64: 1, 100>}, {transform_indices = @transform_4, window_bounds = array<i64: 1, 32, 122>}, {transform_indices = @transform_5, window_bounds = array<i64: 1, 32, 122>}]} {
    %cst = arith.constant 0.000000e+00 : f32
    %0 = vector.broadcast %cst : f32 to vector<32x100xf32>
    %c0 = arith.constant 0 : index
    %c0_0 = arith.constant 0 : index
    %c0_1 = arith.constant 0 : index
    %1 = vector.load %arg1[%c0, %c0_0, %c0_1] : memref<1x32x122xbf16, #tpu.memory_space<vmem>>, vector<1x32x100xbf16>
    %2 = vector.shape_cast %1 : vector<1x32x100xbf16> to vector<32x100xbf16>
    %c0_2 = arith.constant 0 : index
    %c0_3 = arith.constant 0 : index
    %c0_4 = arith.constant 0 : index
    %3 = vector.load %arg2[%c0_2, %c0_3, %c0_4] : memref<9x32x32xbf16, #tpu.memory_space<vmem>>, vector<1x32x32xbf16>
    %4 = vector.shape_cast %3 : vector<1x32x32xbf16> to vector<32x32xbf16>
    %cst_5 = arith.constant dense<0.000000e+00> : vector<32x100xf32>
    %5 = tpu.matmul %4, %2, %cst_5 {dimension_numbers = #tpu.dot_dimension_numbers<[1], [0], [0], [1], [0, 0, 1, 1], [], []>} : vector<32x32xbf16>, vector<32x100xbf16>, vector<32x100xf32> -> vector<32x100xf32>
    %6 = arith.addf %0, %5 : vector<32x100xf32>
    %c0_6 = arith.constant 0 : index
    %c0_7 = arith.constant 0 : index
    %c1 = arith.constant 1 : index
    %7 = vector.load %arg1[%c0_6, %c0_7, %c1] : memref<1x32x122xbf16, #tpu.memory_space<vmem>>, vector<1x32x100xbf16>
    %8 = vector.shape_cast %7 : vector<1x32x100xbf16> to vector<32x100xbf16>
    %c1_8 = arith.constant 1 : index
    %c0_9 = arith.constant 0 : index
    %c0_10 = arith.constant 0 : index
    %9 = vector.load %arg2[%c1_8, %c0_9, %c0_10] : memref<9x32x32xbf16, #tpu.memory_space<vmem>>, vector<1x32x32xbf16>
    %10 = vector.shape_cast %9 : vector<1x32x32xbf16> to vector<32x32xbf16>
    %cst_11 = arith.constant dense<0.000000e+00> : vector<32x100xf32>
    %11 = tpu.matmul %10, %8, %cst_11 {dimension_numbers = #tpu.dot_dimension_numbers<[1], [0], [0], [1], [0, 0, 1, 1], [], []>} : vector<32x32xbf16>, vector<32x100xbf16>, vector<32x100xf32> -> vector<32x100xf32>
    %12 = arith.addf %6, %11 : vector<32x100xf32>
    %c0_12 = arith.constant 0 : index
    %c0_13 = arith.constant 0 : index
    %c2 = arith.constant 2 : index
    %13 = vector.load %arg1[%c0_12, %c0_13, %c2] : memref<1x32x122xbf16, #tpu.memory_space<vmem>>, vector<1x32x100xbf16>
    %14 = vector.shape_cast %13 : vector<1x32x100xbf16> to vector<32x100xbf16>
    %c2_14 = arith.constant 2 : index
    %c0_15 = arith.constant 0 : index
    %c0_16 = arith.constant 0 : index
    %15 = vector.load %arg2[%c2_14, %c0_15, %c0_16] : memref<9x32x32xbf16, #tpu.memory_space<vmem>>, vector<1x32x32xbf16>
    %16 = vector.shape_cast %15 : vector<1x32x32xbf16> to vector<32x32xbf16>
    %cst_17 = arith.constant dense<0.000000e+00> : vector<32x100xf32>
    %17 = tpu.matmul %16, %14, %cst_17 {dimension_numbers = #tpu.dot_dimension_numbers<[1], [0], [0], [1], [0, 0, 1, 1], [], []>} : vector<32x32xbf16>, vector<32x100xbf16>, vector<32x100xf32> -> vector<32x100xf32>
    %18 = arith.addf %12, %17 : vector<32x100xf32>
    %c0_18 = arith.constant 0 : index
    %c0_19 = arith.constant 0 : index
    %c10 = arith.constant 10 : index
    %19 = vector.load %arg1[%c0_18, %c0_19, %c10] : memref<1x32x122xbf16, #tpu.memory_space<vmem>>, vector<1x32x100xbf16>
    %20 = vector.shape_cast %19 : vector<1x32x100xbf16> to vector<32x100xbf16>
    %c3 = arith.constant 3 : index
    %c0_20 = arith.constant 0 : index
    %c0_21 = arith.constant 0 : index
    %21 = vector.load %arg2[%c3, %c0_20, %c0_21] : memref<9x32x32xbf16, #tpu.memory_space<vmem>>, vector<1x32x32xbf16>
    %22 = vector.shape_cast %21 : vector<1x32x32xbf16> to vector<32x32xbf16>
    %cst_22 = arith.constant dense<0.000000e+00> : vector<32x100xf32>
    %23 = tpu.matmul %22, %20, %cst_22 {dimension_numbers = #tpu.dot_dimension_numbers<[1], [0], [0], [1], [0, 0, 1, 1], [], []>} : vector<32x32xbf16>, vector<32x100xbf16>, vector<32x100xf32> -> vector<32x100xf32>
    %24 = arith.addf %18, %23 : vector<32x100xf32>
    %c0_23 = arith.constant 0 : index
    %c0_24 = arith.constant 0 : index
    %c11 = arith.constant 11 : index
    %25 = vector.load %arg1[%c0_23, %c0_24, %c11] : memref<1x32x122xbf16, #tpu.memory_space<vmem>>, vector<1x32x100xbf16>
    %26 = vector.shape_cast %25 : vector<1x32x100xbf16> to vector<32x100xbf16>
    %c4 = arith.constant 4 : index
    %c0_25 = arith.constant 0 : index
    %c0_26 = arith.constant 0 : index
    %27 = vector.load %arg2[%c4, %c0_25, %c0_26] : memref<9x32x32xbf16, #tpu.memory_space<vmem>>, vector<1x32x32xbf16>
    %28 = vector.shape_cast %27 : vector<1x32x32xbf16> to vector<32x32xbf16>
    %cst_27 = arith.constant dense<0.000000e+00> : vector<32x100xf32>
    %29 = tpu.matmul %28, %26, %cst_27 {dimension_numbers = #tpu.dot_dimension_numbers<[1], [0], [0], [1], [0, 0, 1, 1], [], []>} : vector<32x32xbf16>, vector<32x100xbf16>, vector<32x100xf32> -> vector<32x100xf32>
    %30 = arith.addf %24, %29 : vector<32x100xf32>
    %c0_28 = arith.constant 0 : index
    %c0_29 = arith.constant 0 : index
    %c12 = arith.constant 12 : index
    %31 = vector.load %arg1[%c0_28, %c0_29, %c12] : memref<1x32x122xbf16, #tpu.memory_space<vmem>>, vector<1x32x100xbf16>
    %32 = vector.shape_cast %31 : vector<1x32x100xbf16> to vector<32x100xbf16>
    %c5 = arith.constant 5 : index
    %c0_30 = arith.constant 0 : index
    %c0_31 = arith.constant 0 : index
    %33 = vector.load %arg2[%c5, %c0_30, %c0_31] : memref<9x32x32xbf16, #tpu.memory_space<vmem>>, vector<1x32x32xbf16>
    %34 = vector.shape_cast %33 : vector<1x32x32xbf16> to vector<32x32xbf16>
    %cst_32 = arith.constant dense<0.000000e+00> : vector<32x100xf32>
    %35 = tpu.matmul %34, %32, %cst_32 {dimension_numbers = #tpu.dot_dimension_numbers<[1], [0], [0], [1], [0, 0, 1, 1], [], []>} : vector<32x32xbf16>, vector<32x100xbf16>, vector<32x100xf32> -> vector<32x100xf32>
    %36 = arith.addf %30, %35 : vector<32x100xf32>
    %c0_33 = arith.constant 0 : index
    %c0_34 = arith.constant 0 : index
    %c20 = arith.constant 20 : index
    %37 = vector.load %arg1[%c0_33, %c0_34, %c20] : memref<1x32x122xbf16, #tpu.memory_space<vmem>>, vector<1x32x100xbf16>
    %38 = vector.shape_cast %37 : vector<1x32x100xbf16> to vector<32x100xbf16>
    %c6 = arith.constant 6 : index
    %c0_35 = arith.constant 0 : index
    %c0_36 = arith.constant 0 : index
    %39 = vector.load %arg2[%c6, %c0_35, %c0_36] : memref<9x32x32xbf16, #tpu.memory_space<vmem>>, vector<1x32x32xbf16>
    %40 = vector.shape_cast %39 : vector<1x32x32xbf16> to vector<32x32xbf16>
    %cst_37 = arith.constant dense<0.000000e+00> : vector<32x100xf32>
    %41 = tpu.matmul %40, %38, %cst_37 {dimension_numbers = #tpu.dot_dimension_numbers<[1], [0], [0], [1], [0, 0, 1, 1], [], []>} : vector<32x32xbf16>, vector<32x100xbf16>, vector<32x100xf32> -> vector<32x100xf32>
    %42 = arith.addf %36, %41 : vector<32x100xf32>
    %c0_38 = arith.constant 0 : index
    %c0_39 = arith.constant 0 : index
    %c21 = arith.constant 21 : index
    %43 = vector.load %arg1[%c0_38, %c0_39, %c21] : memref<1x32x122xbf16, #tpu.memory_space<vmem>>, vector<1x32x100xbf16>
    %44 = vector.shape_cast %43 : vector<1x32x100xbf16> to vector<32x100xbf16>
    %c7 = arith.constant 7 : index
    %c0_40 = arith.constant 0 : index
    %c0_41 = arith.constant 0 : index
    %45 = vector.load %arg2[%c7, %c0_40, %c0_41] : memref<9x32x32xbf16, #tpu.memory_space<vmem>>, vector<1x32x32xbf16>
    %46 = vector.shape_cast %45 : vector<1x32x32xbf16> to vector<32x32xbf16>
    %cst_42 = arith.constant dense<0.000000e+00> : vector<32x100xf32>
    %47 = tpu.matmul %46, %44, %cst_42 {dimension_numbers = #tpu.dot_dimension_numbers<[1], [0], [0], [1], [0, 0, 1, 1], [], []>} : vector<32x32xbf16>, vector<32x100xbf16>, vector<32x100xf32> -> vector<32x100xf32>
    %48 = arith.addf %42, %47 : vector<32x100xf32>
    %c0_43 = arith.constant 0 : index
    %c0_44 = arith.constant 0 : index
    %c22 = arith.constant 22 : index
    %49 = vector.load %arg1[%c0_43, %c0_44, %c22] : memref<1x32x122xbf16, #tpu.memory_space<vmem>>, vector<1x32x100xbf16>
    %50 = vector.shape_cast %49 : vector<1x32x100xbf16> to vector<32x100xbf16>
    %c8 = arith.constant 8 : index
    %c0_45 = arith.constant 0 : index
    %c0_46 = arith.constant 0 : index
    %51 = vector.load %arg2[%c8, %c0_45, %c0_46] : memref<9x32x32xbf16, #tpu.memory_space<vmem>>, vector<1x32x32xbf16>
    %52 = vector.shape_cast %51 : vector<1x32x32xbf16> to vector<32x32xbf16>
    %cst_47 = arith.constant dense<0.000000e+00> : vector<32x100xf32>
    %53 = tpu.matmul %52, %50, %cst_47 {dimension_numbers = #tpu.dot_dimension_numbers<[1], [0], [0], [1], [0, 0, 1, 1], [], []>} : vector<32x32xbf16>, vector<32x100xbf16>, vector<32x100xf32> -> vector<32x100xf32>
    %54 = arith.addf %48, %53 : vector<32x100xf32>
    %c0_48 = arith.constant 0 : index
    %c0_49 = arith.constant 0 : index
    %55 = vector.load %arg3[%c0_48, %c0_49] : memref<32x1xf32, #tpu.memory_space<vmem>>, vector<32x1xf32>
    %56 = vector.broadcast %55 : vector<32x1xf32> to vector<32x100xf32>
    %57 = arith.addf %54, %56 : vector<32x100xf32>
    %c0_50 = arith.constant 0 : index
    %c0_51 = arith.constant 0 : index
    %c11_52 = arith.constant 11 : index
    %58 = vector.load %arg5[%c0_50, %c0_51, %c11_52] : memref<1x32x122xbf16, #tpu.memory_space<vmem>>, vector<1x32x100xbf16>
    %59 = vector.shape_cast %58 : vector<1x32x100xbf16> to vector<32x100xbf16>
    %60 = arith.extf %59 : vector<32x100xbf16> to vector<32x100xf32>
    %61 = arith.addf %57, %60 : vector<32x100xf32>
    %cst_53 = arith.constant 0.000000e+00 : f32
    %62 = vector.broadcast %cst_53 : f32 to vector<32x100xf32>
    %63 = arith.maximumf %61, %62 : vector<32x100xf32>
    %c0_54 = arith.constant 0 : index
    %c0_55 = arith.constant 0 : index
    %64 = vector.load %arg4[%c0_54, %c0_55] : memref<1x100xf32, #tpu.memory_space<vmem>>, vector<1x100xf32>
    %65 = vector.broadcast %64 : vector<1x100xf32> to vector<32x100xf32>
    %66 = arith.mulf %63, %65 : vector<32x100xf32>
    %cst_56 = arith.constant 0.000000e+00 : bf16
    %67 = vector.broadcast %cst_56 : bf16 to vector<32x11xbf16>
    %c0_57 = arith.constant 0 : index
    %c0_58 = arith.constant 0 : index
    %c0_59 = arith.constant 0 : index
    %68 = vector.load %arg6[%c0_57, %c0_58, %c0_59] : memref<1x32x122xbf16, #tpu.memory_space<vmem>>, vector<1x32x11xbf16>
    %69 = vector.shape_cast %68 : vector<1x32x11xbf16> to vector<32x11xbf16>
    %70 = vector.shape_cast %67 : vector<32x11xbf16> to vector<1x32x11xbf16>
    tpu.vector_store %arg6[%c0_57, %c0_58, %c0_59], %70 {strides = array<i32>} : memref<1x32x122xbf16, #tpu.memory_space<vmem>>, vector<1x32x11xbf16>,
    %71 = arith.truncf %66 : vector<32x100xf32> to vector<32x100xbf16>
    %c0_60 = arith.constant 0 : index
    %c0_61 = arith.constant 0 : index
    %c11_62 = arith.constant 11 : index
    %72 = vector.load %arg6[%c0_60, %c0_61, %c11_62] : memref<1x32x122xbf16, #tpu.memory_space<vmem>>, vector<1x32x100xbf16>
    %73 = vector.shape_cast %72 : vector<1x32x100xbf16> to vector<32x100xbf16>
    %74 = vector.shape_cast %71 : vector<32x100xbf16> to vector<1x32x100xbf16>
    tpu.vector_store %arg6[%c0_60, %c0_61, %c11_62], %74 {strides = array<i32>} : memref<1x32x122xbf16, #tpu.memory_space<vmem>>, vector<1x32x100xbf16>,
    %c0_63 = arith.constant 0 : index
    %c0_64 = arith.constant 0 : index
    %c111 = arith.constant 111 : index
    %75 = vector.load %arg6[%c0_63, %c0_64, %c111] : memref<1x32x122xbf16, #tpu.memory_space<vmem>>, vector<1x32x11xbf16>
    %76 = vector.shape_cast %75 : vector<1x32x11xbf16> to vector<32x11xbf16>
    %77 = vector.shape_cast %67 : vector<32x11xbf16> to vector<1x32x11xbf16>
    tpu.vector_store %arg6[%c0_63, %c0_64, %c111], %77 {strides = array<i32>} : memref<1x32x122xbf16, #tpu.memory_space<vmem>>, vector<1x32x11xbf16>,
    return
  }
  func.func @transform_0(%arg0: i32) -> (i32, i32, i32) {
    %c0_i32 = arith.constant 0 : i32
    %c0_i32_0 = arith.constant 0 : i32
    %c0_i32_1 = arith.constant 0 : i32
    return %arg0, %c0_i32, %c0_i32_0 : i32, i32, i32
  }
  func.func @transform_1(%arg0: i32) -> (i32, i32, i32) {
    %c0_i32 = arith.constant 0 : i32
    %c0_i32_0 = arith.constant 0 : i32
    %c0_i32_1 = arith.constant 0 : i32
    %c0_i32_2 = arith.constant 0 : i32
    return %c0_i32, %c0_i32_0, %c0_i32_1 : i32, i32, i32
  }
  func.func @transform_2(%arg0: i32) -> (i32, i32) {
    %c0_i32 = arith.constant 0 : i32
    %c0_i32_0 = arith.constant 0 : i32
    %c0_i32_1 = arith.constant 0 : i32
    return %c0_i32, %c0_i32_0 : i32, i32
  }
  func.func @transform_3(%arg0: i32) -> (i32, i32) {
    %c0_i32 = arith.constant 0 : i32
    %c0_i32_0 = arith.constant 0 : i32
    %c0_i32_1 = arith.constant 0 : i32
    return %c0_i32, %c0_i32_0 : i32, i32
  }
  func.func @transform_4(%arg0: i32) -> (i32, i32, i32) {
    %c0_i32 = arith.constant 0 : i32
    %c0_i32_0 = arith.constant 0 : i32
    %c0_i32_1 = arith.constant 0 : i32
    return %arg0, %c0_i32, %c0_i32_0 : i32, i32, i32
  }
  func.func @transform_5(%arg0: i32) -> (i32, i32, i32) {
    %c0_i32 = arith.constant 0 : i32
    %c0_i32_0 = arith.constant 0 : i32
    %c0_i32_1 = arith.constant 0 : i32
    return %arg0, %c0_i32, %c0_i32_0 : i32, i32, i32
  }
}

module attributes {stable_mosaic.version = 11 : i64} {
  func.func @_head_kernel(%arg0: memref<4x32x122xbf16, #tpu.memory_space<vmem>>, %arg1: memref<2x4xf32, #tpu.memory_space<vmem>>, %arg2: memref<32x16xf32, #tpu.memory_space<vmem>>, %arg3: memref<1x16xf32, #tpu.memory_space<vmem>>, %arg4: memref<16x2xf32, #tpu.memory_space<vmem>>, %arg5: memref<1x2xf32, #tpu.memory_space<vmem>>, %arg6: memref<2x2xf32, #tpu.memory_space<vmem>>) attributes {dimension_semantics = [], scalar_prefetch = 0 : i64, scratch_operands = 0 : i64, tpu.core_type = #tpu.core_type<tc>} {
    %c0 = arith.constant 0 : index
    %c0_0 = arith.constant 0 : index
    %c0_1 = arith.constant 0 : index
    %0 = vector.load %arg0[%c0, %c0_0, %c0_1] : memref<4x32x122xbf16, #tpu.memory_space<vmem>>, vector<4x32x122xbf16>
    %1 = arith.extf %0 : vector<4x32x122xbf16> to vector<4x32x122xf32>
    %cst = arith.constant dense<0.000000e+00> : vector<4x32xf32>
    %2 = vector.multi_reduction <add>, %1, %cst [2] : vector<4x32x122xf32> to vector<4x32xf32>
    %cst_2 = arith.constant 1.562500e-02 : f32
    %3 = vector.broadcast %cst_2 : f32 to vector<4x32xf32>
    %4 = arith.mulf %2, %3 : vector<4x32xf32>
    %c0_3 = arith.constant 0 : index
    %c0_4 = arith.constant 0 : index
    %5 = vector.load %arg1[%c0_3, %c0_4] : memref<2x4xf32, #tpu.memory_space<vmem>>, vector<2x4xf32>
    %cst_5 = arith.constant dense<0.000000e+00> : vector<2x32xf32>
    %6 = tpu.matmul %5, %4, %cst_5 {dimension_numbers = #tpu.dot_dimension_numbers<[1], [0], [0], [1], [0, 0, 1, 1], [], []>} : vector<2x4xf32>, vector<4x32xf32>, vector<2x32xf32> -> vector<2x32xf32>
    %c0_6 = arith.constant 0 : index
    %c0_7 = arith.constant 0 : index
    %7 = vector.load %arg2[%c0_6, %c0_7] : memref<32x16xf32, #tpu.memory_space<vmem>>, vector<32x16xf32>
    %cst_8 = arith.constant dense<0.000000e+00> : vector<2x16xf32>
    %8 = tpu.matmul %6, %7, %cst_8 {dimension_numbers = #tpu.dot_dimension_numbers<[1], [0], [0], [1], [0, 0, 1, 1], [], []>} : vector<2x32xf32>, vector<32x16xf32>, vector<2x16xf32> -> vector<2x16xf32>
    %c0_9 = arith.constant 0 : index
    %c0_10 = arith.constant 0 : index
    %9 = vector.load %arg3[%c0_9, %c0_10] : memref<1x16xf32, #tpu.memory_space<vmem>>, vector<1x16xf32>
    %10 = vector.broadcast %9 : vector<1x16xf32> to vector<2x16xf32>
    %11 = arith.addf %8, %10 : vector<2x16xf32>
    %c0_11 = arith.constant 0 : index
    %c0_12 = arith.constant 0 : index
    %12 = vector.load %arg4[%c0_11, %c0_12] : memref<16x2xf32, #tpu.memory_space<vmem>>, vector<16x2xf32>
    %cst_13 = arith.constant dense<0.000000e+00> : vector<2x2xf32>
    %13 = tpu.matmul %11, %12, %cst_13 {dimension_numbers = #tpu.dot_dimension_numbers<[1], [0], [0], [1], [0, 0, 1, 1], [], []>} : vector<2x16xf32>, vector<16x2xf32>, vector<2x2xf32> -> vector<2x2xf32>
    %c0_14 = arith.constant 0 : index
    %c0_15 = arith.constant 0 : index
    %14 = vector.load %arg5[%c0_14, %c0_15] : memref<1x2xf32, #tpu.memory_space<vmem>>, vector<1x2xf32>
    %15 = vector.broadcast %14 : vector<1x2xf32> to vector<2x2xf32>
    %16 = arith.addf %13, %15 : vector<2x2xf32>
    %cst_16 = arith.constant dense<0xFF800000> : vector<2xf32>
    %17 = vector.multi_reduction <maximumf>, %16, %cst_16 [1] : vector<2x2xf32> to vector<2xf32>
    %18 = vector.shape_cast %17 : vector<2xf32> to vector<2x1xf32>
    %19 = vector.broadcast %18 : vector<2x1xf32> to vector<2x2xf32>
    %20 = arith.subf %16, %19 : vector<2x2xf32>
    %21 = math.exp %20 : vector<2x2xf32>
    %cst_17 = arith.constant dense<0.000000e+00> : vector<2xf32>
    %22 = vector.multi_reduction <add>, %21, %cst_17 [1] : vector<2x2xf32> to vector<2xf32>
    %23 = vector.shape_cast %22 : vector<2xf32> to vector<2x1xf32>
    %24 = tpu.reciprocal %23 {approx = true} : vector<2x1xf32> -> vector<2x1xf32>
    %25 = vector.broadcast %24 : vector<2x1xf32> to vector<2x2xf32>
    %26 = arith.mulf %21, %25 : vector<2x2xf32>
    %c0_18 = arith.constant 0 : index
    %c0_19 = arith.constant 0 : index
    %27 = vector.load %arg6[%c0_18, %c0_19] : memref<2x2xf32, #tpu.memory_space<vmem>>, vector<2x2xf32>
    tpu.vector_store %arg6[%c0_18, %c0_19], %26 {strides = array<i32>} : memref<2x2xf32, #tpu.memory_space<vmem>>, vector<2x2xf32>,
    return
  }
}

</mosaic_0001>

<bundles_post_ra>
// kernel: resnet_forward_batched.8
= control target key start
LH: loop header
LB: loop body
LE: loop exit
PB: predicated region body
PF: predicated region fallthrough
CT: control target
= control target key end

     0   :  { %s1611_s15 = smov 0   ;;  %s1755_s0 = inlined_call_operand.vmem [shape: bf16[4,16,362], index: 0, kind: input, shape index: {}]   ;;  %s1756_s1 = inlined_call_operand.vmem [shape: bf16[9,16,16], index: 1, kind: input, shape index: {}]   ;;  %s1757_s2 = inlined_call_operand.vmem [shape: f32[16,1], index: 2, kind: input, shape index: {}]   ;;  %s1758_s3 = inlined_call_operand.vmem [shape: f32[1,324], index: 3, kind: input, shape index: {}]   ;;  %s1759_s4 = inlined_call_operand.vmem [shape: bf16[4,16,362], index: 4, kind: output, shape index: {}]  }
   0x1 LB: > { %s1363_s16 = sadd.s32 4294967295, %s1572_s15   ;;  %p1367_p0 = scmp.ge.s32.totalorder %s1572_s15, 1  ;;  %s1572_s15 = sphi %s1611_s15, %s14_s15  }
   0x2   : > { %p162_p1 = scmp.lt.s32.totalorder %s1572_s15, 5 }
   0x4   : > { %p163_p2 = pnand %p1367_p0, %p162_p1 }
   0x5   : > { %p188_p3 = scmp.lt.s32.totalorder (!%p163_p2), %s1363_s16, 3  ;;  %v1574_v0 = vmov (!%p163_p2), 0.0   ;;  %vm1575_vm0 = vmmov (!%p163_p2), 0   ;;  %v1576_v1 = vmov (!%p163_p2), 0   ;;  %s1577_s21 = smov (!%p163_p2), 127   ;;  %v1212_v5 = vld [vmem:[%s1757_s2] sm:$0xff] (!%p163_p2) }
   0x6   : > { %166 = sbr.rel (%p163_p2) target bundleno = 584 (0x248), region = 36  ;;  %1444 = vmatprep.subr.bf16.mxu1 (!%p163_p2), %v1574_v0  ;;  %1446 = vmatprep.mubr.msk.bf16.mxu1 (!%p163_p2), %vm1575_vm0, %v1574_v0  ;;  %s1578_s22 = smov (!%p163_p2), 126   ;;  %v1213_v6 = vld [vmem:[%s1757_s2 + $0x8] sm:$0xff] (!%p163_p2)  ;;  %vm232_vm1 = vcmask (!%p163_p2), 1039360   ;;  %vm238_vm2 = vcmask (!%p163_p2), 130048   ;;  %vm435_vm3 = vcmask (!%p163_p2), 1031168  }
   0x7   : > { %274 = vmatprep.mubr.bf16.mxu0 (!%p163_p2), %v1576_v1  ;;  %1551 = vset.pattern.permute.xlu0 (!%p163_p2), %v1576_v1  ;;  %s1579_s23 = smov (!%p163_p2), 110   ;;  %s1580_s24 = smov (!%p163_p2), 109   ;;  %v1557_v10 = vld [vmem:[%s1756_s1 + $0x8] sm:$0xff] (!%p163_p2)   ;;  %v1558_v16 = vld [vmem:[%s1756_s1] sm:$0xff] (!%p163_p2)   ;;  %vm548_vm4 = vcmask (!%p163_p2), 900096   ;;  %v1559_v20 = vld [vmem:[%s1756_s1 + $0x10] sm:$0xff] (!%p163_p2)  }
   0x8   : > { %1552 = vset.pattern.permute.xlu1 (!%p163_p2), %v1576_v1  ;;  %s1581_s25 = smov (!%p163_p2), 108   ;;  %s1582_s26 = smov (!%p163_p2), 92   ;;  %v1560_v25 = vld [vmem:[%s1756_s1 + $0x18] sm:$0xff] (!%p163_p2)   ;;  %vm661_vm5 = vcmask (!%p163_p2), 891904   ;;  %v1561_v31 = vld [vmem:[%s1756_s1 + $0x20] sm:$0xff] (!%p163_p2)   ;;  %vm774_vm6 = vcmask (!%p163_p2), 883712  }
   0x9   : > { %s1583_s27 = smov (!%p163_p2), 91   ;;  %s1584_s28 = smov (!%p163_p2), 90   ;;  %v1562_v36 = vld [vmem:[%s1756_s1 + $0x28] sm:$0xff] (!%p163_p2)   ;;  %v1563_v41 = vld [vmem:[%s1756_s1 + $0x30] sm:$0xff] (!%p163_p2)   ;;  %vm887_vm7 = vcmask (!%p163_p2), 752640   ;;  %v1564_v46 = vld [vmem:[%s1756_s1 + $0x38] sm:$0xff] (!%p163_p2)  }
   0xa   : > { %vm1000_vm8 = vcmask (!%p163_p2), 744448   ;;  %v1565_v49 = vld [vmem:[%s1756_s1 + $0x40] sm:$0xff] (!%p163_p2)   ;;  %vm1113_vm9 = vcmask (!%p163_p2), 736256   ;;  %vm1259_vm10 = vcmask (!%p163_p2), 150528   ;;  %s1585_s5 = smov (!%p163_p2), 19   ;;  %vm1297_vm11 = vcmask (!%p163_p2), 1043608  }
   0xb   : > { %vm1298_vm12 = vcmask (!%p163_p2), 1047556   ;;  %vm1288_vm13 = vcmask (!%p163_p2), 154624   ;;  %vm1301_vm15 = vcmask (!%p163_p2), 707584  }
   0xc   : > { %vm1299_vm14 = vmor (!%p163_p2), %vm1298_vm12, %vm1297_vm11 }
   0xd   : > { %s1761_s16 = smov (!%p188_p3, %s1363_s16), 3 }
   0xe   : > { %s1530_s17 = smul.u32 24, %s1761_s16 }
  0x10   : > { %s192_s20 = scalar_lea.vmem %s1755_s0, %s1530_s17  ;;  %s1731_s30 = scalar_lea.vmem %s1759_s4, %s1530_s17 }
  0x11   : > { %v1553_v2 = vld [vmem:[%s192_s20 + $0x4] ss:$12 sps:$4 sm:$0xff]   ;;  %v1555_v3 = vld [vmem:[%s192_s20] ss:$12 sps:$4 sm:$0xff]   ;;  %v1556_v4 = vld [vmem:[%s192_s20 + $0x8] ss:$12 sps:$4 sm:$0xff]  }
  0x12   : > { %228 = vrot.lane.b32.xlu0 %v1553_v2, %s1577_s21  ;;  %226 = vrot.lane.b32.xlu1 %v1555_v3, %s1577_s21  ;;  %1260 = vst.msk [vmem:[%s1731_s30] sm:$0xf] %vm1259_vm10, %v1576_v1  ;;  %1261 = vst.msk [vmem:[%s1731_s30 + $0xc] sm:$0xf] %vm1259_vm10, %v1576_v1 }
  0x16   : > { %230 = vrot.lane.b32.xlu0 %v1556_v4, %s1577_s21  ;;  %431 = vrot.lane.b32.xlu1 %v1553_v2, %s1578_s22 }
  0x1a   : > { %433 = vrot.lane.b32.xlu0 %v1556_v4, %s1578_s22  ;;  %429 = vrot.lane.b32.xlu1 %v1555_v3, %s1578_s22 }
  0x1e   : > { %544 = vrot.lane.b32.xlu0 %v1553_v2, %s1579_s23  ;;  %546 = vrot.lane.b32.xlu1 %v1556_v4, %s1579_s23 }
  0x22   : > { %542 = vrot.lane.b32.xlu0 %v1555_v3, %s1579_s23  ;;  %657 = vrot.lane.b32.xlu1 %v1553_v2, %s1580_s24 }
  0x26   : > { %659 = vrot.lane.b32.xlu0 %v1556_v4, %s1580_s24  ;;  %655 = vrot.lane.b32.xlu1 %v1555_v3, %s1580_s24 }
  0x2a   : > { %770 = vrot.lane.b32.xlu0 %v1553_v2, %s1581_s25  ;;  %772 = vrot.lane.b32.xlu1 %v1556_v4, %s1581_s25 }
  0x2e   : > { %768 = vrot.lane.b32.xlu0 %v1555_v3, %s1581_s25  ;;  %883 = vrot.lane.b32.xlu1 %v1553_v2, %s1582_s26 }
  0x32   : > { %885 = vrot.lane.b32.xlu0 %v1556_v4, %s1582_s26  ;;  %881 = vrot.lane.b32.xlu1 %v1555_v3, %s1582_s26 }
  0x36   : > { %996 = vrot.lane.b32.xlu0 %v1553_v2, %s1583_s27  ;;  %998 = vrot.lane.b32.xlu1 %v1556_v4, %s1583_s27 }
  0x3a   : > { %994 = vrot.lane.b32.xlu0 %v1555_v3, %s1583_s27  ;;  %1109 = vrot.lane.b32.xlu1 %v1553_v2, %s1584_s28 }
  0x3e   : > { %1111 = vrot.lane.b32.xlu0 %v1556_v4, %s1584_s28  ;;  %1107 = vrot.lane.b32.xlu1 %v1555_v3, %s1584_s28 }
  0x42   : > { %1216 = vperm.xlu0 %1551, %v1212_v5   ;;  %1221 = vperm.xlu1 %1552, %v1213_v6  }
  0x84   : > { %v229_v7 = vpop.permute.xlu0 %228  ;;  %v227_v8 = vpop.permute.xlu1 %226 }
  0x85   : > { %v233_v12 = vsel %vm232_vm1, %v227_v8, %v229_v7 }
  0x88   : > { %v231_v9 = vpop.permute.xlu0 %230  ;;  %v432_v13 = vpop.permute.xlu1 %431 }
  0x89   : > { %1445 = vmatpush3.bf16.msra.mxu1 %v231_v9  ;;  %v234_v11 = vsel %vm232_vm1, %v229_v7, %v231_v9 }
  0x8a   : > { %242 = vmatprep.subr.bf16.mxu0 %v234_v11  ;;  %1450 = vmatprep.subr.bf16.mxu1 %v1574_v0 }
  0x8b   : > { %243 = vmatpush1.bf16.msra.mxu0 %v233_v12 }
  0x8c   : > { %1447 = vmatmul.mubr.msk.bf16.vlgmr.msra.gmra.mrb[0].mxu1 %vm238_vm2, %v1557_v10  ;;  %337 = vmatprep.subr.bf16.mxu0 %v1553_v2  ;;  %v434_v14 = vpop.permute.xlu0 %433  ;;  %v430_v17 = vpop.permute.xlu1 %429 }
  0x8d   : > { %1451 = vmatpush3.bf16.msra.mxu1 %v1556_v4  ;;  %1452 = vmatprep.mubr.msk.bf16.mxu1 %vm1575_vm0, %v1574_v0  ;;  %v437_v15 = vsel %vm435_vm3, %v432_v13, %v434_v14  ;;  %v436_v19 = vsel %vm435_vm3, %v430_v17, %v432_v13 }
  0x8e   : > { %1376 = vmatmul.mubr.msk.bf16.vlgmr.msra.gmra.mrb[0].mxu0 %vm238_vm2, %v1557_v10  ;;  %1456 = vmatprep.subr.bf16.mxu1 %v1574_v0 }
  0x8f   : > { %338 = vmatpush1.bf16.msra.mxu0 %v1555_v3  ;;  %369 = vmatprep.mubr.bf16.mxu0 %v1576_v1 }
  0x90   : > { %444 = vmatprep.subr.bf16.mxu0 %v437_v15  ;;  %v545_v18 = vpop.permute.xlu0 %544  ;;  %v547_v21 = vpop.permute.xlu1 %546 }
  0x91   : > { %v550_v22 = vsel %vm548_vm4, %v545_v18, %v547_v21 }
  0x94   : > { %1453 = vmatmul.mubr.msk.bf16.vlgmr.msra.gmra.mrb[4].mxu1 %vm238_vm2, %v1558_v16  ;;  %v543_v23 = vpop.permute.xlu0 %542  ;;  %v658_v24 = vpop.permute.xlu1 %657 }
  0x95   : > { %1457 = vmatpush3.bf16.msra.mxu1 %v434_v14  ;;  %1458 = vmatprep.mubr.msk.bf16.mxu1 %vm1575_vm0, %v1574_v0  ;;  %v549_v27 = vsel %vm548_vm4, %v543_v23, %v545_v18 }
  0x96   : > { %1462 = vmatprep.subr.bf16.mxu1 %v1574_v0 }
  0x98   : > { %v660_v26 = vpop.permute.xlu0 %659  ;;  %v656_v28 = vpop.permute.xlu1 %655 }
  0x99   : > { %v663_v29 = vsel %vm661_vm5, %v658_v24, %v660_v26  ;;  %v662_v35 = vsel %vm661_vm5, %v656_v28, %v658_v24 }
  0x9a   : > { %1379 = vmatmul.mubr.msk.bf16.vlgmr.msra.gmra.mrb[0].mxu0 %vm238_vm2, %v1558_v16 }
  0x9b   : > { %445 = vmatpush1.bf16.msra.mxu0 %v436_v19  ;;  %476 = vmatprep.mubr.bf16.mxu0 %v1576_v1 }
  0x9c   : > { %1459 = vmatmul.mubr.msk.bf16.vlgmr.msra.gmra.mrb[8].mxu1 %vm238_vm2, %v1559_v20  ;;  %557 = vmatprep.subr.bf16.mxu0 %v550_v22  ;;  %v771_v30 = vpop.permute.xlu0 %770  ;;  %v773_v32 = vpop.permute.xlu1 %772 }
  0x9d   : > { %1463 = vmatpush3.bf16.msra.mxu1 %v547_v21  ;;  %1464 = vmatprep.mubr.msk.bf16.mxu1 %vm1575_vm0, %v1574_v0  ;;  %v776_v37 = vsel %vm774_vm6, %v771_v30, %v773_v32 }
  0x9e   : > { %1468 = vmatprep.subr.bf16.mxu1 %v1574_v0 }
  0xa0   : > { %v769_v33 = vpop.permute.xlu0 %768  ;;  %v884_v34 = vpop.permute.xlu1 %883 }
  0xa1   : > { %v775_v43 = vsel %vm774_vm6, %v769_v33, %v771_v30 }
  0xa4   : > { %1465 = vmatmul.mubr.msk.bf16.vlgmr.msra.gmra.mrb[12].mxu1 %vm238_vm2, %v1560_v25  ;;  %v886_v38 = vpop.permute.xlu0 %885  ;;  %v882_v39 = vpop.permute.xlu1 %881 }
  0xa5   : > { %1469 = vmatpush3.bf16.msra.mxu1 %v660_v26  ;;  %1470 = vmatprep.mubr.msk.bf16.mxu1 %vm1575_vm0, %v1574_v0  ;;  %v889_v45 = vsel %vm887_vm7, %v884_v34, %v886_v38  ;;  %v888_v48 = vsel %vm887_vm7, %v882_v39, %v884_v34 }
  0xa6   : > { %1384 = vmatmul.mubr.msk.bf16.vlgmr.msra.gmra.mrb[0].mxu0 %vm238_vm2, %v1559_v20  ;;  %1474 = vmatprep.subr.bf16.mxu1 %v1574_v0 }
  0xa7   : > { %558 = vmatpush1.bf16.msra.mxu0 %v549_v27  ;;  %589 = vmatprep.mubr.bf16.mxu0 %v1576_v1 }
  0xa8   : > { %670 = vmatprep.subr.bf16.mxu0 %v663_v29  ;;  %v997_v40 = vpop.permute.xlu0 %996  ;;  %v999_v42 = vpop.permute.xlu1 %998 }
  0xa9   : > { %v1002_v50 = vsel %vm1000_vm8, %v997_v40, %v999_v42 }
  0xac   : > { %1471 = vmatmul.mubr.msk.bf16.vlgmr.msra.gmra.mrb[16].mxu1 %vm238_vm2, %v1561_v31  ;;  %v995_v44 = vpop.permute.xlu0 %994  ;;  %v1110_v52 = vpop.permute.xlu1 %1109 }
  0xad   : > { %1475 = vmatpush3.bf16.msra.mxu1 %v773_v32  ;;  %1476 = vmatprep.mubr.msk.bf16.mxu1 %vm1575_vm0, %v1574_v0  ;;  %v1001_v51 = vsel %vm1000_vm8, %v995_v44, %v997_v40 }
  0xae   : > { %1480 = vmatprep.subr.bf16.mxu1 %v1574_v0 }
  0xb0   : > { %v1112_v47 = vpop.permute.xlu0 %1111  ;;  %v1108_v54 = vpop.permute.xlu1 %1107 }
  0xb1   : > { %v1115_v53 = vsel %vm1113_vm9, %v1110_v52, %v1112_v47  ;;  %v1114_v55 = vsel %vm1113_vm9, %v1108_v54, %v1110_v52 }
  0xb2   : > { %1389 = vmatmul.mubr.msk.bf16.vlgmr.msra.gmra.mrb[0].mxu0 %vm238_vm2, %v1560_v25 }
  0xb3   : > { %671 = vmatpush1.bf16.msra.mxu0 %v662_v35  ;;  %702 = vmatprep.mubr.bf16.mxu0 %v1576_v1 }
  0xb4   : > { %1477 = vmatmul.mubr.msk.bf16.vlgmr.msra.gmra.mrb[20].mxu1 %vm238_vm2, %v1562_v36  ;;  %783 = vmatprep.subr.bf16.mxu0 %v776_v37 }
  0xb5   : > { %1481 = vmatpush3.bf16.msra.mxu1 %v886_v38  ;;  %1482 = vmatprep.mubr.msk.bf16.mxu1 %vm1575_vm0, %v1574_v0 }
  0xb6   : > { %1486 = vmatprep.subr.bf16.mxu1 %v1574_v0 }
  0xbc   : > { %1483 = vmatmul.mubr.msk.bf16.vlgmr.msra.gmra.mrb[24].mxu1 %vm238_vm2, %v1563_v41 }
  0xbd   : > { %1487 = vmatpush3.bf16.msra.mxu1 %v999_v42  ;;  %1488 = vmatprep.mubr.msk.bf16.mxu1 %vm1575_vm0, %v1574_v0 }
  0xbe   : > { %1394 = vmatmul.mubr.msk.bf16.vlgmr.msra.gmra.mrb[0].mxu0 %vm238_vm2, %v1561_v31  ;;  %1492 = vmatprep.subr.bf16.mxu1 %v1574_v0 }
  0xbf   : > { %784 = vmatpush1.bf16.msra.mxu0 %v775_v43  ;;  %815 = vmatprep.mubr.bf16.mxu0 %v1576_v1 }
  0xc0   : > { %896 = vmatprep.subr.bf16.mxu0 %v889_v45  ;;  %v1238_v45 = vlaneseq }
  0xc4   : > { %1489 = vmatmul.mubr.msk.bf16.vlgmr.msra.gmra.mrb[28].mxu1 %vm238_vm2, %v1564_v46 }
  0xc5   : > { %1493 = vmatpush3.bf16.msra.mxu1 %v1112_v47  ;;  %1494 = vmatprep.mubr.msk.bf16.mxu1 %vm1575_vm0, %v1574_v0  ;;  %v1217_v47 = vpop.permute.xlu0 %1216  ;;  %vm1305_vm0 = vcmask 863928  }
  0xca   : > { %1399 = vmatmul.mubr.msk.bf16.vlgmr.msra.gmra.mrb[0].mxu0 %vm238_vm2, %v1562_v36 }
  0xcb   : > { %897 = vmatpush1.bf16.msra.mxu0 %v888_v48  ;;  %928 = vmatprep.mubr.bf16.mxu0 %v1576_v1 }
  0xcc   : > { %1495 = vmatmul.mubr.msk.bf16.vlgmr.msra.gmra.mrb[32].mxu1 %vm238_vm2, %v1565_v49  ;;  %1009 = vmatprep.subr.bf16.mxu0 %v1002_v50  ;;  %v1222_v50 = vpop.permute.xlu1 %1221 }
  0xd6   : > { %1404 = vmatmul.mubr.msk.bf16.vlgmr.msra.gmra.mrb[0].mxu0 %vm238_vm2, %v1563_v41 }
  0xd7   : > { %1010 = vmatpush1.bf16.msra.mxu0 %v1001_v51  ;;  %1041 = vmatprep.mubr.bf16.mxu0 %v1576_v1 }
  0xd8   : > { %1122 = vmatprep.subr.bf16.mxu0 %v1115_v53  ;;  %v1236_v53 = vld [vmem:[%s1758_s3] sm:$0x7] }
  0xe2   : > { %1409 = vmatmul.mubr.msk.bf16.vlgmr.msra.gmra.mrb[0].mxu0 %vm238_vm2, %v1564_v46  ;;  %v1239_v46 = vshrl.u32 %v1238_v45, 7 }
  0xe3   : > { %1123 = vmatpush1.bf16.msra.mxu0 %v1114_v55  ;;  %1154 = vmatprep.mubr.bf16.mxu0 %v1576_v1 }
  0xe4   : > { %v1240_v48 = vsub.s32 0, %v1239_v46  ;;  %v1248_v54 = vsub.s32 2, %v1239_v46 }
  0xee   : > { %1414 = vmatmul.mubr.msk.bf16.vlgmr.msra.gmra.mrb[0].mxu0 %vm238_vm2, %v1565_v49  ;;  %v1244_v49 = vsub.s32 1, %v1239_v46 }
 0x15f   : > { %v319_v56 = vpop.f32.mrb[0].mxu1 }
 0x160   : > { %v1448_v57 = vpop.f32.mrb[1].mxu1 }
 0x161   : > { %v322_v58 = vpop.f32.mrb[2].mxu1 }
 0x162   : > { %v1449_v59 = vpop.f32.mrb[3].mxu1 }
 0x167   : > { %v414_v60 = vpop.f32.mrb[4].mxu1 }
 0x168   : > { %v415_v61 = vadd.f32 %v414_v60, %v319_v56  ;;  %v1454_v62 = vpop.f32.mrb[5].mxu1  ;;  %v1241_v56 = vrot.slane %v1236_v53, %v1240_v48  ;;  %v1245_v60 = vrot.slane %v1236_v53, %v1244_v49 }
 0x169   : > { %v417_v63 = vpop.f32.mrb[6].mxu1 }
 0x16a   : > { %v418_v0 = vadd.f32 %v417_v63, %v322_v58  ;;  %v1455_v2 = vpop.f32.mrb[7].mxu1 }
 0x16f   : > { %v521_v3 = vpop.f32.mrb[8].mxu1 }
 0x170   : > { %v530_v4 = vadd.f32 %v521_v3, %v415_v61  ;;  %v1460_v5 = vpop.f32.mrb[9].mxu1 }
 0x171   : > { %v524_v6 = vpop.f32.mrb[10].mxu1  ;;  %v1249_v5 = vrot.slane %v1236_v53, %v1248_v54 }
 0x172   : > { %v533_v7 = vadd.f32 %v524_v6, %v418_v0  ;;  %v1461_v8 = vpop.f32.mrb[11].mxu1 }
 0x177   : > { %v634_v9 = vpop.f32.mrb[12].mxu1 }
 0x178   : > { %v643_v10 = vadd.f32 %v634_v9, %v530_v4  ;;  %v1466_v11 = vpop.f32.mrb[13].mxu1 }
 0x179   : > { %v637_v12 = vpop.f32.mrb[14].mxu1 }
 0x17a   : > { %v646_v13 = vadd.f32 %v637_v12, %v533_v7  ;;  %v1467_v14 = vpop.f32.mrb[15].mxu1 }
 0x17f   : > { %v747_v15 = vpop.f32.mrb[16].mxu1 }
 0x180   : > { %v756_v16 = vadd.f32 %v747_v15, %v643_v10  ;;  %v1472_v17 = vpop.f32.mrb[17].mxu1 }
 0x181   : > { %v750_v18 = vpop.f32.mrb[18].mxu1 }
 0x182   : > { %v759_v19 = vadd.f32 %v750_v18, %v646_v13  ;;  %v1473_v20 = vpop.f32.mrb[19].mxu1 }
 0x187   : > { %v860_v21 = vpop.f32.mrb[20].mxu1 }
 0x188   : > { %v869_v22 = vadd.f32 %v860_v21, %v756_v16  ;;  %v1478_v23 = vpop.f32.mrb[21].mxu1 }
 0x189   : > { %v863_v24 = vpop.f32.mrb[22].mxu1 }
 0x18a   : > { %v872_v25 = vadd.f32 %v863_v24, %v759_v19  ;;  %v1479_v26 = vpop.f32.mrb[23].mxu1 }
 0x18f   : > { %v973_v27 = vpop.f32.mrb[24].mxu1 }
 0x190   : > { %v982_v28 = vadd.f32 %v973_v27, %v869_v22  ;;  %v1484_v29 = vpop.f32.mrb[25].mxu1 }
 0x191   : > { %v976_v30 = vpop.f32.mrb[26].mxu1 }
 0x192   : > { %v985_v31 = vadd.f32 %v976_v30, %v872_v25  ;;  %v1485_v32 = vpop.f32.mrb[27].mxu1 }
 0x197   : > { %v1086_v33 = vpop.f32.mrb[28].mxu1 }
 0x198   : > { %v1095_v34 = vadd.f32 %v1086_v33, %v982_v28  ;;  %v1490_v35 = vpop.f32.mrb[29].mxu1 }
 0x199   : > { %v1089_v36 = vpop.f32.mrb[30].mxu1 }
 0x19a   : > { %v1098_v37 = vadd.f32 %v1089_v36, %v985_v31  ;;  %v1491_v38 = vpop.f32.mrb[31].mxu1 }
 0x19f   : > { %v1199_v39 = vpop.f32.mrb[32].mxu1 }
 0x1a0   : > { %v1208_v40 = vadd.f32 %v1199_v39, %v1095_v34  ;;  %v1496_v41 = vpop.f32.mrb[33].mxu1 }
 0x1a1   : > { %v1202_v42 = vpop.f32.mrb[34].mxu1 }
 0x1a2   : > { %v1211_v43 = vadd.f32 %v1202_v42, %v1098_v37  ;;  %v1497_v44 = vpop.f32.mrb[35].mxu1  ;;  %v1226_v51 = vadd.f32 %v1217_v47, %v1208_v40 }
 0x1a4   : > { %v1229_v58 = vadd.f32 %v1222_v50, %v1211_v43  ;;  %v1232_v2 = vmax.f32 %v1226_v51, 0.0 }
 0x1a6   : > { %v1235_v8 = vmax.f32 %v1229_v58, 0.0  ;;  %v1255_v14 = vmul.f32 %v1249_v5, %v1232_v2 }
 0x1a8   : > { %v1258_v16 = vmul.f32 %v1249_v5, %v1235_v8  ;;  %v1423_v17 = vpack.c.bf16 %v1255_v14, %v1255_v14 }
 0x1aa   : > { %v1425_v18 = vpack.c.bf16 %v1258_v16, %v1258_v16 }
 0x1c1   : > { %v1156_v52 = vpop.f32.mrb[0].mxu0 }
 0x1c2   : > { %v1224_v55 = vadd.f32 %v1217_v47, %v1156_v52  ;;  %v1158_v57 = vpop.f32.mrb[1].mxu0 }
 0x1c3   : > { %v1225_v59 = vadd.f32 %v1217_v47, %v1158_v57  ;;  %v1160_v61 = vpop.f32.mrb[2].mxu0 }
 0x1c4   : > { %v1230_v62 = vmax.f32 %v1224_v55, 0.0  ;;  %v1227_v63 = vadd.f32 %v1222_v50, %v1160_v61  ;;  %v1162_v0 = vpop.f32.mrb[3].mxu0 }
 0x1c5   : > { %v1231_v3 = vmax.f32 %v1225_v59, 0.0  ;;  %v1228_v4 = vadd.f32 %v1222_v50, %v1162_v0 }
 0x1c6   : > { %v1253_v6 = vmul.f32 %v1241_v56, %v1230_v62  ;;  %v1233_v7 = vmax.f32 %v1227_v63, 0.0 }
 0x1c7   : > { %v1254_v9 = vmul.f32 %v1245_v60, %v1231_v3  ;;  %v1234_v10 = vmax.f32 %v1228_v4, 0.0 }
 0x1c8   : > { %v1256_v11 = vmul.f32 %v1241_v56, %v1233_v7 }
 0x1c9   : > { %v1257_v12 = vmul.f32 %v1245_v60, %v1234_v10  ;;  %v1422_v13 = vpack.c.bf16 %v1254_v9, %v1253_v6 }
 0x1cb   : > { %1278 = vrot.lane.b32.xlu1 %v1422_v13, %s1585_s5  ;;  %v1424_v15 = vpack.c.bf16 %v1257_v12, %v1256_v11 }
 0x1cd   : > { %1282 = vrot.lane.b32.xlu0 %v1424_v15, %s1585_s5 }
 0x1cf   : > { %1280 = vrot.lane.b32.xlu1 %v1423_v17, %s1585_s5 }
 0x1d1   : > { %1284 = vrot.lane.b32.xlu0 %v1425_v18, %s1585_s5 }
 0x23d   : > { %v1279_v19 = vpop.permute.xlu1 %1278 }
 0x23e   : > { %v1286_v20 = vrot.slane %v1279_v19, 4 }
 0x23f   : > { %v1283_v21 = vpop.permute.xlu0 %1282 }
 0x240   : > { %v1289_v22 = vsel %vm1288_vm13, %v1286_v20, %v1279_v19  ;;  %v1287_v23 = vrot.slane %v1283_v21, 4 }
 0x241   : > { %1300 = vst.msk [vmem:[%s1731_s30] sm:$0xff] %vm1299_vm14, %v1289_v22  ;;  %v1281_v24 = vpop.permute.xlu1 %1280 }
 0x242   : > { %v1291_v25 = vsel %vm1288_vm13, %v1287_v23, %v1283_v21  ;;  %v1290_v26 = vsel %vm1288_vm13, %v1286_v20, %v1281_v24 }
 0x243   : > { %1303 = vst.msk [vmem:[%s1731_s30 + $0xc] sm:$0xff] %vm1299_vm14, %v1291_v25  ;;  %v1285_v27 = vpop.permute.xlu0 %1284 }
 0x244   : > { %1302 = vst.msk [vmem:[%s1731_s30 + $0x8] sm:$0xf] %vm1301_vm15, %v1290_v26  ;;  %v1292_v28 = vsel %vm1288_vm13, %v1287_v23, %v1285_v27 }
 0x245   : > { %1306 = vst.msk [vmem:[%s1731_s30 + $0x8] sm:$0xf] %vm1305_vm0, %v1576_v1 }
 0x246   : > { %1304 = vst.msk [vmem:[%s1731_s30 + $0x14] sm:$0xf] %vm1301_vm15, %v1292_v28 }
 0x247   : > { %1307 = vst.msk [vmem:[%s1731_s30 + $0x14] sm:$0xf] %vm1305_vm0, %v1576_v1 }
 0x248 PF: > { %s14_s15 = sadd.s32 1, %s1572_s15  }
 0x249   : > { %p11_p4 = scmp.ge.s32.totalorder %s14_s15, 6  }
 0x24b   :  { %13 = sbr.rel (!%p11_p4) target bundleno = 1 (0x1), region = 74 }

// kernel: resnet_forward_batched.9
= control target key start
LH: loop header
LB: loop body
LE: loop exit
PB: predicated region body
PF: predicated region fallthrough
CT: control target
= control target key end

     0   :  { %s1736_s18 = smov 0   ;;  %s1924_s0 = inlined_call_operand.vmem [shape: bf16[4,16,362], index: 0, kind: input, shape index: {}]   ;;  %s1925_s1 = inlined_call_operand.vmem [shape: bf16[9,16,16], index: 1, kind: input, shape index: {}]   ;;  %s1926_s2 = inlined_call_operand.vmem [shape: f32[16,1], index: 2, kind: input, shape index: {}]   ;;  %s1927_s3 = inlined_call_operand.vmem [shape: f32[1,324], index: 3, kind: input, shape index: {}]   ;;  %s1928_s4 = inlined_call_operand.vmem [shape: bf16[4,16,362], index: 4, kind: input, shape index: {}]   ;;  %s1929_s5 = inlined_call_operand.vmem [shape: bf16[4,16,362], index: 5, kind: output, shape index: {}]  }
   0x1 LB: > { %s1467_s19 = sadd.s32 4294967295, %s1692_s18   ;;  %p1471_p0 = scmp.ge.s32.totalorder %s1692_s18, 1  ;;  %s1692_s18 = sphi %s1736_s18, %s15_s18  }
   0x2   : > { %p197_p1 = scmp.lt.s32.totalorder %s1692_s18, 5 }
   0x4   : > { %p198_p2 = pnand %p1471_p0, %p197_p1 }
   0x5   : > { %p230_p3 = scmp.lt.s32.totalorder (!%p198_p2), %s1467_s19, 3  ;;  %v1694_v0 = vmov (!%p198_p2), 0.0   ;;  %vm1695_vm0 = vmmov (!%p198_p2), 0   ;;  %v1696_v1 = vmov (!%p198_p2), 0   ;;  %s1697_s24 = smov (!%p198_p2), 127   ;;  %v1260_v5 = vld [vmem:[%s1926_s2 + $0x8] sm:$0xff] (!%p198_p2) }
   0x6   : > { %201 = sbr.rel (%p198_p2) target bundleno = 586 (0x24a), region = 40  ;;  %1549 = vmatprep.subr.bf16.mxu1 (!%p198_p2), %v1694_v0  ;;  %1551 = vmatprep.mubr.msk.bf16.mxu1 (!%p198_p2), %vm1695_vm0, %v1694_v0  ;;  %s1698_s25 = smov (!%p198_p2), 126   ;;  %v1259_v6 = vld [vmem:[%s1926_s2] sm:$0xff] (!%p198_p2)  ;;  %vm279_vm1 = vcmask (!%p198_p2), 1039360   ;;  %v1677_v22 = vld [vmem:[%s1925_s1 + $0x8] sm:$0xff] (!%p198_p2)   ;;  %vm285_vm2 = vcmask (!%p198_p2), 130048  }
   0x7   : > { %321 = vmatprep.mubr.bf16.mxu0 (!%p198_p2), %v1696_v1  ;;  %1657 = vset.pattern.permute.xlu1 (!%p198_p2), %v1696_v1  ;;  %s1699_s26 = smov (!%p198_p2), 110   ;;  %s1700_s27 = smov (!%p198_p2), 109   ;;  %vm482_vm3 = vcmask (!%p198_p2), 1031168   ;;  %v1678_v28 = vld [vmem:[%s1925_s1] sm:$0xff] (!%p198_p2)   ;;  %vm595_vm4 = vcmask (!%p198_p2), 900096   ;;  %v1679_v32 = vld [vmem:[%s1925_s1 + $0x10] sm:$0xff] (!%p198_p2)  }
   0x8   : > { %1656 = vset.pattern.permute.xlu0 (!%p198_p2), %v1696_v1  ;;  %s1701_s28 = smov (!%p198_p2), 108   ;;  %s1702_s29 = smov (!%p198_p2), 92   ;;  %v1680_v37 = vld [vmem:[%s1925_s1 + $0x18] sm:$0xff] (!%p198_p2)   ;;  %vm708_vm5 = vcmask (!%p198_p2), 891904   ;;  %v1681_v43 = vld [vmem:[%s1925_s1 + $0x20] sm:$0xff] (!%p198_p2)   ;;  %vm821_vm6 = vcmask (!%p198_p2), 883712  }
   0x9   : > { %s1703_s30 = smov (!%p198_p2), 91   ;;  %s1704_s6 = smov (!%p198_p2), 90   ;;  %v1682_v48 = vld [vmem:[%s1925_s1 + $0x28] sm:$0xff] (!%p198_p2)   ;;  %v1683_v53 = vld [vmem:[%s1925_s1 + $0x30] sm:$0xff] (!%p198_p2)   ;;  %vm934_vm7 = vcmask (!%p198_p2), 752640   ;;  %v1684_v58 = vld [vmem:[%s1925_s1 + $0x38] sm:$0xff] (!%p198_p2)  }
   0xa   : > { %vm1047_vm8 = vcmask (!%p198_p2), 744448   ;;  %v1685_v61 = vld [vmem:[%s1925_s1 + $0x40] sm:$0xff] (!%p198_p2)   ;;  %vm1160_vm9 = vcmask (!%p198_p2), 736256   ;;  %vm1351_vm10 = vcmask (!%p198_p2), 150528   ;;  %vm1389_vm11 = vcmask (!%p198_p2), 1043608  }
   0xb   : > { %vm1390_vm12 = vcmask (!%p198_p2), 1047556   ;;  %vm1380_vm13 = vcmask (!%p198_p2), 154624   ;;  %vm1393_vm15 = vcmask (!%p198_p2), 707584  }
   0xc   : > { %vm1391_vm14 = vmor (!%p198_p2), %vm1390_vm12, %vm1389_vm11 }
   0xd   : > { %s1931_s19 = smov (!%p230_p3, %s1467_s19), 3 }
   0xe   : > { %s1747_s20 = smul.u32 24, %s1931_s19 }
  0x10   : > { %s234_s23 = scalar_lea.vmem %s1924_s0, %s1747_s20  ;;  %s239_s13 = scalar_lea.vmem %s1928_s4, %s1747_s20 }
  0x11   : > { %v1756_v2 = vld [vmem:[%s234_s23 + $0x4] ss:$12 sps:$4 sm:$0xff]   ;;  %v1758_v3 = vld [vmem:[%s234_s23] ss:$12 sps:$4 sm:$0xff]   ;;  %v1761_v4 = vld [vmem:[%s234_s23 + $0x8] ss:$12 sps:$4 sm:$0xff]   ;;  %s1896_s11 = scalar_lea.vmem %s1929_s5, %s1747_s20 }
  0x12   : > { %275 = vrot.lane.b32.xlu0 %v1756_v2, %s1697_s24  ;;  %273 = vrot.lane.b32.xlu1 %v1758_v3, %s1697_s24  ;;  %v1277_v7 = vld [vmem:[%s239_s13] sm:$0xff]  ;;  %v1278_v8 = vld [vmem:[%s239_s13 + $0x8] ss:$12 sps:$4 sm:$0xff]  }
  0x13   : > { %v1279_v9 = vld [vmem:[%s239_s13 + $0xc] sm:$0xff]  ;;  %v1281_v10 = vunpack.c.l.bf16 %v1277_v7  ;;  %v1282_v11 = vunpack.c.h.bf16 %v1277_v7  ;;  %v1283_v12 = vunpack.c.l.bf16 %v1278_v8  ;;  %v1286_v15 = vunpack.c.h.bf16 %v1278_v8  ;;  %1352 = vst.msk [vmem:[%s1896_s11] sm:$0xf] %vm1351_vm10, %v1696_v1  ;;  %1353 = vst.msk [vmem:[%s1896_s11 + $0xc] sm:$0xf] %vm1351_vm10, %v1696_v1  ;;  %s1705_s13 = smov 19  }
  0x14   : > { %v1284_v13 = vunpack.c.l.bf16 %v1279_v9  ;;  %v1285_v14 = vunpack.c.h.bf16 %v1279_v9 }
  0x15   : > { %v1658_v16 = vpack.i.bf16 %v1282_v11, %v1281_v10 }
  0x16   : > { %277 = vrot.lane.b32.xlu0 %v1761_v4, %s1697_s24  ;;  %478 = vrot.lane.b32.xlu1 %v1756_v2, %s1698_s25  ;;  %v1663_v17 = vpack.i.bf16 %v1284_v13, %v1283_v12  ;;  %v1668_v18 = vpack.i.bf16 %v1286_v15, %v1285_v14 }
  0x1a   : > { %480 = vrot.lane.b32.xlu0 %v1761_v4, %s1698_s25  ;;  %476 = vrot.lane.b32.xlu1 %v1758_v3, %s1698_s25 }
  0x1e   : > { %591 = vrot.lane.b32.xlu0 %v1756_v2, %s1699_s26  ;;  %593 = vrot.lane.b32.xlu1 %v1761_v4, %s1699_s26 }
  0x22   : > { %589 = vrot.lane.b32.xlu0 %v1758_v3, %s1699_s26  ;;  %704 = vrot.lane.b32.xlu1 %v1756_v2, %s1700_s27 }
  0x26   : > { %706 = vrot.lane.b32.xlu0 %v1761_v4, %s1700_s27  ;;  %702 = vrot.lane.b32.xlu1 %v1758_v3, %s1700_s27 }
  0x2a   : > { %817 = vrot.lane.b32.xlu0 %v1756_v2, %s1701_s28  ;;  %819 = vrot.lane.b32.xlu1 %v1761_v4, %s1701_s28 }
  0x2e   : > { %815 = vrot.lane.b32.xlu0 %v1758_v3, %s1701_s28  ;;  %930 = vrot.lane.b32.xlu1 %v1756_v2, %s1702_s29 }
  0x32   : > { %932 = vrot.lane.b32.xlu0 %v1761_v4, %s1702_s29  ;;  %928 = vrot.lane.b32.xlu1 %v1758_v3, %s1702_s29 }
  0x36   : > { %1043 = vrot.lane.b32.xlu0 %v1756_v2, %s1703_s30  ;;  %1045 = vrot.lane.b32.xlu1 %v1761_v4, %s1703_s30 }
  0x3a   : > { %1041 = vrot.lane.b32.xlu0 %v1758_v3, %s1703_s30  ;;  %1156 = vrot.lane.b32.xlu1 %v1756_v2, %s1704_s6 }
  0x3e   : > { %1158 = vrot.lane.b32.xlu0 %v1761_v4, %s1704_s6  ;;  %1154 = vrot.lane.b32.xlu1 %v1758_v3, %s1704_s6 }
  0x42   : > { %1268 = vperm.xlu1 %1657, %v1260_v5   ;;  %1263 = vperm.xlu0 %1656, %v1259_v6  }
  0x46   : > { %1659 = vrot.lane.b32.xlu1 %v1658_v16, %s1700_s27  ;;  %1664 = vrot.lane.b32.xlu0 %v1663_v17, %s1700_s27 }
  0x4a   : > { %1669 = vrot.lane.b32.xlu1 %v1668_v18, %s1700_s27 }
  0x84   : > { %v276_v19 = vpop.permute.xlu0 %275  ;;  %v274_v20 = vpop.permute.xlu1 %273 }
  0x85   : > { %v280_v24 = vsel %vm279_vm1, %v274_v20, %v276_v19 }
  0x88   : > { %v278_v21 = vpop.permute.xlu0 %277  ;;  %v479_v25 = vpop.permute.xlu1 %478 }
  0x89   : > { %1550 = vmatpush3.bf16.msra.mxu1 %v278_v21  ;;  %v281_v23 = vsel %vm279_vm1, %v276_v19, %v278_v21 }
  0x8a   : > { %289 = vmatprep.subr.bf16.mxu0 %v281_v23  ;;  %1555 = vmatprep.subr.bf16.mxu1 %v1694_v0 }
  0x8b   : > { %290 = vmatpush1.bf16.msra.mxu0 %v280_v24 }
  0x8c   : > { %1552 = vmatmul.mubr.msk.bf16.vlgmr.msra.gmra.mrb[0].mxu1 %vm285_vm2, %v1677_v22  ;;  %384 = vmatprep.subr.bf16.mxu0 %v1756_v2  ;;  %v481_v26 = vpop.permute.xlu0 %480  ;;  %v477_v29 = vpop.permute.xlu1 %476 }
  0x8d   : > { %1556 = vmatpush3.bf16.msra.mxu1 %v1761_v4  ;;  %1557 = vmatprep.mubr.msk.bf16.mxu1 %vm1695_vm0, %v1694_v0  ;;  %v484_v27 = vsel %vm482_vm3, %v479_v25, %v481_v26  ;;  %v483_v31 = vsel %vm482_vm3, %v477_v29, %v479_v25 }
  0x8e   : > { %1481 = vmatmul.mubr.msk.bf16.vlgmr.msra.gmra.mrb[0].mxu0 %vm285_vm2, %v1677_v22  ;;  %1561 = vmatprep.subr.bf16.mxu1 %v1694_v0 }
  0x8f   : > { %385 = vmatpush1.bf16.msra.mxu0 %v1758_v3  ;;  %416 = vmatprep.mubr.bf16.mxu0 %v1696_v1 }
  0x90   : > { %491 = vmatprep.subr.bf16.mxu0 %v484_v27  ;;  %v592_v30 = vpop.permute.xlu0 %591  ;;  %v594_v33 = vpop.permute.xlu1 %593 }
  0x91   : > { %v597_v34 = vsel %vm595_vm4, %v592_v30, %v594_v33 }
  0x94   : > { %1558 = vmatmul.mubr.msk.bf16.vlgmr.msra.gmra.mrb[4].mxu1 %vm285_vm2, %v1678_v28  ;;  %v590_v35 = vpop.permute.xlu0 %589  ;;  %v705_v36 = vpop.permute.xlu1 %704 }
  0x95   : > { %1562 = vmatpush3.bf16.msra.mxu1 %v481_v26  ;;  %1563 = vmatprep.mubr.msk.bf16.mxu1 %vm1695_vm0, %v1694_v0  ;;  %v596_v39 = vsel %vm595_vm4, %v590_v35, %v592_v30 }
  0x96   : > { %1567 = vmatprep.subr.bf16.mxu1 %v1694_v0 }
  0x98   : > { %v707_v38 = vpop.permute.xlu0 %706  ;;  %v703_v40 = vpop.permute.xlu1 %702 }
  0x99   : > { %v710_v41 = vsel %vm708_vm5, %v705_v36, %v707_v38  ;;  %v709_v47 = vsel %vm708_vm5, %v703_v40, %v705_v36 }
  0x9a   : > { %1484 = vmatmul.mubr.msk.bf16.vlgmr.msra.gmra.mrb[0].mxu0 %vm285_vm2, %v1678_v28 }
  0x9b   : > { %492 = vmatpush1.bf16.msra.mxu0 %v483_v31  ;;  %523 = vmatprep.mubr.bf16.mxu0 %v1696_v1 }
  0x9c   : > { %1564 = vmatmul.mubr.msk.bf16.vlgmr.msra.gmra.mrb[8].mxu1 %vm285_vm2, %v1679_v32  ;;  %604 = vmatprep.subr.bf16.mxu0 %v597_v34  ;;  %v818_v42 = vpop.permute.xlu0 %817  ;;  %v820_v44 = vpop.permute.xlu1 %819 }
  0x9d   : > { %1568 = vmatpush3.bf16.msra.mxu1 %v594_v33  ;;  %1569 = vmatprep.mubr.msk.bf16.mxu1 %vm1695_vm0, %v1694_v0  ;;  %v823_v49 = vsel %vm821_vm6, %v818_v42, %v820_v44 }
  0x9e   : > { %1573 = vmatprep.subr.bf16.mxu1 %v1694_v0 }
  0xa0   : > { %v816_v45 = vpop.permute.xlu0 %815  ;;  %v931_v46 = vpop.permute.xlu1 %930 }
  0xa1   : > { %v822_v55 = vsel %vm821_vm6, %v816_v45, %v818_v42 }
  0xa4   : > { %1570 = vmatmul.mubr.msk.bf16.vlgmr.msra.gmra.mrb[12].mxu1 %vm285_vm2, %v1680_v37  ;;  %v933_v50 = vpop.permute.xlu0 %932  ;;  %v929_v51 = vpop.permute.xlu1 %928 }
  0xa5   : > { %1574 = vmatpush3.bf16.msra.mxu1 %v707_v38  ;;  %1575 = vmatprep.mubr.msk.bf16.mxu1 %vm1695_vm0, %v1694_v0  ;;  %v936_v57 = vsel %vm934_vm7, %v931_v46, %v933_v50  ;;  %v935_v60 = vsel %vm934_vm7, %v929_v51, %v931_v46 }
  0xa6   : > { %1489 = vmatmul.mubr.msk.bf16.vlgmr.msra.gmra.mrb[0].mxu0 %vm285_vm2, %v1679_v32  ;;  %1579 = vmatprep.subr.bf16.mxu1 %v1694_v0 }
  0xa7   : > { %605 = vmatpush1.bf16.msra.mxu0 %v596_v39  ;;  %636 = vmatprep.mubr.bf16.mxu0 %v1696_v1 }
  0xa8   : > { %717 = vmatprep.subr.bf16.mxu0 %v710_v41  ;;  %v1044_v52 = vpop.permute.xlu0 %1043  ;;  %v1046_v54 = vpop.permute.xlu1 %1045 }
  0xa9   : > { %v1049_v62 = vsel %vm1047_vm8, %v1044_v52, %v1046_v54 }
  0xac   : > { %1576 = vmatmul.mubr.msk.bf16.vlgmr.msra.gmra.mrb[16].mxu1 %vm285_vm2, %v1681_v43  ;;  %v1042_v56 = vpop.permute.xlu0 %1041 }
  0xad   : > { %1580 = vmatpush3.bf16.msra.mxu1 %v820_v44  ;;  %1581 = vmatprep.mubr.msk.bf16.mxu1 %vm1695_vm0, %v1694_v0  ;;  %v1048_v63 = vsel %vm1047_vm8, %v1042_v56, %v1044_v52 }
  0xae   : > { %1585 = vmatprep.subr.bf16.mxu1 %v1694_v0 }
  0xb0   : > { %v1159_v59 = vpop.permute.xlu0 %1158 }
  0xb2   : > { %1494 = vmatmul.mubr.msk.bf16.vlgmr.msra.gmra.mrb[0].mxu0 %vm285_vm2, %v1680_v37 }
  0xb3   : > { %718 = vmatpush1.bf16.msra.mxu0 %v709_v47  ;;  %749 = vmatprep.mubr.bf16.mxu0 %v1696_v1 }
  0xb4   : > { %1582 = vmatmul.mubr.msk.bf16.vlgmr.msra.gmra.mrb[20].mxu1 %vm285_vm2, %v1682_v48  ;;  %830 = vmatprep.subr.bf16.mxu0 %v823_v49 }
  0xb5   : > { %1586 = vmatpush3.bf16.msra.mxu1 %v933_v50  ;;  %1587 = vmatprep.mubr.msk.bf16.mxu1 %vm1695_vm0, %v1694_v0 }
  0xb6   : > { %1591 = vmatprep.subr.bf16.mxu1 %v1694_v0 }
  0xbc   : > { %1588 = vmatmul.mubr.msk.bf16.vlgmr.msra.gmra.mrb[24].mxu1 %vm285_vm2, %v1683_v53 }
  0xbd   : > { %1592 = vmatpush3.bf16.msra.mxu1 %v1046_v54  ;;  %1593 = vmatprep.mubr.msk.bf16.mxu1 %vm1695_vm0, %v1694_v0 }
  0xbe   : > { %1499 = vmatmul.mubr.msk.bf16.vlgmr.msra.gmra.mrb[0].mxu0 %vm285_vm2, %v1681_v43  ;;  %1597 = vmatprep.subr.bf16.mxu1 %v1694_v0 }
  0xbf   : > { %831 = vmatpush1.bf16.msra.mxu0 %v822_v55  ;;  %862 = vmatprep.mubr.bf16.mxu0 %v1696_v1 }
  0xc0   : > { %943 = vmatprep.subr.bf16.mxu0 %v936_v57 }
  0xc4   : > { %1594 = vmatmul.mubr.msk.bf16.vlgmr.msra.gmra.mrb[28].mxu1 %vm285_vm2, %v1684_v58 }
  0xc5   : > { %1598 = vmatpush3.bf16.msra.mxu1 %v1159_v59  ;;  %1599 = vmatprep.mubr.msk.bf16.mxu1 %vm1695_vm0, %v1694_v0  ;;  %v1157_v0 = vpop.permute.xlu1 %1156  ;;  %vm1397_vm0 = vcmask 863928  }
  0xc6   : > { %v1162_v2 = vsel %vm1160_vm9, %v1157_v0, %v1159_v59 }
  0xc9   : > { %v1155_v3 = vpop.permute.xlu1 %1154 }
  0xca   : > { %1504 = vmatmul.mubr.msk.bf16.vlgmr.msra.gmra.mrb[0].mxu0 %vm285_vm2, %v1682_v48  ;;  %v1161_v4 = vsel %vm1160_vm9, %v1155_v3, %v1157_v0 }
  0xcb   : > { %944 = vmatpush1.bf16.msra.mxu0 %v935_v60  ;;  %975 = vmatprep.mubr.bf16.mxu0 %v1696_v1  ;;  %v1330_v60 = vlaneseq }
  0xcc   : > { %1600 = vmatmul.mubr.msk.bf16.vlgmr.msra.gmra.mrb[32].mxu1 %vm285_vm2, %v1685_v61  ;;  %1056 = vmatprep.subr.bf16.mxu0 %v1049_v62 }
  0xcd   : > { %v1269_v57 = vpop.permute.xlu1 %1268 }
  0xd1   : > { %v1660_v59 = vpop.permute.xlu1 %1659 }
  0xd2   : > { %v1662_v62 = vunpack.i.h.bf16 %v1660_v59 }
  0xd5   : > { %v1670_v0 = vpop.permute.xlu1 %1669 }
  0xd6   : > { %1509 = vmatmul.mubr.msk.bf16.vlgmr.msra.gmra.mrb[0].mxu0 %vm285_vm2, %v1683_v53 }
  0xd7   : > { %1057 = vmatpush1.bf16.msra.mxu0 %v1048_v63  ;;  %1088 = vmatprep.mubr.bf16.mxu0 %v1696_v1  ;;  %v1661_v63 = vunpack.i.l.bf16 %v1660_v59 }
  0xd8   : > { %1169 = vmatprep.subr.bf16.mxu0 %v1162_v2  ;;  %v1331_v2 = vshrl.u32 %v1330_v60, 7 }
  0xe2   : > { %1514 = vmatmul.mubr.msk.bf16.vlgmr.msra.gmra.mrb[0].mxu0 %vm285_vm2, %v1684_v58  ;;  %v1264_v58 = vpop.permute.xlu0 %1263 }
  0xe3   : > { %1170 = vmatpush1.bf16.msra.mxu0 %v1161_v4  ;;  %1201 = vmatprep.mubr.bf16.mxu0 %v1696_v1 }
  0xee   : > { %1519 = vmatmul.mubr.msk.bf16.vlgmr.msra.gmra.mrb[0].mxu0 %vm285_vm2, %v1685_v61  ;;  %v1665_v61 = vpop.permute.xlu0 %1664 }
  0xef   : > { %v1667_v4 = vunpack.i.h.bf16 %v1665_v61 }
 0x15f   : > { %v366_v5 = vpop.f32.mrb[0].mxu1 }
 0x160   : > { %v1553_v6 = vpop.f32.mrb[1].mxu1 }
 0x161   : > { %v369_v7 = vpop.f32.mrb[2].mxu1  ;;  %v1671_v6 = vunpack.i.l.bf16 %v1670_v0 }
 0x162   : > { %v1554_v8 = vpop.f32.mrb[3].mxu1 }
 0x167   : > { %v461_v9 = vpop.f32.mrb[4].mxu1 }
 0x168   : > { %v462_v10 = vadd.f32 %v461_v9, %v366_v5  ;;  %v1559_v11 = vpop.f32.mrb[5].mxu1  ;;  %v1666_v5 = vunpack.i.l.bf16 %v1665_v61  ;;  %v1672_v9 = vunpack.i.h.bf16 %v1670_v0 }
 0x169   : > { %v464_v12 = vpop.f32.mrb[6].mxu1  ;;  %v1306_v11 = vsel %vm708_vm5, %v1661_v63, %v1662_v62 }
 0x16a   : > { %v465_v13 = vadd.f32 %v464_v12, %v369_v7  ;;  %v1560_v14 = vpop.f32.mrb[7].mxu1  ;;  %v1332_v7 = vsub.s32 0, %v1331_v2  ;;  %v1336_v12 = vsub.s32 1, %v1331_v2 }
 0x16f   : > { %v568_v15 = vpop.f32.mrb[8].mxu1 }
 0x170   : > { %v577_v16 = vadd.f32 %v568_v15, %v462_v10  ;;  %v1565_v17 = vpop.f32.mrb[9].mxu1  ;;  %v1340_v15 = vsub.s32 2, %v1331_v2 }
 0x171   : > { %v571_v18 = vpop.f32.mrb[10].mxu1  ;;  %v1328_v17 = vld [vmem:[%s1927_s3] sm:$0x7] }
 0x172   : > { %v580_v19 = vadd.f32 %v571_v18, %v465_v13  ;;  %v1566_v20 = vpop.f32.mrb[11].mxu1 }
 0x177   : > { %v681_v21 = vpop.f32.mrb[12].mxu1 }
 0x178   : > { %v690_v22 = vadd.f32 %v681_v21, %v577_v16  ;;  %v1571_v23 = vpop.f32.mrb[13].mxu1  ;;  %v1308_v21 = vsel %vm708_vm5, %v1667_v4, %v1671_v6 }
 0x179   : > { %v684_v24 = vpop.f32.mrb[14].mxu1  ;;  %v1333_v23 = vrot.slane %v1328_v17, %v1332_v7 }
 0x17a   : > { %v693_v25 = vadd.f32 %v684_v24, %v580_v19  ;;  %v1572_v26 = vpop.f32.mrb[15].mxu1  ;;  %v1307_v19 = vsel %vm708_vm5, %v1662_v62, %v1666_v5 }
 0x17b   : > { %v1309_v26 = vsel %vm708_vm5, %v1671_v6, %v1672_v9 }
 0x17f   : > { %v794_v27 = vpop.f32.mrb[16].mxu1 }
 0x180   : > { %v803_v28 = vadd.f32 %v794_v27, %v690_v22  ;;  %v1577_v29 = vpop.f32.mrb[17].mxu1 }
 0x181   : > { %v797_v30 = vpop.f32.mrb[18].mxu1  ;;  %v1337_v29 = vrot.slane %v1328_v17, %v1336_v12 }
 0x182   : > { %v806_v31 = vadd.f32 %v797_v30, %v693_v25  ;;  %v1578_v32 = vpop.f32.mrb[19].mxu1 }
 0x187   : > { %v907_v33 = vpop.f32.mrb[20].mxu1 }
 0x188   : > { %v916_v34 = vadd.f32 %v907_v33, %v803_v28  ;;  %v1583_v35 = vpop.f32.mrb[21].mxu1 }
 0x189   : > { %v910_v36 = vpop.f32.mrb[22].mxu1 }
 0x18a   : > { %v919_v37 = vadd.f32 %v910_v36, %v806_v31  ;;  %v1584_v38 = vpop.f32.mrb[23].mxu1  ;;  %v1341_v36 = vrot.slane %v1328_v17, %v1340_v15 }
 0x18f   : > { %v1020_v39 = vpop.f32.mrb[24].mxu1 }
 0x190   : > { %v1029_v40 = vadd.f32 %v1020_v39, %v916_v34  ;;  %v1589_v41 = vpop.f32.mrb[25].mxu1 }
 0x191   : > { %v1023_v42 = vpop.f32.mrb[26].mxu1 }
 0x192   : > { %v1032_v43 = vadd.f32 %v1023_v42, %v919_v37  ;;  %v1590_v44 = vpop.f32.mrb[27].mxu1 }
 0x197   : > { %v1133_v45 = vpop.f32.mrb[28].mxu1 }
 0x198   : > { %v1142_v46 = vadd.f32 %v1133_v45, %v1029_v40  ;;  %v1595_v47 = vpop.f32.mrb[29].mxu1 }
 0x199   : > { %v1136_v48 = vpop.f32.mrb[30].mxu1 }
 0x19a   : > { %v1145_v49 = vadd.f32 %v1136_v48, %v1032_v43  ;;  %v1596_v50 = vpop.f32.mrb[31].mxu1 }
 0x19f   : > { %v1246_v51 = vpop.f32.mrb[32].mxu1 }
 0x1a0   : > { %v1255_v52 = vadd.f32 %v1246_v51, %v1142_v46  ;;  %v1601_v53 = vpop.f32.mrb[33].mxu1 }
 0x1a1   : > { %v1249_v54 = vpop.f32.mrb[34].mxu1 }
 0x1a2   : > { %v1258_v55 = vadd.f32 %v1249_v54, %v1145_v49  ;;  %v1602_v56 = vpop.f32.mrb[35].mxu1  ;;  %v1273_v3 = vadd.f32 %v1264_v58, %v1255_v52 }
 0x1a4   : > { %v1276_v8 = vadd.f32 %v1269_v57, %v1258_v55  ;;  %v1318_v16 = vadd.f32 %v1666_v5, %v1273_v3 }
 0x1a6   : > { %v1321_v27 = vadd.f32 %v1672_v9, %v1276_v8  ;;  %v1324_v33 = vmax.f32 %v1318_v16, 0.0 }
 0x1a8   : > { %v1327_v39 = vmax.f32 %v1321_v27, 0.0  ;;  %v1347_v45 = vmul.f32 %v1341_v36, %v1324_v33 }
 0x1aa   : > { %v1350_v47 = vmul.f32 %v1341_v36, %v1327_v39  ;;  %v1528_v48 = vpack.c.bf16 %v1347_v45, %v1347_v45 }
 0x1ac   : > { %v1530_v49 = vpack.c.bf16 %v1350_v47, %v1350_v47 }
 0x1c1   : > { %v1203_v10 = vpop.f32.mrb[0].mxu0 }
 0x1c2   : > { %v1271_v13 = vadd.f32 %v1264_v58, %v1203_v10  ;;  %v1205_v14 = vpop.f32.mrb[1].mxu0 }
 0x1c3   : > { %v1272_v18 = vadd.f32 %v1264_v58, %v1205_v14  ;;  %v1207_v20 = vpop.f32.mrb[2].mxu0 }
 0x1c4   : > { %v1316_v22 = vadd.f32 %v1306_v11, %v1271_v13  ;;  %v1274_v24 = vadd.f32 %v1269_v57, %v1207_v20  ;;  %v1209_v25 = vpop.f32.mrb[3].mxu0 }
 0x1c5   : > { %v1317_v28 = vadd.f32 %v1307_v19, %v1272_v18  ;;  %v1275_v30 = vadd.f32 %v1269_v57, %v1209_v25 }
 0x1c6   : > { %v1322_v31 = vmax.f32 %v1316_v22, 0.0  ;;  %v1319_v32 = vadd.f32 %v1308_v21, %v1274_v24 }
 0x1c7   : > { %v1323_v34 = vmax.f32 %v1317_v28, 0.0  ;;  %v1320_v35 = vadd.f32 %v1309_v26, %v1275_v30 }
 0x1c8   : > { %v1345_v37 = vmul.f32 %v1333_v23, %v1322_v31  ;;  %v1325_v38 = vmax.f32 %v1319_v32, 0.0 }
 0x1c9   : > { %v1346_v40 = vmul.f32 %v1337_v29, %v1323_v34  ;;  %v1326_v41 = vmax.f32 %v1320_v35, 0.0 }
 0x1ca   : > { %v1348_v42 = vmul.f32 %v1333_v23, %v1325_v38 }
 0x1cb   : > { %v1349_v43 = vmul.f32 %v1337_v29, %v1326_v41  ;;  %v1527_v44 = vpack.c.bf16 %v1346_v40, %v1345_v37 }
 0x1cd   : > { %1370 = vrot.lane.b32.xlu0 %v1527_v44, %s1705_s13  ;;  %v1529_v46 = vpack.c.bf16 %v1349_v43, %v1348_v42 }
 0x1cf   : > { %1374 = vrot.lane.b32.xlu1 %v1529_v46, %s1705_s13 }
 0x1d1   : > { %1372 = vrot.lane.b32.xlu0 %v1528_v48, %s1705_s13 }
 0x1d3   : > { %1376 = vrot.lane.b32.xlu1 %v1530_v49, %s1705_s13 }
 0x23f   : > { %v1371_v50 = vpop.permute.xlu0 %1370 }
 0x240   : > { %v1378_v51 = vrot.slane %v1371_v50, 4 }
 0x241   : > { %v1375_v52 = vpop.permute.xlu1 %1374 }
 0x242   : > { %v1381_v53 = vsel %vm1380_vm13, %v1378_v51, %v1371_v50  ;;  %v1379_v54 = vrot.slane %v1375_v52, 4 }
 0x243   : > { %1392 = vst.msk [vmem:[%s1896_s11] sm:$0xff] %vm1391_vm14, %v1381_v53  ;;  %v1373_v55 = vpop.permute.xlu0 %1372 }
 0x244   : > { %v1383_v56 = vsel %vm1380_vm13, %v1379_v54, %v1375_v52  ;;  %v1382_v57 = vsel %vm1380_vm13, %v1378_v51, %v1373_v55 }
 0x245   : > { %1395 = vst.msk [vmem:[%s1896_s11 + $0xc] sm:$0xff] %vm1391_vm14, %v1383_v56  ;;  %v1377_v58 = vpop.permute.xlu1 %1376 }
 0x246   : > { %1394 = vst.msk [vmem:[%s1896_s11 + $0x8] sm:$0xf] %vm1393_vm15, %v1382_v57  ;;  %v1384_v59 = vsel %vm1380_vm13, %v1379_v54, %v1377_v58 }
 0x247   : > { %1398 = vst.msk [vmem:[%s1896_s11 + $0x8] sm:$0xf] %vm1397_vm0, %v1696_v1 }
 0x248   : > { %1396 = vst.msk [vmem:[%s1896_s11 + $0x14] sm:$0xf] %vm1393_vm15, %v1384_v59 }
 0x249   : > { %1399 = vst.msk [vmem:[%s1896_s11 + $0x14] sm:$0xf] %vm1397_vm0, %v1696_v1 }
 0x24a PF: > { %s15_s18 = sadd.s32 1, %s1692_s18  }
 0x24b   : > { %p12_p4 = scmp.ge.s32.totalorder %s15_s18, 6  }
 0x24d   :  { %14 = sbr.rel (!%p12_p4) target bundleno = 1 (0x1), region = 81 }

// kernel: resnet_forward_batched.7
= control target key start
LH: loop header
LB: loop body
LE: loop exit
PB: predicated region body
PF: predicated region fallthrough
CT: control target
= control target key end

     0   :  { %s1802_s15 = smov 0   ;;  %s2020_s0 = inlined_call_operand.vmem [shape: bf16[4,3,362], index: 0, kind: input, shape index: {}]   ;;  %s2021_s1 = inlined_call_operand.vmem [shape: bf16[9,16,3], index: 1, kind: input, shape index: {}]   ;;  %s2022_s2 = inlined_call_operand.vmem [shape: f32[16,1], index: 2, kind: input, shape index: {}]   ;;  %s2023_s3 = inlined_call_operand.vmem [shape: f32[1,324], index: 3, kind: input, shape index: {}]   ;;  %s2024_s4 = inlined_call_operand.vmem [shape: bf16[4,16,362], index: 4, kind: output, shape index: {}]  }
   0x1 LB: > { %s1548_s16 = sadd.s32 4294967295, %s1761_s15   ;;  %p1552_p0 = scmp.ge.s32.totalorder %s1761_s15, 1  ;;  %s1761_s15 = sphi %s1802_s15, %s14_s15  }
   0x2   : > { %p162_p1 = scmp.lt.s32.totalorder %s1761_s15, 5 }
   0x4   : > { %p163_p2 = pnand %p1552_p0, %p162_p1 }
   0x5   : > { %p188_p3 = scmp.lt.s32.totalorder (!%p163_p2), %s1548_s16, 3  ;;  %v215_v0 = vlaneseq (!%p163_p2)  ;;  %v1763_v1 = vmov (!%p163_p2), 1983009808   ;;  %v1764_v5 = vmov (!%p163_p2), 0.0   ;;  %vm1765_vm0 = vmmov (!%p163_p2), 0   ;;  %s1766_s21 = smov (!%p163_p2), 127  }
   0x6   : > { %166 = sbr.rel (%p163_p2) target bundleno = 590 (0x24e), region = 36  ;;  %v213_v2 = vunpack.c.l.s4 (!%p163_p2), %v1763_v1  ;;  %1626 = vmatprep.subr.bf16.mxu1 (!%p163_p2), %v1764_v5  ;;  %1628 = vmatprep.mubr.msk.bf16.mxu1 (!%p163_p2), %vm1765_vm0, %v1764_v5  ;;  %s1767_s22 = smov (!%p163_p2), 126   ;;  %v1768_v21 = vmov (!%p163_p2), 0   ;;  %v1397_v48 = vld [vmem:[%s2022_s2] sm:$0xff] (!%p163_p2)  ;;  %v1398_v49 = vld [vmem:[%s2022_s2 + $0x8] sm:$0xff] (!%p163_p2)  ;;  %vm240_vm1 = vcmask (!%p163_p2), 1040384  }
   0x7   : > { %v1812_v3 = vshrl.u32 (!%p163_p2), %v215_v0, 7  ;;  %285 = vmatprep.mubr.bf16.mxu0 (!%p163_p2), %v1768_v21  ;;  %1736 = vset.pattern.permute.xlu0 (!%p163_p2), %v1768_v21  ;;  %s1769_s23 = smov (!%p163_p2), 110   ;;  %s1770_s24 = smov (!%p163_p2), 109   ;;  %vm241_vm2 = vcmask (!%p163_p2), 1041408   ;;  %v1775_v51 = vmov (!%p163_p2), 65535   ;;  %vm233_vm3 = vcmask (!%p163_p2), 1039360  }
   0x8   : > { %v214_v4 = vunpack.c.0.s8 (!%p163_p2), %v213_v2  ;;  %1737 = vset.pattern.permute.xlu1 (!%p163_p2), %v1768_v21  ;;  %s1771_s25 = smov (!%p163_p2), 108   ;;  %s1772_s26 = smov (!%p163_p2), 92   ;;  %v242_v52 = vsel (!%p163_p2), %vm240_vm1, 4294967295, %v1775_v51  ;;  %v1746_v61 = vld [vmem:[%s2021_s1 + $0x8] sm:$0xff] (!%p163_p2)   ;;  %vm470_vm4 = vcmask (!%p163_p2), 1031168   ;;  %vm236_vm5 = vcmask (!%p163_p2), 23552  }
   0x9   : > { %s1773_s27 = smov (!%p163_p2), 91   ;;  %s1774_s28 = smov (!%p163_p2), 90   ;;  %v1870_v54 = vsel (!%p163_p2), %vm241_vm2, %v242_v52, 0  ;;  %vm607_vm6 = vcmask (!%p163_p2), 900096   ;;  %vm744_vm7 = vcmask (!%p163_p2), 891904   ;;  %vm881_vm8 = vcmask (!%p163_p2), 883712  }
   0xa   : > { %v1817_v6 = vsub.s32 (!%p163_p2), %v214_v4, %v1812_v3  ;;  %vm1018_vm9 = vcmask (!%p163_p2), 752640   ;;  %vm1155_vm10 = vcmask (!%p163_p2), 744448   ;;  %vm1292_vm11 = vcmask (!%p163_p2), 736256   ;;  %s1776_s6 = smov (!%p163_p2), 19  }
   0xb   : > { %vm1444_vm12 = vcmask (!%p163_p2), 150528   ;;  %vm1482_vm13 = vcmask (!%p163_p2), 1043608   ;;  %vm1483_vm14 = vcmask (!%p163_p2), 1047556   ;;  %vm1473_vm15 = vcmask (!%p163_p2), 154624  }
   0xc   : > { %vm1486_vm1 = vcmask (!%p163_p2), 707584   ;;  %vm1490_vm2 = vcmask (!%p163_p2), 863928  }
   0xd   : > { %s2026_s16 = smov (!%p188_p3, %s1548_s16), 3 }
   0xe   : > { %s1712_s17 = smul.u32 6, %s2026_s16 }
  0x10   : > { %s1822_s20 = scalar_lea.vmem %s2020_s0, %s1712_s17 }
  0x11   : > { %v199_v7 = vld [vmem:[%s1822_s20] sm:$0x3f] }
  0x12   : > { %v438_v8 = vld [vmem:[%s1822_s20] sm:$0x3f]  ;;  %v1829_v9 = vrot.slane %v199_v7, %v1817_v6  ;;  %v211_v10 = vcombine.high %v199_v7, %v199_v7 }
  0x13   : > { %v455_v11 = vrot.slane %v438_v8, %v1817_v6  ;;  %v575_v14 = vld [vmem:[%s1822_s20] sm:$0x3f]  ;;  %v448_v16 = vcombine.high %v438_v8, %v438_v8 }
  0x14   : > { %227 = vrot.lane.b32.xlu1 %v1829_v9, %s1766_s21  ;;  %v1835_v12 = vcombine.high %v1829_v9, %v1829_v9  ;;  %v1840_v15 = vrot.slane %v211_v10, %v1817_v6  ;;  %v585_v17 = vcombine.high %v575_v14, %v575_v14  ;;  %v712_v18 = vld [vmem:[%s1822_s20] sm:$0x3f]  ;;  %v592_v20 = vrot.slane %v575_v14, %v1817_v6 }
  0x15   : > { %v463_v13 = vcombine.high %v455_v11, %v455_v11  ;;  %v462_v19 = vrot.slane %v448_v16, %v1817_v6  ;;  %v729_v23 = vrot.slane %v712_v18, %v1817_v6  ;;  %v849_v26 = vld [vmem:[%s1822_s20] sm:$0x3f]  ;;  %v722_v27 = vcombine.high %v712_v18, %v712_v18 }
  0x16   : > { %229 = vrot.lane.b32.xlu0 %v1835_v12, %s1766_s21  ;;  %v599_v22 = vrot.slane %v585_v17, %v1817_v6  ;;  %v600_v24 = vcombine.high %v592_v20, %v592_v20  ;;  %v859_v28 = vcombine.high %v849_v26, %v849_v26  ;;  %v986_v29 = vld [vmem:[%s1822_s20] sm:$0x3f]  ;;  %v866_v31 = vrot.slane %v849_v26, %v1817_v6 }
  0x17   : > { %v737_v25 = vcombine.high %v729_v23, %v729_v23  ;;  %v736_v30 = vrot.slane %v722_v27, %v1817_v6  ;;  %v1003_v33 = vrot.slane %v986_v29, %v1817_v6  ;;  %v1123_v36 = vld [vmem:[%s1822_s20] sm:$0x3f]  ;;  %v996_v37 = vcombine.high %v986_v29, %v986_v29 }
  0x18   : > { %466 = vrot.lane.b32.xlu1 %v463_v13, %s1767_s22  ;;  %v873_v32 = vrot.slane %v859_v28, %v1817_v6  ;;  %v874_v34 = vcombine.high %v866_v31, %v866_v31  ;;  %v1133_v38 = vcombine.high %v1123_v36, %v1123_v36  ;;  %v1140_v40 = vrot.slane %v1123_v36, %v1817_v6  ;;  %v1260_v41 = vld [vmem:[%s1822_s20] sm:$0x3f] }
  0x19   : > { %v1011_v35 = vcombine.high %v1003_v33, %v1003_v33  ;;  %v1010_v39 = vrot.slane %v996_v37, %v1817_v6  ;;  %v1277_v43 = vrot.slane %v1260_v41, %v1817_v6  ;;  %v1270_v46 = vcombine.high %v1260_v41, %v1260_v41  ;;  %v1747_v8 = vld [vmem:[%s2021_s1] sm:$0xff]  }
  0x1a   : > { %231 = vrot.lane.b32.xlu0 %v1840_v15, %s1766_s21  ;;  %v1147_v42 = vrot.slane %v1133_v38, %v1817_v6  ;;  %v1148_v44 = vcombine.high %v1140_v40, %v1140_v40  ;;  %v349_v59 = vand.u32 %v1870_v54, %v1835_v12  ;;  %v352_v63 = vand.u32 %v1870_v54, %v1840_v15  ;;  %v1748_v15 = vld [vmem:[%s2021_s1 + $0x10] sm:$0xff]  }
  0x1b   : > { %v1285_v45 = vcombine.high %v1277_v43, %v1277_v43  ;;  %v1284_v47 = vrot.slane %v1270_v46, %v1817_v6  ;;  %v346_v2 = vand.u32 %v1870_v54, %v1829_v9  ;;  %v1752_v46 = vld [vmem:[%s2021_s1 + $0x30] sm:$0xff]  }
  0x1c   : > { %464 = vrot.lane.b32.xlu1 %v455_v11, %s1767_s22 }
  0x1e   : > { %468 = vrot.lane.b32.xlu0 %v462_v19, %s1767_s22 }
  0x20   : > { %605 = vrot.lane.b32.xlu1 %v599_v22, %s1769_s23 }
  0x22   : > { %603 = vrot.lane.b32.xlu0 %v600_v24, %s1769_s23 }
  0x24   : > { %740 = vrot.lane.b32.xlu1 %v737_v25, %s1770_s24 }
  0x26   : > { %601 = vrot.lane.b32.xlu0 %v592_v20, %s1769_s23 }
  0x28   : > { %738 = vrot.lane.b32.xlu1 %v729_v23, %s1770_s24  ;;  %v1749_v23 = vld [vmem:[%s2021_s1 + $0x18] sm:$0xff]  }
  0x2a   : > { %742 = vrot.lane.b32.xlu0 %v736_v30, %s1770_s24 }
  0x2c   : > { %879 = vrot.lane.b32.xlu1 %v873_v32, %s1771_s25 }
  0x2e   : > { %877 = vrot.lane.b32.xlu0 %v874_v34, %s1771_s25 }
  0x30   : > { %1014 = vrot.lane.b32.xlu1 %v1011_v35, %s1772_s26 }
  0x32   : > { %875 = vrot.lane.b32.xlu0 %v866_v31, %s1771_s25  ;;  %v1750_v31 = vld [vmem:[%s2021_s1 + $0x20] sm:$0xff]  }
  0x34   : > { %1012 = vrot.lane.b32.xlu1 %v1003_v33, %s1772_s26 }
  0x36   : > { %1016 = vrot.lane.b32.xlu0 %v1010_v39, %s1772_s26 }
  0x38   : > { %1153 = vrot.lane.b32.xlu1 %v1147_v42, %s1773_s27 }
  0x3a   : > { %1151 = vrot.lane.b32.xlu0 %v1148_v44, %s1773_s27 }
  0x3c   : > { %1288 = vrot.lane.b32.xlu1 %v1285_v45, %s1774_s28 }
  0x3e   : > { %1149 = vrot.lane.b32.xlu0 %v1140_v40, %s1773_s27  ;;  %v1751_v40 = vld [vmem:[%s2021_s1 + $0x28] sm:$0xff]   ;;  %s1713_s27 = smul.u32 24, %s2026_s16 }
  0x40   : > { %1286 = vrot.lane.b32.xlu1 %v1277_v43, %s1774_s28  ;;  %s1993_s30 = scalar_lea.vmem %s2024_s4, %s1713_s27 }
  0x41   : > { %1445 = vst.msk [vmem:[%s1993_s30] sm:$0xf] %vm1444_vm12, %v1768_v21  ;;  %1446 = vst.msk [vmem:[%s1993_s30 + $0xc] sm:$0xf] %vm1444_vm12, %v1768_v21 }
  0x42   : > { %1290 = vrot.lane.b32.xlu0 %v1284_v47, %s1774_s28 }
  0x44   : > { %1406 = vperm.xlu1 %1737, %v1398_v49  }
  0x46   : > { %1401 = vperm.xlu0 %1736, %v1397_v48  }
  0x86   : > { %v228_v53 = vpop.permute.xlu1 %227 }
  0x88   : > { %v230_v50 = vpop.permute.xlu0 %229 }
  0x89   : > { %v234_v55 = vsel %vm233_vm3, %v228_v53, %v230_v50  ;;  %v1753_v53 = vld [vmem:[%s2021_s1 + $0x38] sm:$0xff]  }
  0x8a   : > { %v467_v62 = vpop.permute.xlu1 %466  ;;  %v245_v0 = vand.u32 %v1870_v54, %v234_v55 }
  0x8c   : > { %v232_v56 = vpop.permute.xlu0 %231 }
  0x8d   : > { %v251_v57 = vand.u32 %v1870_v54, %v232_v56  ;;  %v235_v58 = vsel %vm233_vm3, %v230_v50, %v232_v56 }
  0x8e   : > { %v248_v60 = vand.u32 %v1870_v54, %v235_v58  ;;  %v465_v7 = vpop.permute.xlu1 %464 }
  0x8f   : > { %1627 = vmatpush3.bf16.msra.mxu1 %v251_v57  ;;  %v471_v11 = vsel %vm470_vm4, %v465_v7, %v467_v62 }
  0x90   : > { %253 = vmatprep.subr.bf16.mxu0 %v248_v60  ;;  %1632 = vmatprep.subr.bf16.mxu1 %v1764_v5  ;;  %v469_v1 = vpop.permute.xlu0 %468  ;;  %v477_v14 = vand.u32 %v471_v11, %v1870_v54  ;;  %v1754_v60 = vld [vmem:[%s2021_s1 + $0x40] sm:$0xff]  }
  0x91   : > { %254 = vmatpush1.bf16.msra.mxu0 %v245_v0  ;;  %v472_v4 = vsel %vm470_vm4, %v467_v62, %v469_v1  ;;  %v483_v9 = vand.u32 %v469_v1, %v1870_v54 }
  0x92   : > { %1629 = vmatmul.mubr.msk.bf16.vlgmr.msra.gmra.mrb[0].mxu1 %vm236_vm5, %v1746_v61  ;;  %354 = vmatprep.subr.bf16.mxu0 %v349_v59  ;;  %v480_v6 = vand.u32 %v472_v4, %v1870_v54  ;;  %v606_v12 = vpop.permute.xlu1 %605 }
  0x93   : > { %1633 = vmatpush3.bf16.msra.mxu1 %v352_v63  ;;  %1634 = vmatprep.mubr.msk.bf16.mxu1 %vm1765_vm0, %v1764_v5  ;;  %v620_v18 = vand.u32 %v606_v12, %v1870_v54 }
  0x94   : > { %1558 = vmatmul.mubr.msk.bf16.vlgmr.msra.gmra.mrb[0].mxu0 %vm236_vm5, %v1746_v61  ;;  %1638 = vmatprep.subr.bf16.mxu1 %v1764_v5  ;;  %v604_v10 = vpop.permute.xlu0 %603 }
  0x95   : > { %355 = vmatpush1.bf16.msra.mxu0 %v346_v2  ;;  %386 = vmatprep.mubr.bf16.mxu0 %v1768_v21  ;;  %v609_v13 = vsel %vm607_vm6, %v604_v10, %v606_v12 }
  0x96   : > { %485 = vmatprep.subr.bf16.mxu0 %v480_v6  ;;  %v617_v16 = vand.u32 %v609_v13, %v1870_v54  ;;  %v741_v19 = vpop.permute.xlu1 %740 }
  0x98   : > { %v602_v17 = vpop.permute.xlu0 %601 }
  0x99   : > { %v608_v22 = vsel %vm607_vm6, %v602_v17, %v604_v10 }
  0x9a   : > { %1635 = vmatmul.mubr.msk.bf16.vlgmr.msra.gmra.mrb[4].mxu1 %vm236_vm5, %v1747_v8  ;;  %v739_v24 = vpop.permute.xlu1 %738  ;;  %v614_v28 = vand.u32 %v608_v22, %v1870_v54 }
  0x9b   : > { %1639 = vmatpush3.bf16.msra.mxu1 %v483_v9  ;;  %1640 = vmatprep.mubr.msk.bf16.mxu1 %vm1765_vm0, %v1764_v5  ;;  %v745_v35 = vsel %vm744_vm7, %v739_v24, %v741_v19 }
  0x9c   : > { %1644 = vmatprep.subr.bf16.mxu1 %v1764_v5  ;;  %v743_v20 = vpop.permute.xlu0 %742  ;;  %v751_v38 = vand.u32 %v745_v35, %v1870_v54 }
  0x9d   : > { %v746_v25 = vsel %vm744_vm7, %v741_v19, %v743_v20  ;;  %v757_v26 = vand.u32 %v743_v20, %v1870_v54 }
  0x9e   : > { %v754_v29 = vand.u32 %v746_v25, %v1870_v54  ;;  %v880_v30 = vpop.permute.xlu1 %879 }
  0x9f   : > { %v894_v33 = vand.u32 %v880_v30, %v1870_v54 }
  0xa0   : > { %1561 = vmatmul.mubr.msk.bf16.vlgmr.msra.gmra.mrb[0].mxu0 %vm236_vm5, %v1747_v8  ;;  %v878_v27 = vpop.permute.xlu0 %877 }
  0xa1   : > { %486 = vmatpush1.bf16.msra.mxu0 %v477_v14  ;;  %517 = vmatprep.mubr.bf16.mxu0 %v1768_v21  ;;  %v883_v36 = vsel %vm881_vm8, %v878_v27, %v880_v30 }
  0xa2   : > { %1641 = vmatmul.mubr.msk.bf16.vlgmr.msra.gmra.mrb[8].mxu1 %vm236_vm5, %v1748_v15  ;;  %622 = vmatprep.subr.bf16.mxu0 %v617_v16  ;;  %v1015_v34 = vpop.permute.xlu1 %1014  ;;  %v891_v39 = vand.u32 %v883_v36, %v1870_v54 }
  0xa3   : > { %1645 = vmatpush3.bf16.msra.mxu1 %v620_v18  ;;  %1646 = vmatprep.mubr.msk.bf16.mxu1 %vm1765_vm0, %v1764_v5 }
  0xa4   : > { %1650 = vmatprep.subr.bf16.mxu1 %v1764_v5  ;;  %v876_v32 = vpop.permute.xlu0 %875 }
  0xa5   : > { %v882_v45 = vsel %vm881_vm8, %v876_v32, %v878_v27 }
  0xa6   : > { %v1013_v41 = vpop.permute.xlu1 %1012  ;;  %v888_v50 = vand.u32 %v882_v45, %v1870_v54 }
  0xa7   : > { %v1019_v56 = vsel %vm1018_vm9, %v1013_v41, %v1015_v34 }
  0xa8   : > { %v1017_v37 = vpop.permute.xlu0 %1016  ;;  %v1025_v58 = vand.u32 %v1019_v56, %v1870_v54 }
  0xa9   : > { %v1031_v42 = vand.u32 %v1017_v37, %v1870_v54  ;;  %v1020_v48 = vsel %vm1018_vm9, %v1015_v34, %v1017_v37 }
  0xaa   : > { %1647 = vmatmul.mubr.msk.bf16.vlgmr.msra.gmra.mrb[12].mxu1 %vm236_vm5, %v1749_v23  ;;  %v1154_v44 = vpop.permute.xlu1 %1153  ;;  %v1028_v51 = vand.u32 %v1020_v48, %v1870_v54 }
  0xab   : > { %1651 = vmatpush3.bf16.msra.mxu1 %v757_v26  ;;  %1652 = vmatprep.mubr.msk.bf16.mxu1 %vm1765_vm0, %v1764_v5  ;;  %v1168_v49 = vand.u32 %v1154_v44, %v1870_v54 }
  0xac   : > { %1566 = vmatmul.mubr.msk.bf16.vlgmr.msra.gmra.mrb[0].mxu0 %vm236_vm5, %v1748_v15  ;;  %1656 = vmatprep.subr.bf16.mxu1 %v1764_v5  ;;  %v1152_v43 = vpop.permute.xlu0 %1151 }
  0xad   : > { %623 = vmatpush1.bf16.msra.mxu0 %v614_v28  ;;  %654 = vmatprep.mubr.bf16.mxu0 %v1768_v21  ;;  %v1157_v57 = vsel %vm1155_vm10, %v1152_v43, %v1154_v44 }
  0xae   : > { %759 = vmatprep.subr.bf16.mxu0 %v754_v29  ;;  %v1165_v59 = vand.u32 %v1157_v57, %v1870_v54 }
  0xb0   : > { %v1150_v47 = vpop.permute.xlu0 %1149 }
  0xb1   : > { %v1156_v61 = vsel %vm1155_vm10, %v1150_v47, %v1152_v43 }
  0xb2   : > { %1653 = vmatmul.mubr.msk.bf16.vlgmr.msra.gmra.mrb[16].mxu1 %vm236_vm5, %v1750_v31  ;;  %v1162_v63 = vand.u32 %v1156_v61, %v1870_v54  ;;  %v1429_v61 = vsub.s32 1, %v1812_v3 }
  0xb3   : > { %1657 = vmatpush3.bf16.msra.mxu1 %v894_v33  ;;  %1658 = vmatprep.mubr.msk.bf16.mxu1 %vm1765_vm0, %v1764_v5 }
  0xb4   : > { %1662 = vmatprep.subr.bf16.mxu1 %v1764_v5  ;;  %v1291_v52 = vpop.permute.xlu0 %1290 }
  0xb5   : > { %v1305_v55 = vand.u32 %v1291_v52, %v1870_v54 }
  0xb8   : > { %1571 = vmatmul.mubr.msk.bf16.vlgmr.msra.gmra.mrb[0].mxu0 %vm236_vm5, %v1749_v23 }
  0xb9   : > { %760 = vmatpush1.bf16.msra.mxu0 %v751_v38  ;;  %791 = vmatprep.mubr.bf16.mxu0 %v1768_v21 }
  0xba   : > { %1659 = vmatmul.mubr.msk.bf16.vlgmr.msra.gmra.mrb[20].mxu1 %vm236_vm5, %v1751_v40  ;;  %896 = vmatprep.subr.bf16.mxu0 %v891_v39 }
  0xbb   : > { %1663 = vmatpush3.bf16.msra.mxu1 %v1031_v42  ;;  %1664 = vmatprep.mubr.msk.bf16.mxu1 %vm1765_vm0, %v1764_v5 }
  0xbc   : > { %1668 = vmatprep.subr.bf16.mxu1 %v1764_v5 }
  0xc2   : > { %1665 = vmatmul.mubr.msk.bf16.vlgmr.msra.gmra.mrb[24].mxu1 %vm236_vm5, %v1752_v46 }
  0xc3   : > { %1669 = vmatpush3.bf16.msra.mxu1 %v1168_v49  ;;  %1670 = vmatprep.mubr.msk.bf16.mxu1 %vm1765_vm0, %v1764_v5 }
  0xc4   : > { %1576 = vmatmul.mubr.msk.bf16.vlgmr.msra.gmra.mrb[0].mxu0 %vm236_vm5, %v1750_v31  ;;  %1674 = vmatprep.subr.bf16.mxu1 %v1764_v5 }
  0xc5   : > { %897 = vmatpush1.bf16.msra.mxu0 %v888_v50  ;;  %928 = vmatprep.mubr.bf16.mxu0 %v1768_v21 }
  0xc6   : > { %1033 = vmatprep.subr.bf16.mxu0 %v1028_v51 }
  0xca   : > { %1671 = vmatmul.mubr.msk.bf16.vlgmr.msra.gmra.mrb[28].mxu1 %vm236_vm5, %v1753_v53 }
  0xcb   : > { %1675 = vmatpush3.bf16.msra.mxu1 %v1305_v55  ;;  %1676 = vmatprep.mubr.msk.bf16.mxu1 %vm1765_vm0, %v1764_v5  ;;  %v1289_v5 = vpop.permute.xlu1 %1288  ;;  %vm1484_vm0 = vmor %vm1483_vm14, %vm1482_vm13 }
  0xcc   : > { %v1294_v62 = vsel %vm1292_vm11, %v1289_v5, %v1291_v52 }
  0xcd   : > { %v1302_v0 = vand.u32 %v1294_v62, %v1870_v54 }
  0xcf   : > { %v1287_v1 = vpop.permute.xlu1 %1286 }
  0xd0   : > { %1581 = vmatmul.mubr.msk.bf16.vlgmr.msra.gmra.mrb[0].mxu0 %vm236_vm5, %v1751_v40  ;;  %v1293_v2 = vsel %vm1292_vm11, %v1287_v1, %v1289_v5  ;;  %v1433_v1 = vsub.s32 2, %v1812_v3 }
  0xd1   : > { %1034 = vmatpush1.bf16.msra.mxu0 %v1025_v58  ;;  %1065 = vmatprep.mubr.bf16.mxu0 %v1768_v21  ;;  %v1299_v4 = vand.u32 %v1293_v2, %v1870_v54 }
  0xd2   : > { %1677 = vmatmul.mubr.msk.bf16.vlgmr.msra.gmra.mrb[32].mxu1 %vm236_vm5, %v1754_v60  ;;  %1170 = vmatprep.subr.bf16.mxu0 %v1165_v59  ;;  %v1402_v59 = vpop.permute.xlu0 %1401 }
  0xd3   : > { %v1407_v5 = vpop.permute.xlu1 %1406 }
  0xdc   : > { %1586 = vmatmul.mubr.msk.bf16.vlgmr.msra.gmra.mrb[0].mxu0 %vm236_vm5, %v1752_v46 }
  0xdd   : > { %1171 = vmatpush1.bf16.msra.mxu0 %v1162_v63  ;;  %1202 = vmatprep.mubr.bf16.mxu0 %v1768_v21 }
  0xde   : > { %1307 = vmatprep.subr.bf16.mxu0 %v1302_v0  ;;  %v1421_v0 = vld [vmem:[%s2023_s3] sm:$0x7] }
  0xe8   : > { %1591 = vmatmul.mubr.msk.bf16.vlgmr.msra.gmra.mrb[0].mxu0 %vm236_vm5, %v1753_v53 }
  0xe9   : > { %1308 = vmatpush1.bf16.msra.mxu0 %v1299_v4  ;;  %1339 = vmatprep.mubr.bf16.mxu0 %v1768_v21 }
  0xf4   : > { %1596 = vmatmul.mubr.msk.bf16.vlgmr.msra.gmra.mrb[0].mxu0 %vm236_vm5, %v1754_v60  ;;  %v1425_v60 = vsub.s32 0, %v1812_v3 }
  0xf6   : > { %v1426_v4 = vrot.slane %v1421_v0, %v1425_v60 }
 0x165   : > { %v330_v54 = vpop.f32.mrb[0].mxu1 }
 0x166   : > { %v1630_v6 = vpop.f32.mrb[1].mxu1 }
 0x167   : > { %v333_v7 = vpop.f32.mrb[2].mxu1 }
 0x168   : > { %v1631_v8 = vpop.f32.mrb[3].mxu1 }
 0x169   : > { %v1430_v8 = vrot.slane %v1421_v0, %v1429_v61 }
 0x16d   : > { %v431_v9 = vpop.f32.mrb[4].mxu1 }
 0x16e   : > { %v432_v10 = vadd.f32 %v431_v9, %v330_v54  ;;  %v1636_v11 = vpop.f32.mrb[5].mxu1 }
 0x16f   : > { %v434_v12 = vpop.f32.mrb[6].mxu1 }
 0x170   : > { %v435_v13 = vadd.f32 %v434_v12, %v333_v7  ;;  %v1637_v14 = vpop.f32.mrb[7].mxu1 }
 0x175   : > { %v562_v15 = vpop.f32.mrb[8].mxu1 }
 0x176   : > { %v571_v16 = vadd.f32 %v562_v15, %v432_v10  ;;  %v1642_v17 = vpop.f32.mrb[9].mxu1 }
 0x177   : > { %v565_v18 = vpop.f32.mrb[10].mxu1 }
 0x178   : > { %v574_v19 = vadd.f32 %v565_v18, %v435_v13  ;;  %v1643_v20 = vpop.f32.mrb[11].mxu1 }
 0x17d   : > { %v699_v22 = vpop.f32.mrb[12].mxu1 }
 0x17e   : > { %v708_v23 = vadd.f32 %v699_v22, %v571_v16  ;;  %v1648_v24 = vpop.f32.mrb[13].mxu1  ;;  %v1434_v16 = vrot.slane %v1421_v0, %v1433_v1 }
 0x17f   : > { %v702_v25 = vpop.f32.mrb[14].mxu1 }
 0x180   : > { %v711_v26 = vadd.f32 %v702_v25, %v574_v19  ;;  %v1649_v27 = vpop.f32.mrb[15].mxu1 }
 0x185   : > { %v836_v28 = vpop.f32.mrb[16].mxu1 }
 0x186   : > { %v845_v29 = vadd.f32 %v836_v28, %v708_v23  ;;  %v1654_v30 = vpop.f32.mrb[17].mxu1 }
 0x187   : > { %v839_v31 = vpop.f32.mrb[18].mxu1 }
 0x188   : > { %v848_v32 = vadd.f32 %v839_v31, %v711_v26  ;;  %v1655_v33 = vpop.f32.mrb[19].mxu1 }
 0x18d   : > { %v973_v34 = vpop.f32.mrb[20].mxu1 }
 0x18e   : > { %v982_v35 = vadd.f32 %v973_v34, %v845_v29  ;;  %v1660_v36 = vpop.f32.mrb[21].mxu1 }
 0x18f   : > { %v976_v37 = vpop.f32.mrb[22].mxu1 }
 0x190   : > { %v985_v38 = vadd.f32 %v976_v37, %v848_v32  ;;  %v1661_v39 = vpop.f32.mrb[23].mxu1 }
 0x195   : > { %v1110_v40 = vpop.f32.mrb[24].mxu1 }
 0x196   : > { %v1119_v41 = vadd.f32 %v1110_v40, %v982_v35  ;;  %v1666_v42 = vpop.f32.mrb[25].mxu1 }
 0x197   : > { %v1113_v43 = vpop.f32.mrb[26].mxu1 }
 0x198   : > { %v1122_v44 = vadd.f32 %v1113_v43, %v985_v38  ;;  %v1667_v45 = vpop.f32.mrb[27].mxu1 }
 0x19d   : > { %v1247_v46 = vpop.f32.mrb[28].mxu1 }
 0x19e   : > { %v1256_v47 = vadd.f32 %v1247_v46, %v1119_v41  ;;  %v1672_v48 = vpop.f32.mrb[29].mxu1 }
 0x19f   : > { %v1250_v49 = vpop.f32.mrb[30].mxu1 }
 0x1a0   : > { %v1259_v50 = vadd.f32 %v1250_v49, %v1122_v44  ;;  %v1673_v51 = vpop.f32.mrb[31].mxu1 }
 0x1a5   : > { %v1384_v52 = vpop.f32.mrb[32].mxu1 }
 0x1a6   : > { %v1393_v53 = vadd.f32 %v1384_v52, %v1256_v47  ;;  %v1678_v55 = vpop.f32.mrb[33].mxu1 }
 0x1a7   : > { %v1387_v56 = vpop.f32.mrb[34].mxu1 }
 0x1a8   : > { %v1396_v57 = vadd.f32 %v1387_v56, %v1259_v50  ;;  %v1679_v58 = vpop.f32.mrb[35].mxu1  ;;  %v1411_v62 = vadd.f32 %v1402_v59, %v1393_v53 }
 0x1aa   : > { %v1414_v6 = vadd.f32 %v1407_v5, %v1396_v57  ;;  %v1417_v13 = vmax.f32 %v1411_v62, 0.0 }
 0x1ac   : > { %v1420_v19 = vmax.f32 %v1414_v6, 0.0  ;;  %v1440_v25 = vmul.f32 %v1434_v16, %v1417_v13 }
 0x1ae   : > { %v1443_v27 = vmul.f32 %v1434_v16, %v1420_v19  ;;  %v1605_v28 = vpack.c.bf16 %v1440_v25, %v1440_v25 }
 0x1b0   : > { %v1607_v29 = vpack.c.bf16 %v1443_v27, %v1443_v27 }
 0x1c7   : > { %v1341_v63 = vpop.f32.mrb[0].mxu0 }
 0x1c8   : > { %v1409_v2 = vadd.f32 %v1402_v59, %v1341_v63  ;;  %v1343_v54 = vpop.f32.mrb[1].mxu0 }
 0x1c9   : > { %v1410_v7 = vadd.f32 %v1402_v59, %v1343_v54  ;;  %v1345_v9 = vpop.f32.mrb[2].mxu0 }
 0x1ca   : > { %v1415_v10 = vmax.f32 %v1409_v2, 0.0  ;;  %v1412_v11 = vadd.f32 %v1407_v5, %v1345_v9  ;;  %v1347_v12 = vpop.f32.mrb[3].mxu0 }
 0x1cb   : > { %v1416_v14 = vmax.f32 %v1410_v7, 0.0  ;;  %v1413_v15 = vadd.f32 %v1407_v5, %v1347_v12 }
 0x1cc   : > { %v1438_v17 = vmul.f32 %v1426_v4, %v1415_v10  ;;  %v1418_v18 = vmax.f32 %v1412_v11, 0.0 }
 0x1cd   : > { %v1439_v20 = vmul.f32 %v1430_v8, %v1416_v14  ;;  %v1419_v22 = vmax.f32 %v1413_v15, 0.0 }
 0x1ce   : > { %v1441_v3 = vmul.f32 %v1426_v4, %v1418_v18 }
 0x1cf   : > { %v1442_v23 = vmul.f32 %v1430_v8, %v1419_v22  ;;  %v1604_v24 = vpack.c.bf16 %v1439_v20, %v1438_v17 }
 0x1d1   : > { %1463 = vrot.lane.b32.xlu1 %v1604_v24, %s1776_s6  ;;  %v1606_v26 = vpack.c.bf16 %v1442_v23, %v1441_v3 }
 0x1d3   : > { %1467 = vrot.lane.b32.xlu0 %v1606_v26, %s1776_s6 }
 0x1d5   : > { %1465 = vrot.lane.b32.xlu1 %v1605_v28, %s1776_s6 }
 0x1d7   : > { %1469 = vrot.lane.b32.xlu0 %v1607_v29, %s1776_s6 }
 0x243   : > { %v1464_v30 = vpop.permute.xlu1 %1463 }
 0x244   : > { %v1471_v31 = vrot.slane %v1464_v30, 4 }
 0x245   : > { %v1468_v32 = vpop.permute.xlu0 %1467 }
 0x246   : > { %v1474_v33 = vsel %vm1473_vm15, %v1471_v31, %v1464_v30  ;;  %v1472_v34 = vrot.slane %v1468_v32, 4 }
 0x247   : > { %1485 = vst.msk [vmem:[%s1993_s30] sm:$0xff] %vm1484_vm0, %v1474_v33  ;;  %v1466_v35 = vpop.permute.xlu1 %1465 }
 0x248   : > { %v1476_v36 = vsel %vm1473_vm15, %v1472_v34, %v1468_v32  ;;  %v1475_v37 = vsel %vm1473_vm15, %v1471_v31, %v1466_v35 }
 0x249   : > { %1488 = vst.msk [vmem:[%s1993_s30 + $0xc] sm:$0xff] %vm1484_vm0, %v1476_v36  ;;  %v1470_v38 = vpop.permute.xlu0 %1469 }
 0x24a   : > { %1487 = vst.msk [vmem:[%s1993_s30 + $0x8] sm:$0xf] %vm1486_vm1, %v1475_v37  ;;  %v1477_v39 = vsel %vm1473_vm15, %v1472_v34, %v1470_v38 }
 0x24b   : > { %1491 = vst.msk [vmem:[%s1993_s30 + $0x8] sm:$0xf] %vm1490_vm2, %v1768_v21 }
 0x24c   : > { %1489 = vst.msk [vmem:[%s1993_s30 + $0x14] sm:$0xf] %vm1486_vm1, %v1477_v39 }
 0x24d   : > { %1492 = vst.msk [vmem:[%s1993_s30 + $0x14] sm:$0xf] %vm1490_vm2, %v1768_v21 }
 0x24e PF: > { %s14_s15 = sadd.s32 1, %s1761_s15  }
 0x24f   : > { %p11_p4 = scmp.ge.s32.totalorder %s14_s15, 6  }
 0x251   :  { %13 = sbr.rel (!%p11_p4) target bundleno = 1 (0x1), region = 74 }

// kernel: resnet_forward_batched.10
= control target key start
LH: loop header
LB: loop body
LE: loop exit
PB: predicated region body
PF: predicated region fallthrough
CT: control target
= control target key end

     0   :  { %s2107_s15 = smov 0   ;;  %s2381_s0 = inlined_call_operand.vmem [shape: bf16[4,16,362], index: 0, kind: input, shape index: {}]   ;;  %s2382_s1 = inlined_call_operand.vmem [shape: bf16[9,32,16], index: 1, kind: input, shape index: {}]   ;;  %s2383_s2 = inlined_call_operand.vmem [shape: f32[32,1], index: 2, kind: input, shape index: {}]   ;;  %s2384_s3 = inlined_call_operand.vmem [shape: f32[1,324], index: 3, kind: input, shape index: {}]   ;;  %s2385_s4 = inlined_call_operand.vmem [shape: bf16[4,32,362], index: 4, kind: output, shape index: {}]  }
   0x1 LB: > { %s1729_s16 = sadd.s32 4294967295, %s2070_s15   ;;  %p1733_p0 = scmp.ge.s32.totalorder %s2070_s15, 1  ;;  %s2070_s15 = sphi %s2107_s15, %s14_s15  }
   0x2   : > { %p162_p1 = scmp.lt.s32.totalorder %s2070_s15, 5 }
   0x4   : > { %p163_p2 = pnand %p1733_p0, %p162_p1 }
   0x5   : > { %p188_p3 = scmp.lt.s32.totalorder (!%p163_p2), %s1729_s16, 3  ;;  %v2072_v0 = vmov (!%p163_p2), 0   ;;  %s2073_s21 = smov (!%p163_p2), 127   ;;  %vm241_vm0 = vcmask (!%p163_p2), 1039360   ;;  %v2046_v10 = vld [vmem:[%s2382_s1 + $0x10] sm:$0xff] (!%p163_p2)   ;;  %vm498_vm1 = vcmask (!%p163_p2), 1031168  }
   0x6   : > { %166 = sbr.rel (%p163_p2) target bundleno = 611 (0x263), region = 36  ;;  %286 = vmatprep.mubr.bf16.mxu1 (!%p163_p2), %v2072_v0  ;;  %542 = vmatprep.mubr.bf16.mxu0 (!%p163_p2), %v2072_v0  ;;  %s2074_s22 = smov (!%p163_p2), 126   ;;  %v1506_v11 = vld [vmem:[%s2383_s2] sm:$0xff] (!%p163_p2)  ;;  %v1507_v12 = vld [vmem:[%s2383_s2 + $0x8] sm:$0xff] (!%p163_p2)  ;;  %vm247_vm2 = vcmask (!%p163_p2), 130048   ;;  %vm645_vm3 = vcmask (!%p163_p2), 900096  }
   0x7   : > { %2040 = vset.pattern.permute.xlu0 (!%p163_p2), %v2072_v0  ;;  %2041 = vset.pattern.permute.xlu1 (!%p163_p2), %v2072_v0  ;;  %s2075_s23 = smov (!%p163_p2), 110   ;;  %s2076_s24 = smov (!%p163_p2), 109   ;;  %v2171_v17 = vld [vmem:[%s2382_s1 + $0x20] sm:$0xff] (!%p163_p2)   ;;  %v1508_v18 = vld [vmem:[%s2383_s2 + $0x10] sm:$0xff] (!%p163_p2)  ;;  %v1509_v19 = vld [vmem:[%s2383_s2 + $0x18] sm:$0xff] (!%p163_p2)  ;;  %vm792_vm4 = vcmask (!%p163_p2), 891904  }
   0x8   : > { %s2077_s25 = smov (!%p163_p2), 108   ;;  %s2078_s26 = smov (!%p163_p2), 92   ;;  %v2048_v23 = vld [vmem:[%s2382_s1 + $0x18] sm:$0xff] (!%p163_p2)   ;;  %v2049_v27 = vld [vmem:[%s2382_s1 + $0x28] sm:$0xff] (!%p163_p2)   ;;  %v2050_v31 = vld [vmem:[%s2382_s1 + $0x30] sm:$0xff] (!%p163_p2)   ;;  %vm939_vm5 = vcmask (!%p163_p2), 883712  }
   0x9   : > { %s2079_s27 = smov (!%p163_p2), 91   ;;  %s2080_s28 = smov (!%p163_p2), 90   ;;  %v2051_v36 = vld [vmem:[%s2382_s1] sm:$0xff] (!%p163_p2)   ;;  %v2052_v37 = vld [vmem:[%s2382_s1 + $0x38] sm:$0xff] (!%p163_p2)   ;;  %v2053_v38 = vld [vmem:[%s2382_s1 + $0x8] sm:$0xff] (!%p163_p2)   ;;  %vm1086_vm6 = vcmask (!%p163_p2), 752640  }
   0xa   : > { %v2054_v40 = vld [vmem:[%s2382_s1 + $0x40] sm:$0xff] (!%p163_p2)   ;;  %v2055_v45 = vld [vmem:[%s2382_s1 + $0x48] sm:$0xff] (!%p163_p2)   ;;  %v2056_v47 = vld [vmem:[%s2382_s1 + $0x50] sm:$0xff] (!%p163_p2)   ;;  %vm1233_vm7 = vcmask (!%p163_p2), 744448   ;;  %vm1380_vm8 = vcmask (!%p163_p2), 736256   ;;  %vm1583_vm9 = vcmask (!%p163_p2), 150528  }
   0xb   : > { %v2057_v52 = vld [vmem:[%s2382_s1 + $0x58] sm:$0xff] (!%p163_p2)   ;;  %v2058_v54 = vld [vmem:[%s2382_s1 + $0x60] sm:$0xff] (!%p163_p2)   ;;  %v2059_v59 = vld [vmem:[%s2382_s1 + $0x68] sm:$0xff] (!%p163_p2)   ;;  %s2081_s30 = smov (!%p163_p2), 19   ;;  %vm1657_vm10 = vcmask (!%p163_p2), 1043608   ;;  %vm1658_vm11 = vcmask (!%p163_p2), 1047556  }
   0xc   : > { %v2060_v61 = vld [vmem:[%s2382_s1 + $0x70] sm:$0xff] (!%p163_p2)   ;;  %v2061_v63 = vld [vmem:[%s2382_s1 + $0x78] sm:$0xff] (!%p163_p2)   ;;  %vm1640_vm12 = vcmask (!%p163_p2), 154624   ;;  %vm1659_vm13 = vmor (!%p163_p2), %vm1658_vm11, %vm1657_vm10  ;;  %vm1661_vm14 = vcmask (!%p163_p2), 707584   ;;  %vm1669_vm15 = vcmask (!%p163_p2), 863928  }
   0xd   : > { %s2387_s16 = smov (!%p188_p3, %s1729_s16), 3 }
   0xe   : > { %s2020_s17 = smul.u32 24, %s2387_s16 }
  0x10   : > { %s192_s20 = scalar_lea.vmem %s2381_s0, %s2020_s17 }
  0x11   : > { %v2125_v1 = vld [vmem:[%s192_s20 + $0x4] ss:$12 sps:$4 sm:$0xff]   ;;  %v2127_v2 = vld [vmem:[%s192_s20] ss:$12 sps:$4 sm:$0xff]   ;;  %v2131_v3 = vld [vmem:[%s192_s20 + $0x8] ss:$12 sps:$4 sm:$0xff]  }
  0x12   : > { %237 = vrot.lane.b32.xlu0 %v2125_v1, %s2073_s21  ;;  %235 = vrot.lane.b32.xlu1 %v2127_v2, %s2073_s21 }
  0x16   : > { %239 = vrot.lane.b32.xlu0 %v2131_v3, %s2073_s21  ;;  %494 = vrot.lane.b32.xlu1 %v2125_v1, %s2074_s22 }
  0x1a   : > { %496 = vrot.lane.b32.xlu0 %v2131_v3, %s2074_s22  ;;  %492 = vrot.lane.b32.xlu1 %v2127_v2, %s2074_s22 }
  0x1e   : > { %641 = vrot.lane.b32.xlu0 %v2125_v1, %s2075_s23  ;;  %643 = vrot.lane.b32.xlu1 %v2131_v3, %s2075_s23 }
  0x22   : > { %639 = vrot.lane.b32.xlu0 %v2127_v2, %s2075_s23  ;;  %788 = vrot.lane.b32.xlu1 %v2125_v1, %s2076_s24 }
  0x26   : > { %790 = vrot.lane.b32.xlu0 %v2131_v3, %s2076_s24  ;;  %786 = vrot.lane.b32.xlu1 %v2127_v2, %s2076_s24 }
  0x2a   : > { %935 = vrot.lane.b32.xlu0 %v2125_v1, %s2077_s25  ;;  %937 = vrot.lane.b32.xlu1 %v2131_v3, %s2077_s25 }
  0x2e   : > { %933 = vrot.lane.b32.xlu0 %v2127_v2, %s2077_s25  ;;  %1082 = vrot.lane.b32.xlu1 %v2125_v1, %s2078_s26  ;;  %s2021_s25 = smul.u32 48, %s2387_s16 }
  0x32   : > { %1084 = vrot.lane.b32.xlu0 %v2131_v3, %s2078_s26  ;;  %1080 = vrot.lane.b32.xlu1 %v2127_v2, %s2078_s26 }
  0x36   : > { %1229 = vrot.lane.b32.xlu0 %v2125_v1, %s2079_s27  ;;  %1231 = vrot.lane.b32.xlu1 %v2131_v3, %s2079_s27 }
  0x3a   : > { %1227 = vrot.lane.b32.xlu0 %v2127_v2, %s2079_s27  ;;  %1376 = vrot.lane.b32.xlu1 %v2125_v1, %s2080_s28 }
  0x3e   : > { %1378 = vrot.lane.b32.xlu0 %v2131_v3, %s2080_s28  ;;  %1374 = vrot.lane.b32.xlu1 %v2127_v2, %s2080_s28  ;;  %s2320_s28 = scalar_lea.vmem %s2385_s4, %s2021_s25 }
  0x3f   : > { %1584 = vst.msk [vmem:[%s2320_s28] sm:$0xf] %vm1583_vm9, %v2072_v0  ;;  %1585 = vst.msk [vmem:[%s2320_s28 + $0xc] sm:$0xf] %vm1583_vm9, %v2072_v0 }
  0x40   : > { %1586 = vst.msk [vmem:[%s2320_s28 + $0x18] sm:$0xf] %vm1583_vm9, %v2072_v0  ;;  %1587 = vst.msk [vmem:[%s2320_s28 + $0x24] sm:$0xf] %vm1583_vm9, %v2072_v0 }
  0x42   : > { %1512 = vperm.xlu0 %2040, %v1506_v11   ;;  %1517 = vperm.xlu1 %2041, %v1507_v12   ;;  %v1556_v11 = vlaneseq }
  0x44   : > { %v2330_v12 = vshrl.u32 %v1556_v11, 7 }
  0x46   : > { %1522 = vperm.xlu1 %2041, %v1508_v18   ;;  %1527 = vperm.xlu0 %2040, %v1509_v19  }
  0x84   : > { %v238_v4 = vpop.permute.xlu0 %237  ;;  %v236_v5 = vpop.permute.xlu1 %235 }
  0x85   : > { %v242_v9 = vsel %vm241_vm0, %v236_v5, %v238_v4 }
  0x88   : > { %v240_v6 = vpop.permute.xlu0 %239  ;;  %v495_v7 = vpop.permute.xlu1 %494 }
  0x89   : > { %v243_v8 = vsel %vm241_vm0, %v238_v4, %v240_v6 }
  0x8a   : > { %254 = vmatprep.subr.bf16.mxu1 %v243_v8 }
  0x8b   : > { %255 = vmatpush1.bf16.msra.mxu1 %v242_v9 }
  0x8c   : > { %v2164_v13 = vpop.permute.xlu0 %496  ;;  %1870 = vmatprep.subr.bf16.mxu1 %v240_v6  ;;  %v493_v14 = vpop.permute.xlu1 %492 }
  0x8d   : > { %v500_v15 = vsel %vm498_vm1, %v495_v7, %v2164_v13  ;;  %v499_v16 = vsel %vm498_vm1, %v493_v14, %v495_v7 }
  0x8e   : > { %1745 = vmatmul.mubr.msk.bf16.vlgmr.msra.gmra.mrb[0].mxu1 %vm247_vm2, %v2046_v10  ;;  %510 = vmatprep.subr.bf16.mxu0 %v500_v15 }
  0x8f   : > { %1871 = vmatpush3.bf16.msra.mxu1 %v240_v6  ;;  %511 = vmatpush1.bf16.msra.mxu0 %v499_v16  ;;  %v1554_v16 = vld [vmem:[%s2384_s3] sm:$0x7] }
  0x90   : > { %v642_v20 = vpop.permute.xlu0 %641  ;;  %296 = vmatprep.mubr.bf16.mxu1 %v2072_v0  ;;  %v2180_v21 = vpop.permute.xlu1 %643  ;;  %375 = vmatprep.subr.bf16.mxu1 %v2125_v1  ;;  %v2062_v1 = vld [vmem:[%s2382_s1 + $0x80] sm:$0xff]  }
  0x91   : > { %v647_v22 = vsel %vm645_vm3, %v642_v20, %v2180_v21 }
  0x92   : > { %1761 = vmatmul.mubr.msk.bf16.vlgmr.msra.gmra.mrb[0].mxu0 %vm247_vm2, %v2171_v17  ;;  %657 = vmatprep.subr.bf16.mxu0 %v647_v22 }
  0x93   : > { %552 = vmatprep.mubr.bf16.mxu0 %v2072_v0 }
  0x94   : > { %v640_v24 = vpop.permute.xlu0 %639  ;;  %v789_v25 = vpop.permute.xlu1 %788 }
  0x95   : > { %v646_v26 = vsel %vm645_vm3, %v640_v24, %v642_v20 }
  0x96   : > { %1746 = vmatmul.mubr.msk.bf16.gmra.mrb[4].mxu1 %vm247_vm2, %v2048_v23  ;;  %658 = vmatpush1.bf16.msra.mxu0 %v646_v26 }
  0x97   : > { %1872 = vmatprep.mubr.msk.bf16.mxu1 %vm247_vm2, %v2046_v10 }
  0x98   : > { %v2197_v28 = vpop.permute.xlu0 %790  ;;  %v787_v30 = vpop.permute.xlu1 %786 }
  0x99   : > { %v794_v29 = vsel %vm792_vm4, %v789_v25, %v2197_v28  ;;  %v793_v33 = vsel %vm792_vm4, %v787_v30, %v789_v25 }
  0x9a   : > { %1762 = vmatmul.mubr.msk.bf16.gmra.mrb[4].mxu0 %vm247_vm2, %v2049_v27  ;;  %804 = vmatprep.subr.bf16.mxu0 %v794_v29 }
  0x9b   : > { %689 = vmatprep.mubr.bf16.mxu0 %v2072_v0 }
  0x9c   : > { %v2206_v32 = vpop.permute.xlu1 %937  ;;  %v936_v34 = vpop.permute.xlu0 %935 }
  0x9d   : > { %v941_v35 = vsel %vm939_vm5, %v936_v34, %v2206_v32 }
  0x9e   : > { %1873 = vmatmul.mubr.msk.bf16.vlgmr.msra.gmra.mrb[8].mxu1 %vm247_vm2, %v2048_v23 }
  0x9f   : > { %376 = vmatpush1.bf16.msra.mxu1 %v2127_v2  ;;  %407 = vmatprep.mubr.bf16.mxu1 %v2072_v0  ;;  %v2063_v2 = vld [vmem:[%s2382_s1 + $0x88] sm:$0xff]  }
  0xa0   : > { %1876 = vmatprep.subr.bf16.mxu1 %v2131_v3  ;;  %v934_v39 = vpop.permute.xlu0 %933  ;;  %v1083_v43 = vpop.permute.xlu1 %1082 }
  0xa1   : > { %v940_v42 = vsel %vm939_vm5, %v934_v39, %v936_v34 }
  0xa2   : > { %1771 = vmatmul.mubr.msk.bf16.vlgmr.msra.gmra.mrb[0].mxu0 %vm247_vm2, %v2050_v31 }
  0xa3   : > { %699 = vmatprep.mubr.bf16.mxu0 %v2072_v0  ;;  %805 = vmatpush1.bf16.msra.mxu0 %v793_v33 }
  0xa4   : > { %951 = vmatprep.subr.bf16.mxu0 %v941_v35  ;;  %v2234_v41 = vpop.permute.xlu0 %1084  ;;  %v1081_v46 = vpop.permute.xlu1 %1080 }
  0xa5   : > { %v1088_v44 = vsel %vm1086_vm6, %v1083_v43, %v2234_v41  ;;  %v1087_v49 = vsel %vm1086_vm6, %v1081_v46, %v1083_v43 }
  0xa6   : > { %1751 = vmatmul.mubr.msk.bf16.vlgmr.msra.gmra.mrb[0].mxu1 %vm247_vm2, %v2051_v36 }
  0xa7   : > { %1877 = vmatpush3.bf16.msra.mxu1 %v2131_v3  ;;  %417 = vmatprep.mubr.bf16.mxu1 %v2072_v0 }
  0xa8   : > { %1882 = vmatprep.subr.bf16.mxu1 %v2164_v13  ;;  %v1232_v48 = vpop.permute.xlu1 %1231  ;;  %v1230_v50 = vpop.permute.xlu0 %1229 }
  0xa9   : > { %v1235_v51 = vsel %vm1233_vm7, %v1230_v50, %v1232_v48 }
  0xaa   : > { %1772 = vmatmul.mubr.msk.bf16.gmra.mrb[4].mxu0 %vm247_vm2, %v2052_v37 }
  0xab   : > { %836 = vmatprep.mubr.bf16.mxu0 %v2072_v0 }
  0xac   : > { %v1228_v53 = vpop.permute.xlu0 %1227  ;;  %v1377_v57 = vpop.permute.xlu1 %1376 }
  0xad   : > { %v1234_v56 = vsel %vm1233_vm7, %v1228_v53, %v1230_v50 }
  0xae   : > { %1752 = vmatmul.mubr.msk.bf16.gmra.mrb[4].mxu1 %vm247_vm2, %v2053_v38 }
  0xaf   : > { %1878 = vmatprep.mubr.msk.bf16.mxu1 %vm247_vm2, %v2051_v36 }
  0xb0   : > { %v1379_v55 = vpop.permute.xlu0 %1378  ;;  %v1375_v60 = vpop.permute.xlu1 %1374 }
  0xb1   : > { %v1382_v58 = vsel %vm1380_vm8, %v1377_v57, %v1379_v55  ;;  %v1381_v62 = vsel %vm1380_vm8, %v1375_v60, %v1377_v57 }
  0xb2   : > { %1781 = vmatmul.mubr.msk.bf16.vlgmr.msra.gmra.mrb[0].mxu0 %vm247_vm2, %v2054_v40 }
  0xb3   : > { %846 = vmatprep.mubr.bf16.mxu0 %v2072_v0  ;;  %952 = vmatpush1.bf16.msra.mxu0 %v940_v42 }
  0xb4   : > { %1098 = vmatprep.subr.bf16.mxu0 %v1088_v44 }
  0xb6   : > { %1879 = vmatmul.mubr.msk.bf16.vlgmr.msra.gmra.mrb[8].mxu1 %vm247_vm2, %v2053_v38 }
  0xb7   : > { %1883 = vmatpush3.bf16.msra.mxu1 %v2164_v13  ;;  %1884 = vmatprep.mubr.msk.bf16.mxu1 %vm247_vm2, %v2171_v17  ;;  %v1558_v13 = vsub.s32 0, %v2330_v12  ;;  %v1562_v17 = vsub.s32 1, %v2330_v12 }
  0xb8   : > { %1888 = vmatprep.subr.bf16.mxu1 %v2180_v21 }
  0xb9   : > { %v1559_v26 = vrot.slane %v1554_v16, %v1558_v13  ;;  %v1563_v29 = vrot.slane %v1554_v16, %v1562_v17 }
  0xba   : > { %1782 = vmatmul.mubr.msk.bf16.gmra.mrb[4].mxu0 %vm247_vm2, %v2055_v45 }
  0xbb   : > { %983 = vmatprep.mubr.bf16.mxu0 %v2072_v0 }
  0xc1   : > { %v1513_v15 = vpop.permute.xlu0 %1512  ;;  %v1518_v22 = vpop.permute.xlu1 %1517 }
  0xc2   : > { %1885 = vmatmul.mubr.msk.bf16.vlgmr.msra.gmra.mrb[8].mxu1 %vm247_vm2, %v2049_v27  ;;  %1791 = vmatmul.mubr.msk.bf16.vlgmr.msra.gmra.mrb[0].mxu0 %vm247_vm2, %v2056_v47 }
  0xc3   : > { %1889 = vmatpush3.bf16.msra.mxu1 %v2180_v21  ;;  %993 = vmatprep.mubr.bf16.mxu0 %v2072_v0 }
  0xc4   : > { %1894 = vmatprep.subr.bf16.mxu1 %v2197_v28  ;;  %1099 = vmatpush1.bf16.msra.mxu0 %v1087_v49 }
  0xc5   : > { %1890 = vmatprep.mubr.msk.bf16.mxu1 %vm247_vm2, %v2050_v31  ;;  %1245 = vmatprep.subr.bf16.mxu0 %v1235_v51  ;;  %v1523_v38 = vpop.permute.xlu1 %1522 }
  0xca   : > { %1792 = vmatmul.mubr.msk.bf16.gmra.mrb[4].mxu0 %vm247_vm2, %v2057_v52 }
  0xcb   : > { %1130 = vmatprep.mubr.bf16.mxu0 %v2072_v0 }
  0xce   : > { %1891 = vmatmul.mubr.msk.bf16.vlgmr.msra.gmra.mrb[8].mxu1 %vm247_vm2, %v2052_v37 }
  0xcf   : > { %1895 = vmatpush3.bf16.msra.mxu1 %v2197_v28  ;;  %1896 = vmatprep.mubr.msk.bf16.mxu1 %vm247_vm2, %v2054_v40 }
  0xd0   : > { %1900 = vmatprep.subr.bf16.mxu1 %v2206_v32 }
  0xd2   : > { %1801 = vmatmul.mubr.msk.bf16.vlgmr.msra.gmra.mrb[0].mxu0 %vm247_vm2, %v2058_v54 }
  0xd3   : > { %1140 = vmatprep.mubr.bf16.mxu0 %v2072_v0  ;;  %1246 = vmatpush1.bf16.msra.mxu0 %v1234_v56 }
  0xd4   : > { %1392 = vmatprep.subr.bf16.mxu0 %v1382_v58 }
  0xda   : > { %1897 = vmatmul.mubr.msk.bf16.vlgmr.msra.gmra.mrb[8].mxu1 %vm247_vm2, %v2055_v45  ;;  %1802 = vmatmul.mubr.msk.bf16.gmra.mrb[4].mxu0 %vm247_vm2, %v2059_v59  ;;  %v1528_v45 = vpop.permute.xlu0 %1527 }
  0xdb   : > { %1901 = vmatpush3.bf16.msra.mxu1 %v2206_v32  ;;  %1277 = vmatprep.mubr.bf16.mxu0 %v2072_v0 }
  0xdc   : > { %1906 = vmatprep.subr.bf16.mxu1 %v2234_v41  ;;  %1902 = vmatprep.mubr.msk.bf16.mxu1 %vm247_vm2, %v2056_v47 }
  0xe2   : > { %1811 = vmatmul.mubr.msk.bf16.vlgmr.msra.gmra.mrb[0].mxu0 %vm247_vm2, %v2060_v61 }
  0xe3   : > { %1287 = vmatprep.mubr.bf16.mxu0 %v2072_v0  ;;  %1393 = vmatpush1.bf16.msra.mxu0 %v1381_v62 }
  0xe6   : > { %1903 = vmatmul.mubr.msk.bf16.vlgmr.msra.gmra.mrb[8].mxu1 %vm247_vm2, %v2057_v52 }
  0xe7   : > { %1907 = vmatpush3.bf16.msra.mxu1 %v2234_v41  ;;  %1908 = vmatprep.mubr.msk.bf16.mxu1 %vm247_vm2, %v2058_v54 }
  0xe8   : > { %1912 = vmatprep.subr.bf16.mxu1 %v1232_v48 }
  0xea   : > { %1812 = vmatmul.mubr.msk.bf16.gmra.mrb[4].mxu0 %vm247_vm2, %v2061_v63 }
  0xeb   : > { %1424 = vmatprep.mubr.bf16.mxu0 %v2072_v0 }
  0xf2   : > { %1909 = vmatmul.mubr.msk.bf16.vlgmr.msra.gmra.mrb[8].mxu1 %vm247_vm2, %v2059_v59  ;;  %1821 = vmatmul.mubr.msk.bf16.vlgmr.msra.gmra.mrb[0].mxu0 %vm247_vm2, %v2062_v1 }
  0xf3   : > { %1913 = vmatpush3.bf16.msra.mxu1 %v1232_v48  ;;  %1434 = vmatprep.mubr.bf16.mxu0 %v2072_v0 }
  0xf4   : > { %1918 = vmatprep.subr.bf16.mxu1 %v1379_v55  ;;  %1914 = vmatprep.mubr.msk.bf16.mxu1 %vm247_vm2, %v2060_v61 }
  0xfa   : > { %1822 = vmatmul.mubr.msk.bf16.gmra.mrb[4].mxu0 %vm247_vm2, %v2063_v2 }
  0xfe   : > { %1915 = vmatmul.mubr.msk.bf16.vlgmr.msra.gmra.mrb[8].mxu1 %vm247_vm2, %v2061_v63 }
  0xff   : > { %1919 = vmatpush3.bf16.msra.mxu1 %v1379_v55  ;;  %1920 = vmatprep.mubr.msk.bf16.mxu1 %vm247_vm2, %v2062_v1 }
 0x10a   : > { %1921 = vmatmul.mubr.msk.bf16.vlgmr.msra.gmra.mrb[8].mxu1 %vm247_vm2, %v2063_v2 }
 0x179   : > { %v409_v3 = vpop.f32.mrb[0].mxu1 }
 0x17a   : > { %v411_v4 = vpop.f32.mrb[1].mxu1 }
 0x17b   : > { %v413_v5 = vpop.f32.mrb[2].mxu1 }
 0x17c   : > { %v415_v6 = vpop.f32.mrb[3].mxu1 }
 0x181   : > { %v419_v7 = vpop.f32.mrb[4].mxu1 }
 0x182   : > { %v421_v8 = vpop.f32.mrb[5].mxu1 }
 0x183   : > { %v423_v9 = vpop.f32.mrb[6].mxu1 }
 0x184   : > { %v425_v10 = vpop.f32.mrb[7].mxu1 }
 0x1c5   : > { %v1426_v14 = vpop.f32.mrb[0].mxu0 }
 0x1c6   : > { %v1924_v18 = vadd.f32 %v1426_v14, %v409_v3  ;;  %v1428_v19 = vpop.f32.mrb[1].mxu0  ;;  %v1566_v3 = vsub.s32 2, %v2330_v12 }
 0x1c7   : > { %v1925_v20 = vadd.f32 %v1428_v19, %v411_v4  ;;  %v1430_v21 = vpop.f32.mrb[2].mxu0 }
 0x1c8   : > { %v1530_v23 = vadd.f32 %v1924_v18, %v1513_v15  ;;  %v1926_v24 = vadd.f32 %v1430_v21, %v413_v5  ;;  %v1432_v25 = vpop.f32.mrb[3].mxu0 }
 0x1c9   : > { %v1531_v27 = vadd.f32 %v1925_v20, %v1513_v15  ;;  %v1927_v28 = vadd.f32 %v1432_v25, %v415_v6 }
 0x1ca   : > { %v1542_v30 = vmax.f32 %v1530_v23, 0.0  ;;  %v1533_v31 = vadd.f32 %v1926_v24, %v1518_v22 }
 0x1cb   : > { %v1543_v32 = vmax.f32 %v1531_v27, 0.0  ;;  %v1534_v33 = vadd.f32 %v1927_v28, %v1518_v22 }
 0x1cc   : > { %v1545_v34 = vmax.f32 %v1533_v31, 0.0  ;;  %v1571_v35 = vmul.f32 %v1559_v26, %v1542_v30 }
 0x1cd   : > { %v1546_v36 = vmax.f32 %v1534_v33, 0.0  ;;  %v1436_v37 = vpop.f32.mrb[4].mxu0  ;;  %v1572_v39 = vmul.f32 %v1563_v29, %v1543_v32 }
 0x1ce   : > { %v1928_v40 = vadd.f32 %v1436_v37, %v419_v7  ;;  %v1438_v41 = vpop.f32.mrb[5].mxu0  ;;  %v1574_v42 = vmul.f32 %v1559_v26, %v1545_v34  ;;  %v1567_v7 = vrot.slane %v1554_v16, %v1566_v3 }
 0x1cf   : > { %v1929_v43 = vadd.f32 %v1438_v41, %v421_v8  ;;  %v1440_v44 = vpop.f32.mrb[6].mxu0  ;;  %v1835_v46 = vpack.c.bf16 %v1572_v39, %v1571_v35  ;;  %v1575_v47 = vmul.f32 %v1563_v29, %v1546_v36 }
 0x1d0   : > { %v1930_v48 = vadd.f32 %v1440_v44, %v423_v9  ;;  %v1536_v49 = vadd.f32 %v1928_v40, %v1523_v38  ;;  %v1442_v50 = vpop.f32.mrb[7].mxu0 }
 0x1d1   : > { %v1537_v51 = vadd.f32 %v1929_v43, %v1523_v38  ;;  %v1931_v52 = vadd.f32 %v1442_v50, %v425_v10  ;;  %1620 = vrot.lane.b32.xlu1 %v1835_v46, %s2081_s30  ;;  %v1837_v53 = vpack.c.bf16 %v1575_v47, %v1574_v42 }
 0x1d2   : > { %v1548_v54 = vmax.f32 %v1536_v49, 0.0  ;;  %v1539_v55 = vadd.f32 %v1930_v48, %v1528_v45 }
 0x1d3   : > { %v1549_v56 = vmax.f32 %v1537_v51, 0.0  ;;  %v1540_v57 = vadd.f32 %v1931_v52, %v1528_v45  ;;  %1624 = vrot.lane.b32.xlu0 %v1837_v53, %s2081_s30 }
 0x1d4   : > { %v1551_v58 = vmax.f32 %v1539_v55, 0.0  ;;  %v1577_v59 = vmul.f32 %v1559_v26, %v1548_v54 }
 0x1d5   : > { %v1552_v60 = vmax.f32 %v1540_v57, 0.0  ;;  %v1578_v61 = vmul.f32 %v1563_v29, %v1549_v56 }
 0x1d6   : > { %v1580_v62 = vmul.f32 %v1559_v26, %v1551_v58 }
 0x1d7   : > { %v1839_v63 = vpack.c.bf16 %v1578_v61, %v1577_v59  ;;  %v1581_v1 = vmul.f32 %v1563_v29, %v1552_v60 }
 0x1d9   : > { %1628 = vrot.lane.b32.xlu1 %v1839_v63, %s2081_s30  ;;  %v1841_v2 = vpack.c.bf16 %v1581_v1, %v1580_v62 }
 0x1db   : > { %1632 = vrot.lane.b32.xlu0 %v1841_v2, %s2081_s30 }
 0x1dd   : > { %v1922_v4 = vpop.f32.mrb[8].mxu1 }
 0x1de   : > { %v1538_v5 = vadd.f32 %v1922_v4, %v1523_v38  ;;  %v1479_v6 = vpop.f32.mrb[9].mxu1 }
 0x1df   : > { %v1532_v8 = vadd.f32 %v1513_v15, %v1479_v6  ;;  %v1923_v9 = vpop.f32.mrb[10].mxu1 }
 0x1e0   : > { %v1541_v10 = vadd.f32 %v1923_v9, %v1528_v45  ;;  %v1482_v11 = vpop.f32.mrb[11].mxu1  ;;  %v1550_v13 = vmax.f32 %v1538_v5, 0.0 }
 0x1e1   : > { %v1544_v14 = vmax.f32 %v1532_v8, 0.0  ;;  %v1535_v17 = vadd.f32 %v1518_v22, %v1482_v11 }
 0x1e2   : > { %v1553_v19 = vmax.f32 %v1541_v10, 0.0  ;;  %v1579_v21 = vmul.f32 %v1567_v7, %v1550_v13 }
 0x1e3   : > { %v1573_v18 = vmul.f32 %v1567_v7, %v1544_v14  ;;  %v1547_v20 = vmax.f32 %v1535_v17, 0.0 }
 0x1e4   : > { %v1582_v25 = vmul.f32 %v1567_v7, %v1553_v19  ;;  %v1840_v12 = vpack.c.bf16 %v1579_v21, %v1579_v21 }
 0x1e5   : > { %v1836_v23 = vpack.c.bf16 %v1573_v18, %v1573_v18  ;;  %v1576_v24 = vmul.f32 %v1567_v7, %v1547_v20 }
 0x1e6   : > { %v1842_v15 = vpack.c.bf16 %v1582_v25, %v1582_v25 }
 0x1e7   : > { %v1838_v26 = vpack.c.bf16 %v1576_v24, %v1576_v24  ;;  %1622 = vrot.lane.b32.xlu1 %v1836_v23, %s2081_s30 }
 0x1e9   : > { %1626 = vrot.lane.b32.xlu0 %v1838_v26, %s2081_s30 }
 0x1eb   : > { %1630 = vrot.lane.b32.xlu1 %v1840_v12, %s2081_s30 }
 0x1ed   : > { %1634 = vrot.lane.b32.xlu0 %v1842_v15, %s2081_s30 }
 0x243   : > { %v1621_v16 = vpop.permute.xlu1 %1620 }
 0x244   : > { %v1636_v22 = vrot.slane %v1621_v16, 4 }
 0x245   : > { %v1625_v27 = vpop.permute.xlu0 %1624 }
 0x246   : > { %v1641_v28 = vsel %vm1640_vm12, %v1636_v22, %v1621_v16  ;;  %v1637_v29 = vrot.slane %v1625_v27, 4 }
 0x247   : > { %1660 = vst.msk [vmem:[%s2320_s28] sm:$0xff] %vm1659_vm13, %v1641_v28 }
 0x248   : > { %v1643_v30 = vsel %vm1640_vm12, %v1637_v29, %v1625_v27 }
 0x249   : > { %1663 = vst.msk [vmem:[%s2320_s28 + $0xc] sm:$0xff] %vm1659_vm13, %v1643_v30 }
 0x24b   : > { %v1629_v31 = vpop.permute.xlu1 %1628 }
 0x24c   : > { %v1638_v32 = vrot.slane %v1629_v31, 4 }
 0x24d   : > { %v1633_v33 = vpop.permute.xlu0 %1632 }
 0x24e   : > { %v1645_v34 = vsel %vm1640_vm12, %v1638_v32, %v1629_v31  ;;  %v1639_v35 = vrot.slane %v1633_v33, 4 }
 0x24f   : > { %1665 = vst.msk [vmem:[%s2320_s28 + $0x18] sm:$0xff] %vm1659_vm13, %v1645_v34 }
 0x250   : > { %v1647_v36 = vsel %vm1640_vm12, %v1639_v35, %v1633_v33 }
 0x251   : > { %1667 = vst.msk [vmem:[%s2320_s28 + $0x24] sm:$0xff] %vm1659_vm13, %v1647_v36 }
 0x259   : > { %v1623_v37 = vpop.permute.xlu1 %1622 }
 0x25a   : > { %v1642_v38 = vsel %vm1640_vm12, %v1636_v22, %v1623_v37 }
 0x25b   : > { %1662 = vst.msk [vmem:[%s2320_s28 + $0x8] sm:$0xf] %vm1661_vm14, %v1642_v38  ;;  %v1627_v39 = vpop.permute.xlu0 %1626 }
 0x25c   : > { %1670 = vst.msk [vmem:[%s2320_s28 + $0x8] sm:$0xf] %vm1669_vm15, %v2072_v0  ;;  %v1644_v40 = vsel %vm1640_vm12, %v1637_v29, %v1627_v39 }
 0x25d   : > { %1664 = vst.msk [vmem:[%s2320_s28 + $0x14] sm:$0xf] %vm1661_vm14, %v1644_v40  ;;  %v1631_v41 = vpop.permute.xlu1 %1630 }
 0x25e   : > { %1671 = vst.msk [vmem:[%s2320_s28 + $0x14] sm:$0xf] %vm1669_vm15, %v2072_v0  ;;  %v1646_v42 = vsel %vm1640_vm12, %v1638_v32, %v1631_v41 }
 0x25f   : > { %1666 = vst.msk [vmem:[%s2320_s28 + $0x20] sm:$0xf] %vm1661_vm14, %v1646_v42  ;;  %v1635_v43 = vpop.permute.xlu0 %1634 }
 0x260   : > { %1672 = vst.msk [vmem:[%s2320_s28 + $0x20] sm:$0xf] %vm1669_vm15, %v2072_v0  ;;  %v1648_v44 = vsel %vm1640_vm12, %v1639_v35, %v1635_v43 }
 0x261   : > { %1668 = vst.msk [vmem:[%s2320_s28 + $0x2c] sm:$0xf] %vm1661_vm14, %v1648_v44 }
 0x262   : > { %1673 = vst.msk [vmem:[%s2320_s28 + $0x2c] sm:$0xf] %vm1669_vm15, %v2072_v0 }
 0x263 PF: > { %s14_s15 = sadd.s32 1, %s2070_s15  }
 0x264   : > { %p11_p4 = scmp.ge.s32.totalorder %s14_s15, 6  }
 0x266   :  { %13 = sbr.rel (!%p11_p4) target bundleno = 1 (0x1), region = 74 }

// kernel: resnet_forward_batched.13
= control target key start
LH: loop header
LB: loop body
LE: loop exit
PB: predicated region body
PF: predicated region fallthrough
CT: control target
= control target key end

     0   :  { %vm56_vm0 = vcmask 998400   ;;  %s763_s0 = inlined_call_operand.vmem [shape: bf16[4,32,122], index: 0, kind: input, shape index: {}]   ;;  %s764_s1 = inlined_call_operand.vmem [shape: f32[2,4], index: 1, kind: input, shape index: {}]   ;;  %s765_s2 = inlined_call_operand.vmem [shape: f32[32,16], index: 2, kind: input, shape index: {}]   ;;  %s766_s3 = inlined_call_operand.vmem [shape: f32[1,16], index: 3, kind: input, shape index: {}]   ;;  %s767_s4 = inlined_call_operand.vmem [shape: f32[16,2], index: 4, kind: input, shape index: {}]   ;;  %s768_s5 = inlined_call_operand.vmem [shape: f32[1,2], index: 5, kind: input, shape index: {}]   ;;  %s769_s6 = inlined_call_operand.hbm [shape: f32[2,2], index: 6, kind: output, shape index: {}]  }
   0x1   :  { %v539_v0 = vld [vmem:[%s763_s0 + $0x10] sm:$0xff]   ;;  %v507_v1 = vld [vmem:[%s763_s0] sm:$0xff]   ;;  %v540_v6 = vld [vmem:[%s763_s0 + $0x18] sm:$0xff]  }
   0x2   :  { %v516_v2 = vunpack.c.l.bf16 %v539_v0  ;;  %v508_v3 = vunpack.c.l.bf16 %v507_v1  ;;  %v517_v4 = vunpack.c.h.bf16 %v539_v0  ;;  %v509_v5 = vunpack.c.h.bf16 %v507_v1  ;;  %v538_v7 = vld [vmem:[%s763_s0 + $0x8] sm:$0xff]  }
   0x3   :  { %11 = vsyncpa [#allocation3], 0  ;;  %v520_v12 = vunpack.c.l.bf16 %v540_v6  ;;  %v512_v13 = vunpack.c.l.bf16 %v538_v7  ;;  %v541_v14 = vld [vmem:[%s763_s0 + $0x20] sm:$0xff]   ;;  %v521_v21 = vunpack.c.h.bf16 %v540_v6  ;;  %v513_v22 = vunpack.c.h.bf16 %v538_v7  ;;  %v543_v23 = vld [vmem:[%s763_s0 + $0x30] sm:$0xff]  }
   0x4   :  { %v69_v8 = vsel %vm56_vm0, %v516_v2, 0.0  ;;  %v57_v9 = vsel %vm56_vm0, %v508_v3, 0.0  ;;  %v72_v10 = vsel %vm56_vm0, %v517_v4, 0.0  ;;  %v60_v11 = vsel %vm56_vm0, %v509_v5, 0.0  ;;  %v542_v24 = vld [vmem:[%s763_s0 + $0x28] sm:$0xff]   ;;  %v544_v33 = vld [vmem:[%s763_s0 + $0x38] sm:$0xff]  }
   0x5   :  { %70 = vadd.xlane.f32.xlu1 %v69_v8  ;;  %58 = vadd.xlane.f32.xlu0 %v57_v9  ;;  %v75_v15 = vsel %vm56_vm0, %v520_v12, 0.0  ;;  %v63_v16 = vsel %vm56_vm0, %v512_v13, 0.0  ;;  %v525_v17 = vunpack.c.h.bf16 %v541_v14  ;;  %v524_v18 = vunpack.c.l.bf16 %v541_v14  ;;  %v305_v41 = vld [vmem:[%s765_s2] sm:$0xff]  ;;  %v306_v42 = vld [vmem:[%s765_s2 + $0x8] sm:$0xff]  ;;  %v307_v43 = vld [vmem:[%s765_s2 + $0x10] sm:$0xff] }
   0x6   :  { %v78_v25 = vsel %vm56_vm0, %v521_v21, 0.0  ;;  %v66_v26 = vsel %vm56_vm0, %v513_v22, 0.0  ;;  %v532_v27 = vunpack.c.l.bf16 %v543_v23  ;;  %v528_v28 = vunpack.c.l.bf16 %v542_v24  ;;  %v308_v46 = vld [vmem:[%s765_s2 + $0x18] sm:$0xff] }
   0x7   :  { %v84_v19 = vsel %vm56_vm0, %v525_v17, 0.0  ;;  %v81_v20 = vsel %vm56_vm0, %v524_v18, 0.0  ;;  %v529_v31 = vunpack.c.h.bf16 %v542_v24  ;;  %v533_v32 = vunpack.c.h.bf16 %v543_v23 }
   0x8   :  { %v93_v29 = vsel %vm56_vm0, %v532_v27, 0.0  ;;  %v87_v30 = vsel %vm56_vm0, %v528_v28, 0.0  ;;  %v536_v36 = vunpack.c.l.bf16 %v544_v33  ;;  %v537_v37 = vunpack.c.h.bf16 %v544_v33 }
   0x9   :  { %73 = vadd.xlane.f32.xlu1 %v72_v10  ;;  %61 = vadd.xlane.f32.xlu0 %v60_v11  ;;  %v90_v34 = vsel %vm56_vm0, %v529_v31, 0.0  ;;  %v96_v35 = vsel %vm56_vm0, %v533_v32, 0.0  ;;  %v619_v40 = vmov 0.0   ;;  %vm620_vm1 = vmmov 0  }
   0xa   :  { %v99_v38 = vsel %vm56_vm0, %v536_v36, 0.0  ;;  %v102_v39 = vsel %vm56_vm0, %v537_v37, 0.0  ;;  %555 = vmatprep.subr.mxu0 %v619_v40  ;;  %557 = vmatprep.mubr.msk.f32.mxu0 %vm620_vm1, %v619_v40  ;;  %v621_v44 = vmov 0.0|0.0   ;;  %v579_v45 = vpack.c.bf16 %v306_v42, %v305_v41 }
   0xb   :  { %568 = vmatprep.mubr.msk.f32.mxu1 %vm620_vm1, %v619_v40  ;;  %578 = vmatprep.subr.bf16.mxu1 %v621_v44  ;;  %v582_v47 = vpack.c.bf16 %v308_v46, %v307_v43  ;;  %v138_v54 = vlaneseq  ;;  %vm149_vm2 = vcmask 130112   ;;  %vm156_vm3 = vcmask 195712  }
   0xc   :  { %580 = vmatpush3.bf16.msra.mxu1 %v579_v45  ;;  %vm163_vm4 = vcmask 261312   ;;  %vm222_vm5 = vcmask 1041409   ;;  %vm224_vm6 = vcmask 1042434   ;;  %vm226_vm7 = vcmask 1043459  }
   0xd   :  { %76 = vadd.xlane.f32.xlu1 %v75_v15  ;;  %64 = vadd.xlane.f32.xlu0 %v63_v16  ;;  %v139_v57 = vand.u32 127, %v138_v54  ;;  %v141_v58 = vshrl.u32 %v138_v54, 7  ;;  %vm232_vm8 = vcmask 1043456   ;;  %vm228_vm9 = vcmask 31744  }
   0xe   :  { %581 = vmatprep.subr.bf16.mxu1 %v621_v44  ;;  %vm316_vm10 = vcmask 261120   ;;  %vm399_vm11 = vcmask 130048   ;;  %vm473_vm12 = vcmask 9216  }
   0xf   :  { %v144_v59 = vadd.s32 4294967288, %v139_v57  ;;  %v151_v60 = vadd.s32 4294967280, %v139_v57  ;;  %v142_v63 = vsub.s32 %v139_v57, %v141_v58  ;;  %v158_v0 = vadd.s32 4294967272, %v139_v57 }
  0x10   :  { %583 = vmatpush3.bf16.msra.mxu1 %v582_v47 }
  0x11   :  { %85 = vadd.xlane.f32.xlu1 %v84_v19  ;;  %82 = vadd.xlane.f32.xlu0 %v81_v20  ;;  %v147_v2 = vsub.s32 %v144_v59, %v141_v58  ;;  %v154_v4 = vsub.s32 %v151_v60, %v141_v58  ;;  %v161_v13 = vsub.s32 %v158_v0, %v141_v58  ;;  %v121_v58 = vld [vmem:[%s764_s1] sm:$0x3] }
  0x12   :  { %v390_v60 = vld [vmem:[%s767_s4] sm:$0xff] }
  0x15   :  { %79 = vadd.xlane.f32.xlu1 %v78_v25  ;;  %67 = vadd.xlane.f32.xlu0 %v66_v26 }
  0x19   :  { %94 = vadd.xlane.f32.xlu1 %v93_v29  ;;  %88 = vadd.xlane.f32.xlu0 %v87_v30 }
  0x1d   :  { %91 = vadd.xlane.f32.xlu1 %v90_v34  ;;  %97 = vadd.xlane.f32.xlu0 %v96_v35 }
  0x21   :  { %100 = vadd.xlane.f32.xlu0 %v99_v38  ;;  %103 = vadd.xlane.f32.xlu1 %v102_v39 }
  0x92   :  { %v71_v48 = vpop.xlane.xlu1 %70  ;;  %v59_v49 = vpop.xlane.xlu0 %58 }
  0x93   :  { %v109_v1 = vmul.f32 0.015625, %v71_v48  ;;  %v105_v5 = vmul.f32 0.015625, %v59_v49 }
  0x95   :  { %v168_v17 = vrot.slane %v109_v1, %v142_v63  ;;  %v143_v19 = vrot.slane %v105_v5, %v142_v63 }
  0x96   :  { %v74_v50 = vpop.xlane.xlu1 %73  ;;  %v62_v51 = vpop.xlane.xlu0 %61 }
  0x97   :  { %v110_v3 = vmul.f32 0.015625, %v74_v50  ;;  %v106_v6 = vmul.f32 0.015625, %v62_v51 }
  0x99   :  { %v172_v18 = vrot.slane %v110_v3, %v147_v2  ;;  %v148_v20 = vrot.slane %v106_v6, %v147_v2  ;;  %v504_v3 = vld [vmem:[%s768_s5] ss:$0 sm:$0xff] }
  0x9a   :  { %v77_v52 = vpop.xlane.xlu1 %76  ;;  %v65_v53 = vpop.xlane.xlu0 %64 }
  0x9b   :  { %v111_v7 = vmul.f32 0.015625, %v77_v52  ;;  %v107_v8 = vmul.f32 0.015625, %v65_v53  ;;  %v173_v33 = vsel %vm149_vm2, %v172_v18, %v168_v17  ;;  %v150_v35 = vsel %vm149_vm2, %v148_v20, %v143_v19 }
  0x9d   :  { %v177_v21 = vrot.slane %v111_v7, %v154_v4  ;;  %v155_v22 = vrot.slane %v107_v8, %v154_v4 }
  0x9e   :  { %v86_v55 = vpop.xlane.xlu1 %85  ;;  %v83_v56 = vpop.xlane.xlu0 %82 }
  0x9f   :  { %v114_v11 = vmul.f32 0.015625, %v86_v55  ;;  %v113_v12 = vmul.f32 0.015625, %v83_v56  ;;  %v178_v36 = vsel %vm156_vm3, %v177_v21, %v173_v33  ;;  %v157_v41 = vsel %vm156_vm3, %v155_v22, %v150_v35 }
  0xa1   :  { %v191_v25 = vrot.slane %v114_v11, %v147_v2  ;;  %v187_v26 = vrot.slane %v113_v12, %v142_v63 }
  0xa2   :  { %v80_v61 = vpop.xlane.xlu1 %79  ;;  %v68_v62 = vpop.xlane.xlu0 %67 }
  0xa3   :  { %v112_v14 = vmul.f32 0.015625, %v80_v61  ;;  %v108_v15 = vmul.f32 0.015625, %v68_v62  ;;  %v192_v42 = vsel %vm149_vm2, %v191_v25, %v187_v26  ;;  %v391_v61 = vld [vmem:[%s767_s4 + $0x8] sm:$0xff] }
  0xa4   :  { %v585_v62 = vpack.c.bf16 %v391_v61, %v390_v60 }
  0xa5   :  { %v182_v29 = vrot.slane %v112_v14, %v161_v13  ;;  %v162_v30 = vrot.slane %v108_v15, %v161_v13 }
  0xa6   :  { %v95_v9 = vpop.xlane.xlu1 %94  ;;  %v89_v10 = vpop.xlane.xlu0 %88 }
  0xa7   :  { %v115_v16 = vmul.f32 0.015625, %v89_v10  ;;  %v117_v31 = vmul.f32 0.015625, %v95_v9  ;;  %v183_v46 = vsel %vm163_vm4, %v182_v29, %v178_v36  ;;  %v164_v47 = vsel %vm163_vm4, %v162_v30, %v157_v41 }
  0xa8   :  { %v223_v55 = vsel %vm222_vm5, %v183_v46, %v164_v47 }
  0xa9   :  { %v196_v32 = vrot.slane %v115_v16, %v154_v4  ;;  %v206_v48 = vrot.slane %v117_v31, %v142_v63 }
  0xaa   :  { %v92_v23 = vpop.xlane.xlu1 %91  ;;  %v98_v24 = vpop.xlane.xlu0 %97 }
  0xab   :  { %v116_v27 = vmul.f32 0.015625, %v92_v23  ;;  %v118_v28 = vmul.f32 0.015625, %v98_v24  ;;  %v197_v49 = vsel %vm156_vm3, %v196_v32, %v192_v42 }
  0xad   :  { %v201_v34 = vrot.slane %v116_v27, %v161_v13  ;;  %v210_v37 = vrot.slane %v118_v28, %v147_v2 }
  0xae   :  { %v101_v38 = vpop.xlane.xlu0 %100  ;;  %v104_v39 = vpop.xlane.xlu1 %103 }
  0xaf   :  { %v119_v43 = vmul.f32 0.015625, %v101_v38  ;;  %v120_v45 = vmul.f32 0.015625, %v104_v39  ;;  %v202_v52 = vsel %vm163_vm4, %v201_v34, %v197_v49  ;;  %v211_v53 = vsel %vm149_vm2, %v210_v37, %v206_v48 }
  0xb0   :  { %v225_v57 = vsel %vm224_vm6, %v202_v52, %v223_v55 }
  0xb1   :  { %v215_v50 = vrot.slane %v119_v43, %v154_v4  ;;  %v220_v51 = vrot.slane %v120_v45, %v161_v13 }
  0xb3   :  { %v216_v54 = vsel %vm156_vm3, %v215_v50, %v211_v53 }
  0xb4   :  { %v221_v56 = vsel %vm163_vm4, %v220_v51, %v216_v54 }
  0xb5   :  { %v227_v59 = vsel %vm226_vm7, %v221_v56, %v225_v57 }
  0xb6   :  { %556 = vmatpush3.msk.msra.mxu0 %vm232_vm8, %v227_v59 }
  0xb7   :  { %558 = vmatmul.mubr.msk.f32.vlgmr.msra.gmra.mrb[0].mxu0 %vm228_vm9, %v121_v58  ;;  %584 = vmatprep.subr.bf16.mxu0 %v621_v44  ;;  %v502_v44 = vld [vmem:[%s766_s3] ss:$0 sm:$0xff]  ;;  %s622_s3 = smov [#allocation2]  }
  0xb8   :  { %575 = vmatprep.mubr.msk.f32.mxu0 %vm620_vm1, %v619_v40  ;;  %586 = vmatpush3.bf16.msra.mxu0 %v585_v62  ;;  %s492_s4 = sshll.u32 %s622_s3, 4  ;;  %s493_s4 = int_to_ptr.vmem [resolvable:$true] %s492_s4 }
  0xb9   :  { %s595_s5 = scalar_lea.vmem %s493_s4, 32  ;;  %p600_p1 = scmp.lt.s32.totalorder %s493_s4, %s493_s4 }
  0xba   :  { %p596_p0 = scmp.ne.s32.totalorder %s493_s4, %s595_s5  ;;  %p601_p2 = scmp.lt.s32.totalorder %s595_s5, %s595_s5 }
  0xbc   :  { %p602_p3 = por %p601_p2, %p600_p1 }
  0xbe   :  { %p603_p4 = pnand %p602_p3, %p596_p0 }
 0x18a   :  { %v301_v63 = vpop.f32.mrb[0].mxu0 }
 0x18b   :  { %v559_v0 = vpop.f32.mrb[1].mxu0  ;;  %569 = vmatmul.mubr.msk.f32.vlgmr.msra.gmra.mrb[0].mxu1 %vm316_vm10, %v301_v63 }
 0x25e   :  { %v386_v1 = vpop.f32.mrb[0].mxu1 }
 0x25f   :  { %v387_v40 = vadd.f32 %v502_v44, %v386_v1  ;;  %v570_v2 = vpop.f32.mrb[1].mxu1 }
 0x261   :  { %576 = vmatmul.mubr.msk.f32.vlgmr.msra.gmra.mrb[2].mxu0 %vm399_vm11, %v387_v40 }
 0x334   :  { %v469_v4 = vpop.f32.mrb[2].mxu0 }
 0x335   :  { %v470_v5 = vadd.f32 %v504_v3, %v469_v4  ;;  %v577_v6 = vpop.f32.mrb[3].mxu0 }
 0x337   :  { %v474_v7 = vsel %vm473_vm12, %v470_v5, -inf }
 0x338   :  { %475 = vmax.xlane.f32.xlu0 %v474_v7 }
 0x3c5   :  { %v476_v8 = vpop.xlane.xlu0 %475 }
 0x3c6   :  { %v477_v9 = vsub.f32 %v470_v5, %v476_v8 }
 0x3c8   :  { %v478_v10 = vmul.f32 1.442695, %v477_v9 }
 0x3ca   :  { %591 = vpow2.f32 %v478_v10 }
 0x3d4   :  { %v592_v11 = vpop.eup %591 }
 0x3d5   :  { %v480_v12 = vsel %vm473_vm12, %v592_v11, 0.0 }
 0x3d6   :  { %481 = vadd.xlane.f32.xlu1 %v480_v12 }
 0x463   :  { %v482_v13 = vpop.xlane.xlu1 %481 }
 0x464   :  { %593 = vrcp.f32 %v482_v13 }
 0x46e   :  { %v594_v14 = vpop.eup %593 }
 0x46f   :  { %v484_v15 = vmul.f32 %v594_v14, %v592_v11 }
 0x471   :  { %485 = vst.msk [vmem:[#allocation2] sm:$0x3] %vm473_vm12, %v484_v15 }
 0x472   :  { %606 = shalt.err (!%p603_p4)
}
 0x473   :  { %s607_s30 = scalar_lea.hbm %s769_s6, 32 }
 0x474   :  { %p608_p5 = scmp.ne.s32.totalorder %s769_s6, %s607_s30  ;;  %p611_p6 = scmp.lt.u32.totalorder %s607_s30, %s769_s6 }
 0x476   :  { %p613_p7 = pnand %p611_p6, %p608_p5 }
 0x478   :  { %616 = shalt.err (!%p613_p7)
}
 0x479   :  { %495 = dma.vmem_to_hbm [thread:$0]  %s493_s4, 32, %s769_s6, [#allocation3]  }
 0x47a   :  { %617 = dma.done.wait [#allocation3], 32  }
 0x47b   :  { %618 = vsyncadd [#allocation3], 4294967264 }
 0x47c   :  { %499 = vsyncpa [#allocation3], 1 }

// kernel: resnet_forward_batched.11
= control target key start
LH: loop header
LB: loop body
LE: loop exit
PB: predicated region body
PF: predicated region fallthrough
CT: control target
= control target key end

     0   :  { %s1373_s15 = smov 0   ;;  %s1532_s0 = inlined_call_operand.vmem [shape: bf16[4,32,122], index: 0, kind: input, shape index: {}]   ;;  %s1533_s1 = inlined_call_operand.vmem [shape: bf16[9,32,32], index: 1, kind: input, shape index: {}]   ;;  %s1534_s2 = inlined_call_operand.vmem [shape: f32[32,1], index: 2, kind: input, shape index: {}]   ;;  %s1535_s3 = inlined_call_operand.vmem [shape: f32[1,100], index: 3, kind: input, shape index: {}]   ;;  %s1536_s4 = inlined_call_operand.vmem [shape: bf16[4,32,122], index: 4, kind: output, shape index: {}]  }
   0x1 LB: > { %s1058_s16 = sadd.s32 4294967295, %s1336_s15   ;;  %p1062_p0 = scmp.ge.s32.totalorder %s1336_s15, 1  ;;  %s1336_s15 = sphi %s1373_s15, %s14_s15  }
   0x2   : > { %p162_p1 = scmp.lt.s32.totalorder %s1336_s15, 5 }
   0x4   : > { %p163_p2 = pnand %p1062_p0, %p162_p1 }
   0x5   : > { %p188_p3 = scmp.lt.s32.totalorder (!%p163_p2), %s1058_s16, 3  ;;  %vm238_vm0 = vcmask (!%p163_p2), 261120   ;;  %v1312_v0 = vld [vmem:[%s1533_s1 + $0x40] sm:$0xff] (!%p163_p2)   ;;  %v1314_v1 = vld [vmem:[%s1533_s1 + $0x10] sm:$0xff] (!%p163_p2)   ;;  %s1338_s25 = smov (!%p163_p2), 117   ;;  %v922_v4 = vld [vmem:[%s1534_s2 + $0x8] sm:$0xff] (!%p163_p2) }
   0x6   : > { %166 = sbr.rel (%p163_p2) target bundleno = 534 (0x216), region = 36  ;;  %1222 = vmatprep.mubr.msk.bf16.mxu0 (!%p163_p2), %vm238_vm0, %v1312_v0  ;;  %1190 = vmatprep.mubr.msk.bf16.mxu1 (!%p163_p2), %vm238_vm0, %v1314_v1  ;;  %s1339_s26 = smov (!%p163_p2), 127   ;;  %v921_v5 = vld [vmem:[%s1534_s2] sm:$0xff] (!%p163_p2)  ;;  %v1346_v6 = vmov (!%p163_p2), 0   ;;  %v923_v7 = vld [vmem:[%s1534_s2 + $0x10] sm:$0xff] (!%p163_p2)  ;;  %v924_v8 = vld [vmem:[%s1534_s2 + $0x18] sm:$0xff] (!%p163_p2) }
   0x7   : > { %s1340_s27 = smov (!%p163_p2), 116   ;;  %s1341_s28 = smov (!%p163_p2), 108   ;;  %1309 = vset.pattern.permute.xlu1 (!%p163_p2), %v1346_v6  ;;  %1308 = vset.pattern.permute.xlu0 (!%p163_p2), %v1346_v6  ;;  %v1313_v13 = vld [vmem:[%s1533_s1 + $0x48] sm:$0xff] (!%p163_p2)   ;;  %v1316_v16 = vld [vmem:[%s1533_s1 + $0x50] sm:$0xff] (!%p163_p2)   ;;  %v1315_v17 = vld [vmem:[%s1533_s1 + $0x18] sm:$0xff] (!%p163_p2)   ;;  %vm964_vm1 = vcmask (!%p163_p2), 84992  }
   0x8   : > { %s1342_s29 = smov (!%p163_p2), 126   ;;  %s1343_s30 = smov (!%p163_p2), 107   ;;  %v1318_v19 = vld [vmem:[%s1533_s1] sm:$0xff] (!%p163_p2)   ;;  %v1317_v21 = vld [vmem:[%s1533_s1 + $0x58] sm:$0xff] (!%p163_p2)   ;;  %v1319_v24 = vld [vmem:[%s1533_s1 + $0x8] sm:$0xff] (!%p163_p2)   ;;  %vm993_vm2 = vcmask (!%p163_p2), 904280  }
   0x9   : > { %s1344_s5 = smov (!%p163_p2), 118   ;;  %s1345_s6 = smov (!%p163_p2), 106   ;;  %v1320_v22 = vld [vmem:[%s1533_s1 + $0x60] sm:$0xff] (!%p163_p2)   ;;  %v1321_v29 = vld [vmem:[%s1533_s1 + $0x68] sm:$0xff] (!%p163_p2)   ;;  %v1324_v30 = vld [vmem:[%s1533_s1 + $0x70] sm:$0xff] (!%p163_p2)   ;;  %vm998_vm3 = vcmask (!%p163_p2), 995192  }
   0xa   : > { %v1322_v27 = vld [vmem:[%s1533_s1 + $0x20] sm:$0xff] (!%p163_p2)   ;;  %v1323_v32 = vld [vmem:[%s1533_s1 + $0x28] sm:$0xff] (!%p163_p2)   ;;  %v1326_v35 = vld [vmem:[%s1533_s1 + $0x30] sm:$0xff] (!%p163_p2)  }
   0xb   : > { %v1325_v36 = vld [vmem:[%s1533_s1 + $0x78] sm:$0xff] (!%p163_p2)   ;;  %v1328_v37 = vld [vmem:[%s1533_s1 + $0x80] sm:$0xff] (!%p163_p2)   ;;  %v1329_v40 = vld [vmem:[%s1533_s1 + $0x88] sm:$0xff] (!%p163_p2)  }
   0xc   : > { %v1327_v39 = vld [vmem:[%s1533_s1 + $0x38] sm:$0xff] (!%p163_p2)   ;;  %v1137_v59 = vld [vmem:[%s1535_s3] ss:$0 sm:$0xff] (!%p163_p2) }
   0xd   : > { %s1538_s16 = smov (!%p188_p3, %s1058_s16), 3 }
   0xe   : > { %s1144_s19 = sshll.u32 %s1538_s16, 4 }
   0xf   : > { %s192_s24 = scalar_lea.vmem %s1532_s0, %s1144_s19 }
  0x10   : > { %v1396_v2 = vld [vmem:[%s192_s24] sm:$0xff]   ;;  %v1401_v3 = vld [vmem:[%s192_s24 + $0x8] sm:$0xff]  }
  0x11   : > { %536 = vrot.lane.b32.xlu0 %v1396_v2, %s1338_s25  ;;  %232 = vrot.lane.b32.xlu1 %v1396_v2, %s1339_s26 }
  0x15   : > { %538 = vrot.lane.b32.xlu0 %v1401_v3, %s1338_s25  ;;  %616 = vrot.lane.b32.xlu1 %v1396_v2, %s1340_s27 }
  0x19   : > { %234 = vrot.lane.b32.xlu0 %v1401_v3, %s1339_s26  ;;  %618 = vrot.lane.b32.xlu1 %v1401_v3, %s1340_s27 }
  0x1d   : > { %696 = vrot.lane.b32.xlu0 %v1396_v2, %s1341_s28  ;;  %698 = vrot.lane.b32.xlu1 %v1401_v3, %s1341_s28 }
  0x21   : > { %376 = vrot.lane.b32.xlu0 %v1396_v2, %s1342_s29  ;;  %776 = vrot.lane.b32.xlu1 %v1396_v2, %s1343_s30 }
  0x25   : > { %378 = vrot.lane.b32.xlu0 %v1401_v3, %s1342_s29  ;;  %778 = vrot.lane.b32.xlu1 %v1401_v3, %s1343_s30  ;;  %s1504_s29 = scalar_lea.vmem %s1536_s4, %s1144_s19  ;;  %s1347_s30 = smov 11  }
  0x26   : > { %965 = vst.msk [vmem:[%s1504_s29] sm:$0xf] %vm964_vm1, %v1346_v6  ;;  %966 = vst.msk [vmem:[%s1504_s29 + $0x4] sm:$0xf] %vm964_vm1, %v1346_v6 }
  0x27   : > { %967 = vst.msk [vmem:[%s1504_s29 + $0x8] sm:$0xf] %vm964_vm1, %v1346_v6  ;;  %968 = vst.msk [vmem:[%s1504_s29 + $0xc] sm:$0xf] %vm964_vm1, %v1346_v6 }
  0x29   : > { %456 = vrot.lane.b32.xlu0 %v1396_v2, %s1344_s5  ;;  %856 = vrot.lane.b32.xlu1 %v1396_v2, %s1345_s6 }
  0x2d   : > { %458 = vrot.lane.b32.xlu0 %v1401_v3, %s1344_s5  ;;  %858 = vrot.lane.b32.xlu1 %v1401_v3, %s1345_s6 }
  0x31   : > { %932 = vperm.xlu1 %1309, %v922_v4   ;;  %927 = vperm.xlu0 %1308, %v921_v5  }
  0x35   : > { %937 = vperm.xlu1 %1309, %v923_v7   ;;  %942 = vperm.xlu0 %1308, %v924_v8  }
  0x83   : > { %v537_v9 = vpop.permute.xlu0 %536  ;;  %v233_v10 = vpop.permute.xlu1 %232 }
  0x84   : > { %1218 = vmatprep.subr.bf16.mxu0 %v537_v9  ;;  %1186 = vmatprep.subr.bf16.mxu1 %v233_v10 }
  0x85   : > { %1219 = vmatpush3.bf16.msra.mxu0 %v537_v9  ;;  %1187 = vmatpush3.bf16.msra.mxu1 %v233_v10 }
  0x87   : > { %v539_v11 = vpop.permute.xlu0 %538  ;;  %v617_v12 = vpop.permute.xlu1 %616 }
  0x88   : > { %1220 = vmatprep.subr.bf16.mxu0 %v539_v11 }
  0x89   : > { %1221 = vmatpush3.bf16.msra.mxu0 %v539_v11 }
  0x8a   : > { %1226 = vmatprep.subr.bf16.mxu0 %v617_v12 }
  0x8b   : > { %v235_v14 = vpop.permute.xlu0 %234  ;;  %v619_v15 = vpop.permute.xlu1 %618 }
  0x8c   : > { %1188 = vmatprep.subr.bf16.mxu1 %v235_v14  ;;  %1223 = vmatmul.mubr.msk.bf16.vlgmr.msra.gmra.mrb[0].mxu0 %vm238_vm0, %v1313_v13 }
  0x8d   : > { %1189 = vmatpush3.bf16.msra.mxu1 %v235_v14  ;;  %1227 = vmatpush3.bf16.msra.mxu0 %v617_v12 }
  0x8e   : > { %1228 = vmatprep.subr.bf16.mxu0 %v619_v15  ;;  %1194 = vmatprep.subr.bf16.mxu1 %v1396_v2 }
  0x8f   : > { %v697_v18 = vpop.permute.xlu0 %696  ;;  %1230 = vmatprep.mubr.msk.bf16.mxu0 %vm238_vm0, %v1316_v16  ;;  %v699_v23 = vpop.permute.xlu1 %698 }
  0x90   : > { %1191 = vmatmul.mubr.msk.bf16.vlgmr.msra.gmra.mrb[0].mxu1 %vm238_vm0, %v1315_v17 }
  0x91   : > { %1229 = vmatpush3.bf16.msra.mxu0 %v619_v15  ;;  %1195 = vmatpush3.bf16.msra.mxu1 %v1396_v2 }
  0x92   : > { %1234 = vmatprep.subr.bf16.mxu0 %v697_v18  ;;  %1196 = vmatprep.subr.bf16.mxu1 %v1401_v3 }
  0x93   : > { %1198 = vmatprep.mubr.msk.bf16.mxu1 %vm238_vm0, %v1318_v19  ;;  %v377_v20 = vpop.permute.xlu0 %376  ;;  %v777_v25 = vpop.permute.xlu1 %776 }
  0x95   : > { %1197 = vmatpush3.bf16.msra.mxu1 %v1401_v3 }
  0x96   : > { %1202 = vmatprep.subr.bf16.mxu1 %v377_v20 }
  0x97   : > { %v379_v26 = vpop.permute.xlu0 %378  ;;  %v779_v31 = vpop.permute.xlu1 %778 }
  0x98   : > { %1231 = vmatmul.mubr.msk.bf16.vlgmr.msra.gmra.mrb[0].mxu0 %vm238_vm0, %v1317_v21 }
  0x99   : > { %1235 = vmatpush3.bf16.msra.mxu0 %v697_v18  ;;  %1238 = vmatprep.mubr.msk.bf16.mxu0 %vm238_vm0, %v1320_v22 }
  0x9a   : > { %1236 = vmatprep.subr.bf16.mxu0 %v699_v23 }
  0x9b   : > { %v457_v28 = vpop.permute.xlu0 %456  ;;  %v857_v33 = vpop.permute.xlu1 %856 }
  0x9c   : > { %1199 = vmatmul.mubr.msk.bf16.vlgmr.msra.gmra.mrb[0].mxu1 %vm238_vm0, %v1319_v24 }
  0x9d   : > { %1237 = vmatpush3.bf16.msra.mxu0 %v699_v23  ;;  %1203 = vmatpush3.bf16.msra.mxu1 %v377_v20 }
  0x9e   : > { %1242 = vmatprep.subr.bf16.mxu0 %v777_v25  ;;  %1204 = vmatprep.subr.bf16.mxu1 %v379_v26 }
  0x9f   : > { %1206 = vmatprep.mubr.msk.bf16.mxu1 %vm238_vm0, %v1322_v27  ;;  %v459_v34 = vpop.permute.xlu0 %458  ;;  %v859_v38 = vpop.permute.xlu1 %858 }
  0xa1   : > { %1205 = vmatpush3.bf16.msra.mxu1 %v379_v26 }
  0xa2   : > { %1210 = vmatprep.subr.bf16.mxu1 %v457_v28 }
  0xa4   : > { %1239 = vmatmul.mubr.msk.bf16.vlgmr.msra.gmra.mrb[0].mxu0 %vm238_vm0, %v1321_v29 }
  0xa5   : > { %1243 = vmatpush3.bf16.msra.mxu0 %v777_v25  ;;  %1246 = vmatprep.mubr.msk.bf16.mxu0 %vm238_vm0, %v1324_v30 }
  0xa6   : > { %1244 = vmatprep.subr.bf16.mxu0 %v779_v31 }
  0xa8   : > { %1207 = vmatmul.mubr.msk.bf16.vlgmr.msra.gmra.mrb[0].mxu1 %vm238_vm0, %v1323_v32 }
  0xa9   : > { %1245 = vmatpush3.bf16.msra.mxu0 %v779_v31  ;;  %1211 = vmatpush3.bf16.msra.mxu1 %v457_v28 }
  0xaa   : > { %1250 = vmatprep.subr.bf16.mxu0 %v857_v33  ;;  %1212 = vmatprep.subr.bf16.mxu1 %v459_v34 }
  0xab   : > { %1214 = vmatprep.mubr.msk.bf16.mxu1 %vm238_vm0, %v1326_v35 }
  0xad   : > { %1213 = vmatpush3.bf16.msra.mxu1 %v459_v34 }
  0xb0   : > { %1247 = vmatmul.mubr.msk.bf16.vlgmr.msra.gmra.mrb[0].mxu0 %vm238_vm0, %v1325_v36  ;;  %v933_v44 = vpop.permute.xlu1 %932  ;;  %v928_v46 = vpop.permute.xlu0 %927 }
  0xb1   : > { %1251 = vmatpush3.bf16.msra.mxu0 %v857_v33  ;;  %1254 = vmatprep.mubr.msk.bf16.mxu0 %vm238_vm0, %v1328_v37 }
  0xb2   : > { %1252 = vmatprep.subr.bf16.mxu0 %v859_v38 }
  0xb4   : > { %1215 = vmatmul.mubr.msk.bf16.vlgmr.msra.gmra.mrb[0].mxu1 %vm238_vm0, %v1327_v39  ;;  %v938_v48 = vpop.permute.xlu1 %937  ;;  %v943_v53 = vpop.permute.xlu0 %942 }
  0xb5   : > { %1253 = vmatpush3.bf16.msra.mxu0 %v859_v38 }
  0xbc   : > { %1255 = vmatmul.mubr.msk.bf16.vlgmr.msra.gmra.mrb[0].mxu0 %vm238_vm0, %v1329_v40 }
 0x187   : > { %v1216_v41 = vpop.f32.mrb[0].mxu1 }
 0x188   : > { %v502_v42 = vpop.f32.mrb[1].mxu1 }
 0x189   : > { %v1217_v43 = vpop.f32.mrb[2].mxu1 }
 0x18a   : > { %v505_v45 = vpop.f32.mrb[3].mxu1 }
 0x18f   : > { %v1256_v47 = vpop.f32.mrb[0].mxu0 }
 0x190   : > { %v1258_v49 = vadd.f32 %v1256_v47, %v1216_v41  ;;  %v902_v50 = vpop.f32.mrb[1].mxu0 }
 0x191   : > { %v1259_v51 = vadd.f32 %v902_v50, %v502_v42  ;;  %v1257_v52 = vpop.f32.mrb[2].mxu0 }
 0x192   : > { %v947_v54 = vadd.f32 %v1258_v49, %v938_v48  ;;  %v1260_v55 = vadd.f32 %v1257_v52, %v1217_v43  ;;  %v905_v56 = vpop.f32.mrb[3].mxu0 }
 0x193   : > { %v945_v57 = vadd.f32 %v1259_v51, %v928_v46  ;;  %v1261_v58 = vadd.f32 %v905_v56, %v505_v45 }
 0x194   : > { %v948_v60 = vadd.f32 %v1260_v55, %v943_v53  ;;  %v951_v62 = vmax.f32 %v947_v54, 0.0 }
 0x195   : > { %v949_v61 = vmax.f32 %v945_v57, 0.0  ;;  %v946_v63 = vadd.f32 %v1261_v58, %v933_v44 }
 0x196   : > { %v952_v1 = vmax.f32 %v948_v60, 0.0  ;;  %v962_v3 = vmul.f32 %v1137_v59, %v951_v62 }
 0x197   : > { %v950_v0 = vmax.f32 %v946_v63, 0.0  ;;  %v960_v2 = vmul.f32 %v1137_v59, %v949_v61 }
 0x198   : > { %v963_v7 = vmul.f32 %v1137_v59, %v952_v1  ;;  %v1148_v9 = vpack.c.bf16 %v962_v3, %v962_v3 }
 0x199   : > { %v1146_v4 = vpack.c.bf16 %v960_v2, %v960_v2  ;;  %v961_v5 = vmul.f32 %v1137_v59, %v950_v0 }
 0x19a   : > { %v1149_v10 = vpack.c.bf16 %v963_v7, %v963_v7 }
 0x19b   : > { %981 = vrot.lane.b32.xlu1 %v1146_v4, %s1347_s30  ;;  %v1147_v8 = vpack.c.bf16 %v961_v5, %v961_v5 }
 0x19d   : > { %983 = vrot.lane.b32.xlu0 %v1147_v8, %s1347_s30 }
 0x19f   : > { %985 = vrot.lane.b32.xlu1 %v1148_v9, %s1347_s30 }
 0x1a1   : > { %987 = vrot.lane.b32.xlu0 %v1149_v10, %s1347_s30 }
 0x20d   : > { %v982_v11 = vpop.permute.xlu1 %981 }
 0x20e   : > { %994 = vst.msk [vmem:[%s1504_s29] sm:$0xf] %vm993_vm2, %v982_v11 }
 0x20f   : > { %999 = vst.msk [vmem:[%s1504_s29] sm:$0xf] %vm998_vm3, %v1346_v6  ;;  %v984_v12 = vpop.permute.xlu0 %983 }
 0x210   : > { %995 = vst.msk [vmem:[%s1504_s29 + $0x4] sm:$0xf] %vm993_vm2, %v984_v12 }
 0x211   : > { %1000 = vst.msk [vmem:[%s1504_s29 + $0x4] sm:$0xf] %vm998_vm3, %v1346_v6  ;;  %v986_v13 = vpop.permute.xlu1 %985 }
 0x212   : > { %996 = vst.msk [vmem:[%s1504_s29 + $0x8] sm:$0xf] %vm993_vm2, %v986_v13 }
 0x213   : > { %1001 = vst.msk [vmem:[%s1504_s29 + $0x8] sm:$0xf] %vm998_vm3, %v1346_v6  ;;  %v988_v14 = vpop.permute.xlu0 %987 }
 0x214   : > { %997 = vst.msk [vmem:[%s1504_s29 + $0xc] sm:$0xf] %vm993_vm2, %v988_v14 }
 0x215   : > { %1002 = vst.msk [vmem:[%s1504_s29 + $0xc] sm:$0xf] %vm998_vm3, %v1346_v6 }
 0x216 PF: > { %s14_s15 = sadd.s32 1, %s1336_s15  }
 0x217   : > { %p11_p4 = scmp.ge.s32.totalorder %s14_s15, 6  }
 0x219   :  { %13 = sbr.rel (!%p11_p4) target bundleno = 1 (0x1), region = 74 }

// kernel: resnet_forward_batched.12
= control target key start
LH: loop header
LB: loop body
LE: loop exit
PB: predicated region body
PF: predicated region fallthrough
CT: control target
= control target key end

     0   :  { %s1491_s18 = smov 0   ;;  %s1655_s0 = inlined_call_operand.vmem [shape: bf16[4,32,122], index: 0, kind: input, shape index: {}]   ;;  %s1656_s1 = inlined_call_operand.vmem [shape: bf16[9,32,32], index: 1, kind: input, shape index: {}]   ;;  %s1657_s2 = inlined_call_operand.vmem [shape: f32[32,1], index: 2, kind: input, shape index: {}]   ;;  %s1658_s3 = inlined_call_operand.vmem [shape: f32[1,100], index: 3, kind: input, shape index: {}]   ;;  %s1659_s4 = inlined_call_operand.vmem [shape: bf16[4,32,122], index: 4, kind: input, shape index: {}]   ;;  %s1660_s5 = inlined_call_operand.vmem [shape: bf16[4,32,122], index: 5, kind: output, shape index: {}]  }
   0x1 LB: > { %s1145_s19 = sadd.s32 4294967295, %s1449_s18   ;;  %p1149_p0 = scmp.ge.s32.totalorder %s1449_s18, 1  ;;  %s1449_s18 = sphi %s1491_s18, %s15_s18  }
   0x2   : > { %p197_p1 = scmp.lt.s32.totalorder %s1449_s18, 5 }
   0x4   : > { %p198_p2 = pnand %p1149_p0, %p197_p1 }
   0x5   : > { %p230_p3 = scmp.lt.s32.totalorder (!%p198_p2), %s1145_s19, 3  ;;  %vm285_vm0 = vcmask (!%p198_p2), 261120   ;;  %v1421_v0 = vld [vmem:[%s1656_s1 + $0x40] sm:$0xff] (!%p198_p2)   ;;  %v1423_v1 = vld [vmem:[%s1656_s1 + $0x10] sm:$0xff] (!%p198_p2)   ;;  %s1451_s28 = smov (!%p198_p2), 117   ;;  %v969_v4 = vld [vmem:[%s1657_s2 + $0x8] sm:$0xff] (!%p198_p2) }
   0x6   : > { %201 = sbr.rel (%p198_p2) target bundleno = 536 (0x218), region = 40  ;;  %1321 = vmatprep.mubr.msk.bf16.mxu0 (!%p198_p2), %vm285_vm0, %v1421_v0  ;;  %1289 = vmatprep.mubr.msk.bf16.mxu1 (!%p198_p2), %vm285_vm0, %v1423_v1  ;;  %s1452_s29 = smov (!%p198_p2), 127   ;;  %v968_v5 = vld [vmem:[%s1657_s2] sm:$0xff] (!%p198_p2)  ;;  %v1459_v6 = vmov (!%p198_p2), 0   ;;  %v970_v13 = vld [vmem:[%s1657_s2 + $0x10] sm:$0xff] (!%p198_p2)  ;;  %v971_v14 = vld [vmem:[%s1657_s2 + $0x18] sm:$0xff] (!%p198_p2) }
   0x7   : > { %s1453_s30 = smov (!%p198_p2), 116   ;;  %s1454_s6 = smov (!%p198_p2), 108   ;;  %1408 = vset.pattern.permute.xlu1 (!%p198_p2), %v1459_v6  ;;  %1407 = vset.pattern.permute.xlu0 (!%p198_p2), %v1459_v6  ;;  %v1422_v21 = vld [vmem:[%s1656_s1 + $0x48] sm:$0xff] (!%p198_p2)   ;;  %v1425_v24 = vld [vmem:[%s1656_s1 + $0x50] sm:$0xff] (!%p198_p2)   ;;  %v1424_v25 = vld [vmem:[%s1656_s1 + $0x18] sm:$0xff] (!%p198_p2)   ;;  %vm1039_vm1 = vcmask (!%p198_p2), 84992  }
   0x8   : > { %s1455_s7 = smov (!%p198_p2), 126   ;;  %s1456_s8 = smov (!%p198_p2), 107   ;;  %v1427_v27 = vld [vmem:[%s1656_s1] sm:$0xff] (!%p198_p2)   ;;  %v1426_v29 = vld [vmem:[%s1656_s1 + $0x58] sm:$0xff] (!%p198_p2)   ;;  %v1428_v32 = vld [vmem:[%s1656_s1 + $0x8] sm:$0xff] (!%p198_p2)   ;;  %vm1068_vm2 = vcmask (!%p198_p2), 904280  }
   0x9   : > { %s1457_s9 = smov (!%p198_p2), 118   ;;  %s1458_s10 = smov (!%p198_p2), 106   ;;  %v1429_v30 = vld [vmem:[%s1656_s1 + $0x60] sm:$0xff] (!%p198_p2)   ;;  %v1430_v37 = vld [vmem:[%s1656_s1 + $0x68] sm:$0xff] (!%p198_p2)   ;;  %v1433_v38 = vld [vmem:[%s1656_s1 + $0x70] sm:$0xff] (!%p198_p2)   ;;  %vm1073_vm3 = vcmask (!%p198_p2), 995192  }
   0xa   : > { %v1431_v35 = vld [vmem:[%s1656_s1 + $0x20] sm:$0xff] (!%p198_p2)   ;;  %v1432_v40 = vld [vmem:[%s1656_s1 + $0x28] sm:$0xff] (!%p198_p2)   ;;  %v1435_v43 = vld [vmem:[%s1656_s1 + $0x30] sm:$0xff] (!%p198_p2)   ;;  %s1460_s12 = smov (!%p198_p2), 11  }
   0xb   : > { %v1434_v44 = vld [vmem:[%s1656_s1 + $0x78] sm:$0xff] (!%p198_p2)   ;;  %v1437_v45 = vld [vmem:[%s1656_s1 + $0x80] sm:$0xff] (!%p198_p2)   ;;  %v1438_v48 = vld [vmem:[%s1656_s1 + $0x88] sm:$0xff] (!%p198_p2)  }
   0xc   : > { %v1436_v47 = vld [vmem:[%s1656_s1 + $0x38] sm:$0xff] (!%p198_p2)  }
   0xd   : > { %s1662_s19 = smov (!%p230_p3, %s1145_s19), 3 }
   0xe   : > { %s1503_s22 = sshll.u32 %s1662_s19, 4 }
   0xf   : > { %s234_s27 = scalar_lea.vmem %s1655_s0, %s1503_s22  ;;  %s239_s17 = scalar_lea.vmem %s1659_s4, %s1503_s22 }
  0x10   : > { %v1512_v2 = vld [vmem:[%s234_s27] sm:$0xff]   ;;  %v1518_v3 = vld [vmem:[%s234_s27 + $0x8] sm:$0xff]  }
  0x11   : > { %583 = vrot.lane.b32.xlu0 %v1512_v2, %s1451_s28  ;;  %279 = vrot.lane.b32.xlu1 %v1512_v2, %s1452_s29  ;;  %v1248_v7 = vld [vmem:[%s239_s17 + $0x8] sm:$0xff]   ;;  %v1241_v8 = vld [vmem:[%s239_s17] sm:$0xff]  }
  0x12   : > { %v1246_v9 = vunpack.c.l.bf16 %v1248_v7  ;;  %v1247_v10 = vunpack.c.h.bf16 %v1248_v7  ;;  %v1242_v11 = vunpack.c.l.bf16 %v1241_v8  ;;  %v1243_v12 = vunpack.c.h.bf16 %v1241_v8 }
  0x14   : > { %v1414_v15 = vpack.i.bf16 %v1247_v10, %v1246_v9  ;;  %v1409_v16 = vpack.i.bf16 %v1243_v12, %v1242_v11  ;;  %v1226_v11 = vld [vmem:[%s1658_s3] ss:$0 sm:$0xff] }
  0x15   : > { %585 = vrot.lane.b32.xlu0 %v1518_v3, %s1451_s28  ;;  %663 = vrot.lane.b32.xlu1 %v1512_v2, %s1453_s30 }
  0x19   : > { %281 = vrot.lane.b32.xlu0 %v1518_v3, %s1452_s29  ;;  %665 = vrot.lane.b32.xlu1 %v1518_v3, %s1453_s30 }
  0x1d   : > { %743 = vrot.lane.b32.xlu0 %v1512_v2, %s1454_s6  ;;  %745 = vrot.lane.b32.xlu1 %v1518_v3, %s1454_s6 }
  0x21   : > { %423 = vrot.lane.b32.xlu0 %v1512_v2, %s1455_s7  ;;  %823 = vrot.lane.b32.xlu1 %v1512_v2, %s1456_s8 }
  0x25   : > { %425 = vrot.lane.b32.xlu0 %v1518_v3, %s1455_s7  ;;  %825 = vrot.lane.b32.xlu1 %v1518_v3, %s1456_s8 }
  0x29   : > { %503 = vrot.lane.b32.xlu0 %v1512_v2, %s1457_s9  ;;  %903 = vrot.lane.b32.xlu1 %v1512_v2, %s1458_s10 }
  0x2d   : > { %505 = vrot.lane.b32.xlu0 %v1518_v3, %s1457_s9  ;;  %905 = vrot.lane.b32.xlu1 %v1518_v3, %s1458_s10  ;;  %s1627_s10 = scalar_lea.vmem %s1660_s5, %s1503_s22 }
  0x2e   : > { %1040 = vst.msk [vmem:[%s1627_s10] sm:$0xf] %vm1039_vm1, %v1459_v6  ;;  %1041 = vst.msk [vmem:[%s1627_s10 + $0x4] sm:$0xf] %vm1039_vm1, %v1459_v6 }
  0x2f   : > { %1042 = vst.msk [vmem:[%s1627_s10 + $0x8] sm:$0xf] %vm1039_vm1, %v1459_v6  ;;  %1043 = vst.msk [vmem:[%s1627_s10 + $0xc] sm:$0xf] %vm1039_vm1, %v1459_v6 }
  0x31   : > { %979 = vperm.xlu1 %1408, %v969_v4   ;;  %974 = vperm.xlu0 %1407, %v968_v5  }
  0x35   : > { %984 = vperm.xlu1 %1408, %v970_v13   ;;  %989 = vperm.xlu0 %1407, %v971_v14  }
  0x39   : > { %1415 = vrot.lane.b32.xlu0 %v1414_v15, %s1451_s28  ;;  %1410 = vrot.lane.b32.xlu1 %v1409_v16, %s1451_s28 }
  0x83   : > { %v584_v17 = vpop.permute.xlu0 %583  ;;  %v280_v18 = vpop.permute.xlu1 %279 }
  0x84   : > { %1317 = vmatprep.subr.bf16.mxu0 %v584_v17  ;;  %1285 = vmatprep.subr.bf16.mxu1 %v280_v18 }
  0x85   : > { %1318 = vmatpush3.bf16.msra.mxu0 %v584_v17  ;;  %1286 = vmatpush3.bf16.msra.mxu1 %v280_v18 }
  0x87   : > { %v586_v19 = vpop.permute.xlu0 %585  ;;  %v664_v20 = vpop.permute.xlu1 %663 }
  0x88   : > { %1319 = vmatprep.subr.bf16.mxu0 %v586_v19 }
  0x89   : > { %1320 = vmatpush3.bf16.msra.mxu0 %v586_v19 }
  0x8a   : > { %1325 = vmatprep.subr.bf16.mxu0 %v664_v20 }
  0x8b   : > { %v282_v22 = vpop.permute.xlu0 %281  ;;  %v666_v23 = vpop.permute.xlu1 %665 }
  0x8c   : > { %1287 = vmatprep.subr.bf16.mxu1 %v282_v22  ;;  %1322 = vmatmul.mubr.msk.bf16.vlgmr.msra.gmra.mrb[0].mxu0 %vm285_vm0, %v1422_v21 }
  0x8d   : > { %1288 = vmatpush3.bf16.msra.mxu1 %v282_v22  ;;  %1326 = vmatpush3.bf16.msra.mxu0 %v664_v20 }
  0x8e   : > { %1327 = vmatprep.subr.bf16.mxu0 %v666_v23  ;;  %1293 = vmatprep.subr.bf16.mxu1 %v1512_v2 }
  0x8f   : > { %v744_v26 = vpop.permute.xlu0 %743  ;;  %1329 = vmatprep.mubr.msk.bf16.mxu0 %vm285_vm0, %v1425_v24  ;;  %v746_v31 = vpop.permute.xlu1 %745 }
  0x90   : > { %1290 = vmatmul.mubr.msk.bf16.vlgmr.msra.gmra.mrb[0].mxu1 %vm285_vm0, %v1424_v25 }
  0x91   : > { %1328 = vmatpush3.bf16.msra.mxu0 %v666_v23  ;;  %1294 = vmatpush3.bf16.msra.mxu1 %v1512_v2 }
  0x92   : > { %1333 = vmatprep.subr.bf16.mxu0 %v744_v26  ;;  %1295 = vmatprep.subr.bf16.mxu1 %v1518_v3 }
  0x93   : > { %1297 = vmatprep.mubr.msk.bf16.mxu1 %vm285_vm0, %v1427_v27  ;;  %v424_v28 = vpop.permute.xlu0 %423  ;;  %v824_v33 = vpop.permute.xlu1 %823 }
  0x95   : > { %1296 = vmatpush3.bf16.msra.mxu1 %v1518_v3 }
  0x96   : > { %1301 = vmatprep.subr.bf16.mxu1 %v424_v28 }
  0x97   : > { %v426_v34 = vpop.permute.xlu0 %425  ;;  %v826_v39 = vpop.permute.xlu1 %825 }
  0x98   : > { %1330 = vmatmul.mubr.msk.bf16.vlgmr.msra.gmra.mrb[0].mxu0 %vm285_vm0, %v1426_v29 }
  0x99   : > { %1334 = vmatpush3.bf16.msra.mxu0 %v744_v26  ;;  %1337 = vmatprep.mubr.msk.bf16.mxu0 %vm285_vm0, %v1429_v30 }
  0x9a   : > { %1335 = vmatprep.subr.bf16.mxu0 %v746_v31 }
  0x9b   : > { %v504_v36 = vpop.permute.xlu0 %503  ;;  %v904_v41 = vpop.permute.xlu1 %903 }
  0x9c   : > { %1298 = vmatmul.mubr.msk.bf16.vlgmr.msra.gmra.mrb[0].mxu1 %vm285_vm0, %v1428_v32 }
  0x9d   : > { %1336 = vmatpush3.bf16.msra.mxu0 %v746_v31  ;;  %1302 = vmatpush3.bf16.msra.mxu1 %v424_v28 }
  0x9e   : > { %1341 = vmatprep.subr.bf16.mxu0 %v824_v33  ;;  %1303 = vmatprep.subr.bf16.mxu1 %v426_v34 }
  0x9f   : > { %1305 = vmatprep.mubr.msk.bf16.mxu1 %vm285_vm0, %v1431_v35  ;;  %v506_v42 = vpop.permute.xlu0 %505  ;;  %v906_v46 = vpop.permute.xlu1 %905 }
  0xa1   : > { %1304 = vmatpush3.bf16.msra.mxu1 %v426_v34 }
  0xa2   : > { %1309 = vmatprep.subr.bf16.mxu1 %v504_v36 }
  0xa4   : > { %1338 = vmatmul.mubr.msk.bf16.vlgmr.msra.gmra.mrb[0].mxu0 %vm285_vm0, %v1430_v37 }
  0xa5   : > { %1342 = vmatpush3.bf16.msra.mxu0 %v824_v33  ;;  %1345 = vmatprep.mubr.msk.bf16.mxu0 %vm285_vm0, %v1433_v38 }
  0xa6   : > { %1343 = vmatprep.subr.bf16.mxu0 %v826_v39 }
  0xa8   : > { %1306 = vmatmul.mubr.msk.bf16.vlgmr.msra.gmra.mrb[0].mxu1 %vm285_vm0, %v1432_v40 }
  0xa9   : > { %1344 = vmatpush3.bf16.msra.mxu0 %v826_v39  ;;  %1310 = vmatpush3.bf16.msra.mxu1 %v504_v36 }
  0xaa   : > { %1349 = vmatprep.subr.bf16.mxu0 %v904_v41  ;;  %1311 = vmatprep.subr.bf16.mxu1 %v506_v42 }
  0xab   : > { %1313 = vmatprep.mubr.msk.bf16.mxu1 %vm285_vm0, %v1435_v43 }
  0xad   : > { %1312 = vmatpush3.bf16.msra.mxu1 %v506_v42 }
  0xb0   : > { %1346 = vmatmul.mubr.msk.bf16.vlgmr.msra.gmra.mrb[0].mxu0 %vm285_vm0, %v1434_v44  ;;  %v975_v49 = vpop.permute.xlu0 %974  ;;  %v980_v50 = vpop.permute.xlu1 %979 }
  0xb1   : > { %1350 = vmatpush3.bf16.msra.mxu0 %v904_v41  ;;  %1353 = vmatprep.mubr.msk.bf16.mxu0 %vm285_vm0, %v1437_v45 }
  0xb2   : > { %1351 = vmatprep.subr.bf16.mxu0 %v906_v46 }
  0xb4   : > { %1314 = vmatmul.mubr.msk.bf16.vlgmr.msra.gmra.mrb[0].mxu1 %vm285_vm0, %v1436_v47  ;;  %v990_v52 = vpop.permute.xlu0 %989  ;;  %v985_v56 = vpop.permute.xlu1 %984 }
  0xb5   : > { %1352 = vmatpush3.bf16.msra.mxu0 %v906_v46 }
  0xb8   : > { %v1416_v57 = vpop.permute.xlu0 %1415  ;;  %v1411_v58 = vpop.permute.xlu1 %1410 }
  0xbc   : > { %1354 = vmatmul.mubr.msk.bf16.vlgmr.msra.gmra.mrb[0].mxu0 %vm285_vm0, %v1438_v48 }
 0x187   : > { %v1315_v51 = vpop.f32.mrb[0].mxu1 }
 0x188   : > { %v549_v53 = vpop.f32.mrb[1].mxu1 }
 0x189   : > { %v1316_v54 = vpop.f32.mrb[2].mxu1 }
 0x18a   : > { %v552_v55 = vpop.f32.mrb[3].mxu1 }
 0x18f   : > { %v1355_v59 = vpop.f32.mrb[0].mxu0 }
 0x190   : > { %v1357_v60 = vadd.f32 %v1355_v59, %v1315_v51  ;;  %v949_v61 = vpop.f32.mrb[1].mxu0 }
 0x191   : > { %v1358_v62 = vadd.f32 %v949_v61, %v549_v53  ;;  %v1356_v63 = vpop.f32.mrb[2].mxu0 }
 0x192   : > { %v994_v0 = vadd.f32 %v1357_v60, %v985_v56  ;;  %v1359_v1 = vadd.f32 %v1356_v63, %v1316_v54  ;;  %v952_v2 = vpop.f32.mrb[3].mxu0 }
 0x193   : > { %v992_v3 = vadd.f32 %v1358_v62, %v975_v49  ;;  %v1360_v4 = vadd.f32 %v952_v2, %v552_v55 }
 0x194   : > { %v995_v5 = vadd.f32 %v1359_v1, %v990_v52  ;;  %v1439_v7 = vadd.low.f32.bf16 %v994_v0, %v1416_v57 }
 0x195   : > { %v1440_v8 = vadd.low.f32.bf16 %v992_v3, %v1411_v58  ;;  %v993_v9 = vadd.f32 %v1360_v4, %v980_v50 }
 0x196   : > { %v1441_v10 = vadd.high.f32.bf16 %v995_v5, %v1416_v57  ;;  %v1026_v12 = vmax.f32 %v1439_v7, 0.0 }
 0x197   : > { %v1024_v13 = vmax.f32 %v1440_v8, 0.0  ;;  %v1442_v14 = vadd.high.f32.bf16 %v993_v9, %v1411_v58 }
 0x198   : > { %v1027_v15 = vmax.f32 %v1441_v10, 0.0  ;;  %v1037_v20 = vmul.f32 %v1226_v11, %v1026_v12 }
 0x199   : > { %v1025_v16 = vmax.f32 %v1442_v14, 0.0  ;;  %v1035_v17 = vmul.f32 %v1226_v11, %v1024_v13 }
 0x19a   : > { %v1038_v22 = vmul.f32 %v1226_v11, %v1027_v15  ;;  %v1238_v23 = vpack.c.bf16 %v1037_v20, %v1037_v20 }
 0x19b   : > { %v1236_v18 = vpack.c.bf16 %v1035_v17, %v1035_v17  ;;  %v1036_v19 = vmul.f32 %v1226_v11, %v1025_v16 }
 0x19c   : > { %v1239_v24 = vpack.c.bf16 %v1038_v22, %v1038_v22 }
 0x19d   : > { %1056 = vrot.lane.b32.xlu1 %v1236_v18, %s1460_s12  ;;  %v1237_v21 = vpack.c.bf16 %v1036_v19, %v1036_v19 }
 0x19f   : > { %1058 = vrot.lane.b32.xlu0 %v1237_v21, %s1460_s12 }
 0x1a1   : > { %1060 = vrot.lane.b32.xlu1 %v1238_v23, %s1460_s12 }
 0x1a3   : > { %1062 = vrot.lane.b32.xlu0 %v1239_v24, %s1460_s12 }
 0x20f   : > { %v1057_v25 = vpop.permute.xlu1 %1056 }
 0x210   : > { %1069 = vst.msk [vmem:[%s1627_s10] sm:$0xf] %vm1068_vm2, %v1057_v25 }
 0x211   : > { %1074 = vst.msk [vmem:[%s1627_s10] sm:$0xf] %vm1073_vm3, %v1459_v6  ;;  %v1059_v26 = vpop.permute.xlu0 %1058 }
 0x212   : > { %1070 = vst.msk [vmem:[%s1627_s10 + $0x4] sm:$0xf] %vm1068_vm2, %v1059_v26 }
 0x213   : > { %1075 = vst.msk [vmem:[%s1627_s10 + $0x4] sm:$0xf] %vm1073_vm3, %v1459_v6  ;;  %v1061_v27 = vpop.permute.xlu1 %1060 }
 0x214   : > { %1071 = vst.msk [vmem:[%s1627_s10 + $0x8] sm:$0xf] %vm1068_vm2, %v1061_v27 }
 0x215   : > { %1076 = vst.msk [vmem:[%s1627_s10 + $0x8] sm:$0xf] %vm1073_vm3, %v1459_v6  ;;  %v1063_v28 = vpop.permute.xlu0 %1062 }
 0x216   : > { %1072 = vst.msk [vmem:[%s1627_s10 + $0xc] sm:$0xf] %vm1068_vm2, %v1063_v28 }
 0x217   : > { %1077 = vst.msk [vmem:[%s1627_s10 + $0xc] sm:$0xf] %vm1073_vm3, %v1459_v6 }
 0x218 PF: > { %s15_s18 = sadd.s32 1, %s1449_s18  }
 0x219   : > { %p12_p4 = scmp.ge.s32.totalorder %s15_s18, 6  }
 0x21b   :  { %14 = sbr.rel (!%p12_p4) target bundleno = 1 (0x1), region = 81 }

</bundles_post_ra>
